<compile_context>
chip_gen: v6e
topology: v6e:2x2x1
jax: 0.10.0
libtpu: 0.0.40
codegen_flags: <defaults>
</compile_context>

<pallas_src>
import jax
import jax.numpy as jnp
import numpy as np
from jax.experimental import pallas as pl
from jax.experimental.pallas import tpu as pltpu


# ----------------------------------------------------------------------------
# Pallas kernel: one grid step == one batch element, everything in VMEM.
# ----------------------------------------------------------------------------
def drblock_kernel(alphas_ref,           # SMEM (2,) f32: [alpha1, alpha2]
                   x_ref,                # VMEM (1, H, W, Cin)        bf16
                   wh_ref,               # VMEM (9*Cin, Cm)           bf16  folded head conv+BN
                   bh_ref,               # VMEM (1, Cm)               f32
                   wc_ref,               # VMEM (Cout, 9*2*Cm)        bf16  fused [conv1 | -conv2], transposed
                   bc_ref,               # VMEM (Cout, 1)             f32   [b1, -b2]
                   out_ref,              # VMEM (1, Cout, H*W)        f32
                   xpad_ref,             # scratch VMEM (H+2, W+2, Cin)   f32
                   a2pad_ref):           # scratch VMEM (H+2, W+2, 2*Cm)  f32
    H, W, Cin = x_ref.shape[1], x_ref.shape[2], x_ref.shape[3]
    Cm2 = a2pad_ref.shape[2]

    # ---- refresh only the zero halo of the padded scratch buffers ----------
    # (interiors are fully rewritten below; re-zeroing just the halo every
    #  step avoids the full per-step buffer clear and is correct even when
    #  the "parallel" batch axis is sharded across TensorCores.)
    def zero_halo(buf, c):
        buf[0:1, :, :] = jnp.zeros((1, W + 2, c), jnp.float32)
        buf[H + 1:H + 2, :, :] = jnp.zeros((1, W + 2, c), jnp.float32)
        buf[:, 0:1, :] = jnp.zeros((H + 2, 1, c), jnp.float32)
        buf[:, W + 1:W + 2, :] = jnp.zeros((H + 2, 1, c), jnp.float32)

    zero_halo(xpad_ref, Cin)
    zero_halo(a2pad_ref, Cm2)

    # ---- head: conv3x3 (+ folded BN) as a single im2col matmul -------------
    xpad_ref[1:H + 1, 1:W + 1, :] = x_ref[0].astype(jnp.float32)
    taps = [xpad_ref[dh:dh + H, dw:dw + W, :].reshape(H * W, Cin)
            for dh in range(3) for dw in range(3)]
    patches = jnp.concatenate(taps, axis=-1).astype(jnp.bfloat16)    # (H*W, 9*Cin)
    a1 = jnp.dot(patches, wh_ref[...],
                 preferred_element_type=jnp.float32) + bh_ref[...]   # (H*W, Cm) f32

    # ---- both PReLU branches, concatenated along channels ------------------
    alpha1 = alphas_ref[0]
    alpha2 = alphas_ref[1]
    a21 = jnp.where(a1 >= 0, a1, alpha1 * a1)          # prelu1(a1)
    a22 = jnp.where(a1 > 0, -alpha2 * a1, -a1)         # prelu2(-a1)
    a2 = jnp.concatenate([a21, a22], axis=-1)          # (H*W, 2*Cm) f32
    a2pad_ref[1:H + 1, 1:W + 1, :] = a2.reshape(H, W, Cm2)

    # ---- fused conv1 | conv2 as one im2col matmul ---------------------------
    # Block-diagonal weight [[w1, 0], [0, -w2]] folds the minus and the channel
    # concat; computed as wc @ patches.T so the result is already the
    # lane-dense (Cout, H*W) output block.
    taps2 = [a2pad_ref[dh:dh + H, dw:dw + W, :].reshape(H * W, Cm2)
             for dh in range(3) for dw in range(3)]
    patches2 = jnp.concatenate(taps2, axis=-1).astype(jnp.bfloat16)  # (H*W, 18*Cm)
    c_t = jax.lax.dot_general(
        wc_ref[...], patches2,
        dimension_numbers=(((1,), (1,)), ((), ())),
        preferred_element_type=jnp.float32)                          # (Cout, H*W) f32
    out_ref[0] = (c_t + bc_ref[...]).astype(out_ref.dtype)


# ----------------------------------------------------------------------------
# Wrapper: pack weights, launch the kernel over the batch grid.
# ----------------------------------------------------------------------------
def drblock_pallas(x_nchw, alphas, wh, bh, w1, b1, w2, b2):
    """x_nchw: (N, Cin, H, W).  wh/w1/w2: BN-folded HWIO conv weights."""
    N, Cin, H, W = x_nchw.shape
    Cm = wh.shape[3]
    Ch = w1.shape[3]
    Cout = 2 * Ch

    # channels-last for the kernel; bf16 halves the activation DMA bytes.
    x = jnp.transpose(x_nchw, (0, 2, 3, 1)).astype(jnp.bfloat16)      # (N,H,W,Cin)

    # head conv: flatten the 9 taps into the contraction dim.
    wh_flat = wh.reshape(9 * Cin, Cm).astype(jnp.bfloat16)            # (9*Cin, Cm)
    bh2 = bh.reshape(1, Cm).astype(jnp.float32)

    # fused conv1 | conv2 weight: per-tap block-diagonal [[w1, 0], [0, -w2]],
    # flattened over taps and pre-transposed to (Cout, 9*2*Cm).
    w1r = w1.reshape(9, Cm, Ch)
    w2r = w2.reshape(9, Cm, Ch)
    z = jnp.zeros_like(w1r)
    wc = jnp.concatenate(
        [jnp.concatenate([w1r, z], axis=2),
         jnp.concatenate([z, -w2r], axis=2)], axis=1)                 # (9, 2*Cm, Cout)
    wc_t = wc.reshape(9 * 2 * Cm, Cout).T.astype(jnp.bfloat16)        # (Cout, 18*Cm)
    bc_t = jnp.concatenate([b1, -b2]).reshape(Cout, 1).astype(jnp.float32)

    out_flat = pl.pallas_call(
        drblock_kernel,
        out_shape=jax.ShapeDtypeStruct((N, Cout, H * W), jnp.float32),
        grid_spec=pltpu.PrefetchScalarGridSpec(
            num_scalar_prefetch=0,
            grid=(N,),
            in_specs=[
                pl.BlockSpec(memory_space=pltpu.MemorySpace.SMEM),      # alphas
                pl.BlockSpec((1, H, W, Cin), lambda b: (b, 0, 0, 0)),   # x
                pl.BlockSpec((9 * Cin, Cm), lambda b: (0, 0)),          # head weight
                pl.BlockSpec((1, Cm), lambda b: (0, 0)),                # head bias
                pl.BlockSpec((Cout, 18 * Cm), lambda b: (0, 0)),        # fused weight (transposed)
                pl.BlockSpec((Cout, 1), lambda b: (0, 0)),              # fused bias
            ],
            out_specs=pl.BlockSpec((1, Cout, H * W), lambda b: (b, 0, 0)),
            scratch_shapes=[
                pltpu.VMEM((H + 2, W + 2, Cin), jnp.float32),
                pltpu.VMEM((H + 2, W + 2, 2 * Cm), jnp.float32),
            ],
        ),
        compiler_params=pltpu.CompilerParams(
            dimension_semantics=("parallel",),
            vmem_limit_bytes=32 * 1024 * 1024),
    )(alphas, x, wh_flat, bh2, wc_t, bc_t)

    # (N, Cout, H*W) -> (N, Cout, H, W): free reshape, already NCHW.
    return out_flat.reshape(N, Cout, H, W)


# ----------------------------------------------------------------------------
# Parameter construction: deterministic init + eval-mode BN folding.
# ----------------------------------------------------------------------------
def fold_conv_bn(w_oihw, b_o, gamma, beta, rmean, rvar, eps=1e-5):
    """Fold BatchNorm2d (eval mode) into a conv; return HWIO weight + bias."""
    scale = gamma / jnp.sqrt(rvar + eps)                     # (Cout,)
    w_folded = w_oihw * scale[:, None, None, None]           # (Cout,Cin,3,3)
    b_folded = (b_o - rmean) * scale + beta                  # (Cout,)
    w_hwio = jnp.transpose(w_folded, (2, 3, 1, 0))           # (3,3,Cin,Cout)
    return w_hwio.astype(jnp.float32), b_folded.astype(jnp.float32)


def make_params(key, in_c, mid_c, out_c):
    half = out_c // 2
    ks = jax.random.split(key, 16)

    def conv_init(k, cout, cin):
        kw, kb = jax.random.split(k)
        fan_in = cin * 9
        w = jax.random.normal(kw, (cout, cin, 3, 3), jnp.float32) / np.sqrt(fan_in)
        b = jax.random.normal(kb, (cout,), jnp.float32) * 0.1
        return w, b

    def bn_init(k, c):
        k1, k2, k3, k4 = jax.random.split(k, 4)
        gamma = 1.0 + 0.1 * jax.random.normal(k1, (c,), jnp.float32)
        beta = 0.1 * jax.random.normal(k2, (c,), jnp.float32)
        rmean = 0.1 * jax.random.normal(k3, (c,), jnp.float32)
        rvar = 1.0 + 0.1 * jax.random.uniform(k4, (c,), jnp.float32)
        return gamma, beta, rmean, rvar

    wh_raw, bh_raw = conv_init(ks[0], mid_c, in_c)
    w1_raw, b1_raw = conv_init(ks[1], half, mid_c)
    w2_raw, b2_raw = conv_init(ks[2], half, mid_c)

    wh, bh = fold_conv_bn(wh_raw, bh_raw, *bn_init(ks[3], mid_c))
    w1, b1 = fold_conv_bn(w1_raw, b1_raw, *bn_init(ks[4], half))
    w2, b2 = fold_conv_bn(w2_raw, b2_raw, *bn_init(ks[5], half))

    # nn.PReLU() default alpha = 0.25; use two distinct deterministic values.
    alphas = jnp.array([0.25, 0.20], jnp.float32)
    return alphas, wh, bh, w1, b1, w2, b2


# ----------------------------------------------------------------------------
# Pure-JAX reference (same folded params, same bf16 MXU operands).
# ----------------------------------------------------------------------------
def drblock_ref(x_nchw, alphas, wh, bh, w1, b1, w2, b2):
    x = jnp.transpose(x_nchw, (0, 2, 3, 1))

    def conv(v, w, b):
        y = jax.lax.conv_general_dilated(
            v.astype(jnp.bfloat16), w.astype(jnp.bfloat16),
            window_strides=(1, 1), padding="SAME",
            dimension_numbers=("NHWC", "HWIO", "NHWC"),
            preferred_element_type=jnp.float32)
        return y + b.astype(jnp.float32)

    a1 = conv(x, wh, bh)
    a21 = jnp.where(a1 >= 0, a1, alphas[0] * a1)
    a22 = jnp.where(a1 > 0, -alphas[1] * a1, -a1)
    c1 = conv(a21, w1, b1)
    c2 = conv(a22, w2, b2)
    out = jnp.concatenate([c1, -c2], axis=-1)
    return jnp.transpose(out, (0, 3, 1, 2))


if __name__ == "__main__":
    N, in_c, mid_c, out_c, H, W = 2, 4, 8, 8, 16, 16

    key = jax.random.PRNGKey(0)
    kx, kp = jax.random.split(key)
    x = jax.random.normal(kx, (N, in_c, H, W), jnp.float32)       # NCHW, like torch
    params = make_params(kp, in_c, mid_c, out_c)

    out = jax.block_until_ready(drblock_pallas(x, *params))
    ref = jax.block_until_ready(drblock_ref(x, *params))

    assert out.shape == (N, out_c, H, W), out.shape
    # Both paths use bf16 MXU operands with f32 accumulation; differences are
    # only rounding / summation-order noise.
    if not np.allclose(np.asarray(out), np.asarray(ref), atol=1e-2, rtol=1e-2):
        raise SystemExit("mismatch vs JAX reference")

    print("KERNEL_OK")
</pallas_src>

<mosaic_0001>
module attributes {stable_mosaic.version = 11 : i64} {
  func.func @drblock_kernel(%arg0: i32, %arg1: memref<2xf32, #tpu.memory_space<smem>>, %arg2: memref<1x16x16x4xbf16, #tpu.memory_space<vmem>>, %arg3: memref<36x8xbf16, #tpu.memory_space<vmem>>, %arg4: memref<1x8xf32, #tpu.memory_space<vmem>>, %arg5: memref<8x144xbf16, #tpu.memory_space<vmem>>, %arg6: memref<8x1xf32, #tpu.memory_space<vmem>>, %arg7: memref<1x8x256xf32, #tpu.memory_space<vmem>>, %arg8: memref<18x18x4xf32, #tpu.memory_space<vmem>>, %arg9: memref<18x18x16xf32, #tpu.memory_space<vmem>>) attributes {dimension_semantics = [#tpu.dimension_semantics<parallel>], iteration_bounds = array<i64: 2>, scalar_prefetch = 0 : i64, scratch_operands = 2 : i64, tpu.core_type = #tpu.core_type<tc>, window_params = [{transform_indices = @transform_0, window_bounds = array<i64: 2>}, {transform_indices = @transform_1, window_bounds = array<i64: 1, 16, 16, 4>}, {pipeline_mode = #tpu.pipeline_mode<synchronous>, transform_indices = @transform_2, window_bounds = array<i64: 36, 8>}, {pipeline_mode = #tpu.pipeline_mode<synchronous>, transform_indices = @transform_3, window_bounds = array<i64: 1, 8>}, {pipeline_mode = #tpu.pipeline_mode<synchronous>, transform_indices = @transform_4, window_bounds = array<i64: 8, 144>}, {pipeline_mode = #tpu.pipeline_mode<synchronous>, transform_indices = @transform_5, window_bounds = array<i64: 8, 1>}, {transform_indices = @transform_6, window_bounds = array<i64: 1, 8, 256>}]} {
    %cst = arith.constant 0.000000e+00 : f32
    %0 = vector.broadcast %cst : f32 to vector<1x18x4xf32>
    %c0 = arith.constant 0 : index
    %c0_0 = arith.constant 0 : index
    %c0_1 = arith.constant 0 : index
    %1 = vector.load %arg8[%c0, %c0_0, %c0_1] : memref<18x18x4xf32, #tpu.memory_space<vmem>>, vector<1x18x4xf32>
    tpu.vector_store %arg8[%c0, %c0_0, %c0_1], %0 {strides = array<i32>} : memref<18x18x4xf32, #tpu.memory_space<vmem>>, vector<1x18x4xf32>,
    %cst_2 = arith.constant 0.000000e+00 : f32
    %2 = vector.broadcast %cst_2 : f32 to vector<1x18x4xf32>
    %c17 = arith.constant 17 : index
    %c0_3 = arith.constant 0 : index
    %c0_4 = arith.constant 0 : index
    %3 = vector.load %arg8[%c17, %c0_3, %c0_4] : memref<18x18x4xf32, #tpu.memory_space<vmem>>, vector<1x18x4xf32>
    tpu.vector_store %arg8[%c17, %c0_3, %c0_4], %2 {strides = array<i32>} : memref<18x18x4xf32, #tpu.memory_space<vmem>>, vector<1x18x4xf32>,
    %cst_5 = arith.constant 0.000000e+00 : f32
    %4 = vector.broadcast %cst_5 : f32 to vector<18x1x4xf32>
    %c0_6 = arith.constant 0 : index
    %c0_7 = arith.constant 0 : index
    %c0_8 = arith.constant 0 : index
    %5 = vector.load %arg8[%c0_6, %c0_7, %c0_8] : memref<18x18x4xf32, #tpu.memory_space<vmem>>, vector<18x1x4xf32>
    tpu.vector_store %arg8[%c0_6, %c0_7, %c0_8], %4 {strides = array<i32>} : memref<18x18x4xf32, #tpu.memory_space<vmem>>, vector<18x1x4xf32>,
    %cst_9 = arith.constant 0.000000e+00 : f32
    %6 = vector.broadcast %cst_9 : f32 to vector<18x1x4xf32>
    %c0_10 = arith.constant 0 : index
    %c17_11 = arith.constant 17 : index
    %c0_12 = arith.constant 0 : index
    %7 = vector.load %arg8[%c0_10, %c17_11, %c0_12] : memref<18x18x4xf32, #tpu.memory_space<vmem>>, vector<18x1x4xf32>
    tpu.vector_store %arg8[%c0_10, %c17_11, %c0_12], %6 {strides = array<i32>} : memref<18x18x4xf32, #tpu.memory_space<vmem>>, vector<18x1x4xf32>,
    %cst_13 = arith.constant 0.000000e+00 : f32
    %8 = vector.broadcast %cst_13 : f32 to vector<1x18x16xf32>
    %c0_14 = arith.constant 0 : index
    %c0_15 = arith.constant 0 : index
    %c0_16 = arith.constant 0 : index
    %9 = vector.load %arg9[%c0_14, %c0_15, %c0_16] : memref<18x18x16xf32, #tpu.memory_space<vmem>>, vector<1x18x16xf32>
    tpu.vector_store %arg9[%c0_14, %c0_15, %c0_16], %8 {strides = array<i32>} : memref<18x18x16xf32, #tpu.memory_space<vmem>>, vector<1x18x16xf32>,
    %cst_17 = arith.constant 0.000000e+00 : f32
    %10 = vector.broadcast %cst_17 : f32 to vector<1x18x16xf32>
    %c17_18 = arith.constant 17 : index
    %c0_19 = arith.constant 0 : index
    %c0_20 = arith.constant 0 : index
    %11 = vector.load %arg9[%c17_18, %c0_19, %c0_20] : memref<18x18x16xf32, #tpu.memory_space<vmem>>, vector<1x18x16xf32>
    tpu.vector_store %arg9[%c17_18, %c0_19, %c0_20], %10 {strides = array<i32>} : memref<18x18x16xf32, #tpu.memory_space<vmem>>, vector<1x18x16xf32>,
    %cst_21 = arith.constant 0.000000e+00 : f32
    %12 = vector.broadcast %cst_21 : f32 to vector<18x1x16xf32>
    %c0_22 = arith.constant 0 : index
    %c0_23 = arith.constant 0 : index
    %c0_24 = arith.constant 0 : index
    %13 = vector.load %arg9[%c0_22, %c0_23, %c0_24] : memref<18x18x16xf32, #tpu.memory_space<vmem>>, vector<18x1x16xf32>
    tpu.vector_store %arg9[%c0_22, %c0_23, %c0_24], %12 {strides = array<i32>} : memref<18x18x16xf32, #tpu.memory_space<vmem>>, vector<18x1x16xf32>,
    %cst_25 = arith.constant 0.000000e+00 : f32
    %14 = vector.broadcast %cst_25 : f32 to vector<18x1x16xf32>
    %c0_26 = arith.constant 0 : index
    %c17_27 = arith.constant 17 : index
    %c0_28 = arith.constant 0 : index
    %15 = vector.load %arg9[%c0_26, %c17_27, %c0_28] : memref<18x18x16xf32, #tpu.memory_space<vmem>>, vector<18x1x16xf32>
    tpu.vector_store %arg9[%c0_26, %c17_27, %c0_28], %14 {strides = array<i32>} : memref<18x18x16xf32, #tpu.memory_space<vmem>>, vector<18x1x16xf32>,
    %c0_29 = arith.constant 0 : index
    %c0_30 = arith.constant 0 : index
    %c0_31 = arith.constant 0 : index
    %c0_32 = arith.constant 0 : index
    %16 = vector.load %arg2[%c0_29, %c0_30, %c0_31, %c0_32] : memref<1x16x16x4xbf16, #tpu.memory_space<vmem>>, vector<1x16x16x4xbf16>
    %17 = vector.shape_cast %16 : vector<1x16x16x4xbf16> to vector<16x16x4xbf16>
    %18 = arith.extf %17 : vector<16x16x4xbf16> to vector<16x16x4xf32>
    %c1 = arith.constant 1 : index
    %c1_33 = arith.constant 1 : index
    %c0_34 = arith.constant 0 : index
    %19 = vector.load %arg8[%c1, %c1_33, %c0_34] : memref<18x18x4xf32, #tpu.memory_space<vmem>>, vector<16x16x4xf32>
    tpu.vector_store %arg8[%c1, %c1_33, %c0_34], %18 {strides = array<i32>} : memref<18x18x4xf32, #tpu.memory_space<vmem>>, vector<16x16x4xf32>,
    %c0_35 = arith.constant 0 : index
    %c0_36 = arith.constant 0 : index
    %c0_37 = arith.constant 0 : index
    %20 = vector.load %arg8[%c0_35, %c0_36, %c0_37] : memref<18x18x4xf32, #tpu.memory_space<vmem>>, vector<16x16x4xf32>
    %21 = vector.shape_cast %20 : vector<16x16x4xf32> to vector<256x4xf32>
    %c0_38 = arith.constant 0 : index
    %c1_39 = arith.constant 1 : index
    %c0_40 = arith.constant 0 : index
    %22 = vector.load %arg8[%c0_38, %c1_39, %c0_40] : memref<18x18x4xf32, #tpu.memory_space<vmem>>, vector<16x16x4xf32>
    %23 = vector.shape_cast %22 : vector<16x16x4xf32> to vector<256x4xf32>
    %c0_41 = arith.constant 0 : index
    %c2 = arith.constant 2 : index
    %c0_42 = arith.constant 0 : index
    %24 = vector.load %arg8[%c0_41, %c2, %c0_42] : memref<18x18x4xf32, #tpu.memory_space<vmem>>, vector<16x16x4xf32>
    %25 = vector.shape_cast %24 : vector<16x16x4xf32> to vector<256x4xf32>
    %c1_43 = arith.constant 1 : index
    %c0_44 = arith.constant 0 : index
    %c0_45 = arith.constant 0 : index
    %26 = vector.load %arg8[%c1_43, %c0_44, %c0_45] : memref<18x18x4xf32, #tpu.memory_space<vmem>>, vector<16x16x4xf32>
    %27 = vector.shape_cast %26 : vector<16x16x4xf32> to vector<256x4xf32>
    %c1_46 = arith.constant 1 : index
    %c1_47 = arith.constant 1 : index
    %c0_48 = arith.constant 0 : index
    %28 = vector.load %arg8[%c1_46, %c1_47, %c0_48] : memref<18x18x4xf32, #tpu.memory_space<vmem>>, vector<16x16x4xf32>
    %29 = vector.shape_cast %28 : vector<16x16x4xf32> to vector<256x4xf32>
    %c1_49 = arith.constant 1 : index
    %c2_50 = arith.constant 2 : index
    %c0_51 = arith.constant 0 : index
    %30 = vector.load %arg8[%c1_49, %c2_50, %c0_51] : memref<18x18x4xf32, #tpu.memory_space<vmem>>, vector<16x16x4xf32>
    %31 = vector.shape_cast %30 : vector<16x16x4xf32> to vector<256x4xf32>
    %c2_52 = arith.constant 2 : index
    %c0_53 = arith.constant 0 : index
    %c0_54 = arith.constant 0 : index
    %32 = vector.load %arg8[%c2_52, %c0_53, %c0_54] : memref<18x18x4xf32, #tpu.memory_space<vmem>>, vector<16x16x4xf32>
    %33 = vector.shape_cast %32 : vector<16x16x4xf32> to vector<256x4xf32>
    %c2_55 = arith.constant 2 : index
    %c1_56 = arith.constant 1 : index
    %c0_57 = arith.constant 0 : index
    %34 = vector.load %arg8[%c2_55, %c1_56, %c0_57] : memref<18x18x4xf32, #tpu.memory_space<vmem>>, vector<16x16x4xf32>
    %35 = vector.shape_cast %34 : vector<16x16x4xf32> to vector<256x4xf32>
    %c2_58 = arith.constant 2 : index
    %c2_59 = arith.constant 2 : index
    %c0_60 = arith.constant 0 : index
    %36 = vector.load %arg8[%c2_58, %c2_59, %c0_60] : memref<18x18x4xf32, #tpu.memory_space<vmem>>, vector<16x16x4xf32>
    %37 = vector.shape_cast %36 : vector<16x16x4xf32> to vector<256x4xf32>
    %38 = tpu.concatenate %21, %23, %25, %27, %29, %31, %33, %35, %37 in 1 : vector<256x4xf32>, vector<256x4xf32>, vector<256x4xf32>, vector<256x4xf32>, vector<256x4xf32>, vector<256x4xf32>, vector<256x4xf32>, vector<256x4xf32>, vector<256x4xf32> -> vector<256x36xf32>
    %39 = arith.truncf %38 : vector<256x36xf32> to vector<256x36xbf16>
    %c0_61 = arith.constant 0 : index
    %c0_62 = arith.constant 0 : index
    %40 = vector.load %arg3[%c0_61, %c0_62] : memref<36x8xbf16, #tpu.memory_space<vmem>>, vector<36x8xbf16>
    %cst_63 = arith.constant dense<0.000000e+00> : vector<256x8xf32>
    %41 = tpu.matmul %39, %40, %cst_63 {dimension_numbers = #tpu.dot_dimension_numbers<[1], [0], [0], [1], [0, 0, 1, 1], [], []>} : vector<256x36xbf16>, vector<36x8xbf16>, vector<256x8xf32> -> vector<256x8xf32>
    %c0_64 = arith.constant 0 : index
    %c0_65 = arith.constant 0 : index
    %42 = vector.load %arg4[%c0_64, %c0_65] : memref<1x8xf32, #tpu.memory_space<vmem>>, vector<1x8xf32>
    %43 = vector.broadcast %42 : vector<1x8xf32> to vector<256x8xf32>
    %44 = arith.addf %41, %43 : vector<256x8xf32>
    %c0_66 = arith.constant 0 : index
    %45 = memref.load %arg1[%c0_66] : memref<2xf32, #tpu.memory_space<smem>>
    %c1_67 = arith.constant 1 : index
    %46 = memref.load %arg1[%c1_67] : memref<2xf32, #tpu.memory_space<smem>>
    %cst_68 = arith.constant 0.000000e+00 : f32
    %47 = vector.broadcast %cst_68 : f32 to vector<256x8xf32>
    %48 = arith.cmpf oge, %44, %47 : vector<256x8xf32>
    %49 = vector.broadcast %45 : f32 to vector<256x8xf32>
    %50 = arith.mulf %49, %44 : vector<256x8xf32>
    %51 = arith.select %48, %44, %50 : vector<256x8xi1>, vector<256x8xf32>
    %cst_69 = arith.constant 0.000000e+00 : f32
    %52 = vector.broadcast %cst_69 : f32 to vector<256x8xf32>
    %53 = arith.cmpf ogt, %44, %52 : vector<256x8xf32>
    %cst_70 = arith.constant 0.000000e+00 : f32
    %54 = arith.subf %cst_70, %46 : f32
    %55 = vector.broadcast %54 : f32 to vector<256x8xf32>
    %56 = arith.mulf %55, %44 : vector<256x8xf32>
    %cst_71 = arith.constant 0.000000e+00 : f32
    %57 = vector.broadcast %cst_71 : f32 to vector<256x8xf32>
    %58 = arith.subf %57, %44 : vector<256x8xf32>
    %59 = arith.select %53, %56, %58 : vector<256x8xi1>, vector<256x8xf32>
    %60 = tpu.concatenate %51, %59 in 1 : vector<256x8xf32>, vector<256x8xf32> -> vector<256x16xf32>
    %61 = vector.shape_cast %60 : vector<256x16xf32> to vector<16x16x16xf32>
    %c1_72 = arith.constant 1 : index
    %c1_73 = arith.constant 1 : index
    %c0_74 = arith.constant 0 : index
    %62 = vector.load %arg9[%c1_72, %c1_73, %c0_74] : memref<18x18x16xf32, #tpu.memory_space<vmem>>, vector<16x16x16xf32>
    tpu.vector_store %arg9[%c1_72, %c1_73, %c0_74], %61 {strides = array<i32>} : memref<18x18x16xf32, #tpu.memory_space<vmem>>, vector<16x16x16xf32>,
    %c0_75 = arith.constant 0 : index
    %c0_76 = arith.constant 0 : index
    %c0_77 = arith.constant 0 : index
    %63 = vector.load %arg9[%c0_75, %c0_76, %c0_77] : memref<18x18x16xf32, #tpu.memory_space<vmem>>, vector<16x16x16xf32>
    %64 = vector.shape_cast %63 : vector<16x16x16xf32> to vector<256x16xf32>
    %c0_78 = arith.constant 0 : index
    %c1_79 = arith.constant 1 : index
    %c0_80 = arith.constant 0 : index
    %65 = vector.load %arg9[%c0_78, %c1_79, %c0_80] : memref<18x18x16xf32, #tpu.memory_space<vmem>>, vector<16x16x16xf32>
    %66 = vector.shape_cast %65 : vector<16x16x16xf32> to vector<256x16xf32>
    %c0_81 = arith.constant 0 : index
    %c2_82 = arith.constant 2 : index
    %c0_83 = arith.constant 0 : index
    %67 = vector.load %arg9[%c0_81, %c2_82, %c0_83] : memref<18x18x16xf32, #tpu.memory_space<vmem>>, vector<16x16x16xf32>
    %68 = vector.shape_cast %67 : vector<16x16x16xf32> to vector<256x16xf32>
    %c1_84 = arith.constant 1 : index
    %c0_85 = arith.constant 0 : index
    %c0_86 = arith.constant 0 : index
    %69 = vector.load %arg9[%c1_84, %c0_85, %c0_86] : memref<18x18x16xf32, #tpu.memory_space<vmem>>, vector<16x16x16xf32>
    %70 = vector.shape_cast %69 : vector<16x16x16xf32> to vector<256x16xf32>
    %c1_87 = arith.constant 1 : index
    %c1_88 = arith.constant 1 : index
    %c0_89 = arith.constant 0 : index
    %71 = vector.load %arg9[%c1_87, %c1_88, %c0_89] : memref<18x18x16xf32, #tpu.memory_space<vmem>>, vector<16x16x16xf32>
    %72 = vector.shape_cast %71 : vector<16x16x16xf32> to vector<256x16xf32>
    %c1_90 = arith.constant 1 : index
    %c2_91 = arith.constant 2 : index
    %c0_92 = arith.constant 0 : index
    %73 = vector.load %arg9[%c1_90, %c2_91, %c0_92] : memref<18x18x16xf32, #tpu.memory_space<vmem>>, vector<16x16x16xf32>
    %74 = vector.shape_cast %73 : vector<16x16x16xf32> to vector<256x16xf32>
    %c2_93 = arith.constant 2 : index
    %c0_94 = arith.constant 0 : index
    %c0_95 = arith.constant 0 : index
    %75 = vector.load %arg9[%c2_93, %c0_94, %c0_95] : memref<18x18x16xf32, #tpu.memory_space<vmem>>, vector<16x16x16xf32>
    %76 = vector.shape_cast %75 : vector<16x16x16xf32> to vector<256x16xf32>
    %c2_96 = arith.constant 2 : index
    %c1_97 = arith.constant 1 : index
    %c0_98 = arith.constant 0 : index
    %77 = vector.load %arg9[%c2_96, %c1_97, %c0_98] : memref<18x18x16xf32, #tpu.memory_space<vmem>>, vector<16x16x16xf32>
    %78 = vector.shape_cast %77 : vector<16x16x16xf32> to vector<256x16xf32>
    %c2_99 = arith.constant 2 : index
    %c2_100 = arith.constant 2 : index
    %c0_101 = arith.constant 0 : index
    %79 = vector.load %arg9[%c2_99, %c2_100, %c0_101] : memref<18x18x16xf32, #tpu.memory_space<vmem>>, vector<16x16x16xf32>
    %80 = vector.shape_cast %79 : vector<16x16x16xf32> to vector<256x16xf32>
    %81 = tpu.concatenate %64, %66, %68, %70, %72, %74, %76, %78, %80 in 1 : vector<256x16xf32>, vector<256x16xf32>, vector<256x16xf32>, vector<256x16xf32>, vector<256x16xf32>, vector<256x16xf32>, vector<256x16xf32>, vector<256x16xf32>, vector<256x16xf32> -> vector<256x144xf32>
    %82 = arith.truncf %81 : vector<256x144xf32> to vector<256x144xbf16>
    %c0_102 = arith.constant 0 : index
    %c0_103 = arith.constant 0 : index
    %83 = vector.load %arg5[%c0_102, %c0_103] : memref<8x144xbf16, #tpu.memory_space<vmem>>, vector<8x144xbf16>
    %cst_104 = arith.constant dense<0.000000e+00> : vector<8x256xf32>
    %84 = tpu.matmul %83, %82, %cst_104 {dimension_numbers = #tpu.dot_dimension_numbers<[1], [1], [0], [0], [0, 0, 1, 0], [], []>} : vector<8x144xbf16>, vector<256x144xbf16>, vector<8x256xf32> -> vector<8x256xf32>
    %c0_105 = arith.constant 0 : index
    %c0_106 = arith.constant 0 : index
    %85 = vector.load %arg6[%c0_105, %c0_106] : memref<8x1xf32, #tpu.memory_space<vmem>>, vector<8x1xf32>
    %86 = vector.broadcast %85 : vector<8x1xf32> to vector<8x256xf32>
    %87 = arith.addf %84, %86 : vector<8x256xf32>
    %c0_107 = arith.constant 0 : index
    %c0_108 = arith.constant 0 : index
    %c0_109 = arith.constant 0 : index
    %88 = vector.load %arg7[%c0_107, %c0_108, %c0_109] : memref<1x8x256xf32, #tpu.memory_space<vmem>>, vector<1x8x256xf32>
    %89 = vector.shape_cast %88 : vector<1x8x256xf32> to vector<8x256xf32>
    %90 = vector.shape_cast %87 : vector<8x256xf32> to vector<1x8x256xf32>
    tpu.vector_store %arg7[%c0_107, %c0_108, %c0_109], %90 {strides = array<i32>} : memref<1x8x256xf32, #tpu.memory_space<vmem>>, vector<1x8x256xf32>,
    return
  }
  func.func @transform_0(%arg0: i32) -> i32 {
    %c0_i32 = arith.constant 0 : i32
    %c0_i32_0 = arith.constant 0 : i32
    return %c0_i32 : i32
  }
  func.func @transform_1(%arg0: i32) -> (i32, i32, i32, i32) {
    %c0_i32 = arith.constant 0 : i32
    %c0_i32_0 = arith.constant 0 : i32
    %c0_i32_1 = arith.constant 0 : i32
    %c0_i32_2 = arith.constant 0 : i32
    return %arg0, %c0_i32, %c0_i32_0, %c0_i32_1 : i32, i32, i32, i32
  }
  func.func @transform_2(%arg0: i32) -> (i32, i32) {
    %c0_i32 = arith.constant 0 : i32
    %c0_i32_0 = arith.constant 0 : i32
    %c0_i32_1 = arith.constant 0 : i32
    return %c0_i32, %c0_i32_0 : i32, i32
  }
  func.func @transform_3(%arg0: i32) -> (i32, i32) {
    %c0_i32 = arith.constant 0 : i32
    %c0_i32_0 = arith.constant 0 : i32
    %c0_i32_1 = arith.constant 0 : i32
    return %c0_i32, %c0_i32_0 : i32, i32
  }
  func.func @transform_4(%arg0: i32) -> (i32, i32) {
    %c0_i32 = arith.constant 0 : i32
    %c0_i32_0 = arith.constant 0 : i32
    %c0_i32_1 = arith.constant 0 : i32
    return %c0_i32, %c0_i32_0 : i32, i32
  }
  func.func @transform_5(%arg0: i32) -> (i32, i32) {
    %c0_i32 = arith.constant 0 : i32
    %c0_i32_0 = arith.constant 0 : i32
    %c0_i32_1 = arith.constant 0 : i32
    return %c0_i32, %c0_i32_0 : i32, i32
  }
  func.func @transform_6(%arg0: i32) -> (i32, i32, i32) {
    %c0_i32 = arith.constant 0 : i32
    %c0_i32_0 = arith.constant 0 : i32
    %c0_i32_1 = arith.constant 0 : i32
    return %arg0, %c0_i32, %c0_i32_0 : i32, i32, i32
  }
}

</mosaic_0001>

<bundles_post_ra>
// kernel: tpu_custom_call.1
= control target key start
LH: loop header
LB: loop body
LE: loop exit
PB: predicated region body
PF: predicated region fallthrough
CT: control target
= control target key end

     0   :  { %11 = vsyncpa [#allocation6], 0  ;;  %s8664_s0 = inlined_call_operand.vmem [shape: f32[2], index: 0, kind: input, shape index: {}]   ;;  %s8665_s1 = inlined_call_operand.vmem [shape: bf16[2,16,16,4], index: 1, kind: input, shape index: {}]   ;;  %s8666_s2 = inlined_call_operand.vmem [shape: bf16[36,8], index: 2, kind: input, shape index: {}]   ;;  %s8667_s3 = inlined_call_operand.vmem [shape: f32[1,8], index: 3, kind: input, shape index: {}]   ;;  %s8668_s4 = inlined_call_operand.vmem [shape: bf16[8,144], index: 4, kind: input, shape index: {}]   ;;  %s8669_s5 = inlined_call_operand.vmem [shape: f32[8,1], index: 5, kind: input, shape index: {}]   ;;  %s8670_s6 = inlined_call_operand.hbm [shape: f32[2,8,256], index: 6, kind: output, shape index: {}]  }
   0x1   :  { %12 = vsyncpa [#allocation5], 0 }
   0x2   :  { %14 = vsyncpa [#allocation5 + $0x1], 0  ;;  %s5965_s21 = smov 0   ;;  %s5967_s22 = smov 0  }
   0x3   :  { %s5969_s23 = smov 0   ;;  %s5971_s24 = smov 0  }
   0x4 LB: > { %s5986_s25 = sadd.s32 4294967295, %s5911_s24   ;;  %s4347_s26 = sadd.s32 4294967294, %s5911_s24   ;;  %s5911_s24 = sphi %s5971_s24, %s8809_s24   ;;  %s5907_s23 = sphi %s5969_s23, %s8808_s23   ;;  %s5903_s22 = sphi %s5967_s22, %s8807_s22   ;;  %s5899_s21 = sphi %s5965_s21, %s8806_s21  }
   0x5   : > { %s5990_s27 = sadd.s32 1, %s5911_s24   ;;  %s158_s28 = sadd.s32 1, %s5907_s23 }
   0x6   : > { %s155_s29 = ssub.s32 %s5911_s24, %s5990_s27  ;;  %p168_p0 = scmp.ne.s32.totalorder %s5907_s23, %s5903_s22 }
   0x7   : > { %p156_p1 = scmp.eq.s32.totalorder %s155_s29, 0  ;;  %p169_p2 = scmp.eq.s32.totalorder %s5986_s25, 1 }
   0x8   : > { %p174_p3 = scmp.ne.s32.totalorder %s5903_s22, %s5899_s21  ;;  %p175_p4 = scmp.eq.s32.totalorder %s4347_s26, 1 }
   0x9   : > { %s6001_s30 = scalar_select %p156_p1, %s5907_s23, %s158_s28  }
   0xa   : > { %p6003_p5 = por %p169_p2, %p168_p0  ;;  %p6007_p6 = por %p175_p4, %p174_p3 }
   0xb   : > { %p4348_p7 = scmp.ge.s32.totalorder %s5911_s24, 1  ;;  %p182_p8 = scmp.lt.s32.totalorder %s5911_s24, 3 }
   0xc   : > { %p4554_p9 = scmp.eq.s32.totalorder %s5986_s25, 0  ;;  %s195_s12 = sshll.u32 %s8664_s0, 4  ;;  %s196_s12 = int_to_ptr.vmem [resolvable:$true] %s195_s12 }
   0xd   : > { %p6014_p10 = pnand %p4348_p7, %p182_p8  ;;  %s5832_s13 = scalar_lea.vmem %s196_s12, 16 }
   0xe   : > { %p5833_p13 = scmp.ne.s32.totalorder %s196_s12, %s5832_s13  ;;  %p5840_p3 = scmp.lt.s32.totalorder %s196_s12, %s196_s12 }
   0xf   : > { %p4546_p11 = pneg %p6014_p10  ;;  %p5841_p4 = scmp.lt.s32.totalorder %s5832_s13, %s5832_s13 }
  0x11   : > { %p4547_p12 = pnand %p4554_p9, %p4546_p11  ;;  %p5842_p7 = por %p5841_p4, %p5840_p3 }
  0x13   : > { %p5834_p0 = pneg %p4547_p12 }
  0x15   : > { %p5835_p1 = pnand %p5834_p0, %p5833_p13 }
  0x17   : > { %p5836_p2 = pneg %p5835_p1 }
  0x19   : > { %p5843_p8 = pnand %p5842_p7, %p5836_p2 }
  0x1b   : > { %5846 = shalt.err (!%p5843_p8)
}
  0x1c   : > { %s5913_s14 = smov [#allocation4]   ;;  %228 = sbr.rel (%p6014_p10) target bundleno = 1219 (0x4c3), region = 44 }
  0x1d   : > { %4549 = dma.vmem_to_smem (!%p4547_p12), %s196_s12, 16, %s5913_s14, [#allocation6]  }
  0x21   : > { %5890 = dma.done.wait (%p4554_p9), [#allocation6], 16  }
  0x22   : > { %5892 = vsyncadd (%p4554_p9), [#allocation6], 4294967280 }
  0x23   : > { %234 = sfence }
  0x24   : > { %vm265_vm0 = vcmask 31744   ;;  %vm268_vm1 = vcmask 25600   ;;  %vm274_vm2 = vcmask 24576   ;;  %p259_p11 = scmp.lt.s32.totalorder %s5986_s25, 1  ;;  %v8671_v0 = vmov 0.0   ;;  %s5915_s20 = smov 4  }
  0x25   : > { %266 = vst.msk [vmem:[#allocation2] sm:$0xff] %vm265_vm0, %v8671_v0  ;;  %267 = vst.msk [vmem:[#allocation2 + $0x8] sm:$0xff] %vm265_vm0, %v8671_v0  ;;  %s5916_s26 = smov 8   ;;  %s5917_s28 = smov 12   ;;  %vm311_vm3 = vcmask 130048   ;;  %vm2121_vm4 = vcmask 1041408  }
  0x26   : > { %269 = vst.msk [vmem:[#allocation2 + $0x10] sm:$0x3] %vm268_vm1, %v8671_v0  ;;  %273 = vst.msk [vmem:[#allocation2 + $0x1a8] sm:$0x3] %vm268_vm1, %v8671_v0  ;;  %s260_s15 = scalar_select %p259_p11, %s5986_s25, 1  ;;  %vm1799_vm5 = vcmask 64512  }
  0x27   : > { %271 = vst.msk [vmem:[#allocation2 + $0x198] sm:$0xff] %vm265_vm0, %v8671_v0  ;;  %272 = vst.msk [vmem:[#allocation2 + $0x1a0] sm:$0xff] %vm265_vm0, %v8671_v0  ;;  %s5918_s29 = smov 16   ;;  %s5919_s11 = smov 20   ;;  %vm1832_vm6 = vcmask 97280   ;;  %vm1897_vm7 = vcmask 162816  }
  0x28   : > { %276 = vst.msk [vmem:[#allocation2 + $0x18] sm:$0x1] %vm274_vm2, %v8671_v0  ;;  %277 = vst.msk [vmem:[#allocation2 + $0x30] sm:$0x1] %vm274_vm2, %v8671_v0  ;;  %s4401_s16 = sshll.u32 %s260_s15, 7  ;;  %s5921_s17 = smov 28  }
  0x29   : > { %278 = vst.msk [vmem:[#allocation2 + $0x48] sm:$0x1] %vm274_vm2, %v8671_v0  ;;  %279 = vst.msk [vmem:[#allocation2 + $0x60] sm:$0x1] %vm274_vm2, %v8671_v0  ;;  %s6120_s19 = scalar_lea.vmem %s8665_s1, %s4401_s16  ;;  %s5920_s16 = smov 24   ;;  %vm1930_vm8 = vcmask 195584  }
  0x2a   : > { %280 = vst.msk [vmem:[#allocation2 + $0x78] sm:$0x1] %vm274_vm2, %v8671_v0  ;;  %281 = vst.msk [vmem:[#allocation2 + $0x90] sm:$0x1] %vm274_vm2, %v8671_v0  ;;  %v4467_v1 = vld [vmem:[%s6120_s19 + $0x8] sm:$0xff]   ;;  %v4404_v2 = vld [vmem:[%s6120_s19] sm:$0xff]  }
  0x2b   : > { %282 = vst.msk [vmem:[#allocation2 + $0xa8] sm:$0x1] %vm274_vm2, %v8671_v0  ;;  %283 = vst.msk [vmem:[#allocation2 + $0xc0] sm:$0x1] %vm274_vm2, %v8671_v0  ;;  %v4468_v3 = vld [vmem:[%s6120_s19 + $0x10] sm:$0xff]   ;;  %v4409_v4 = vunpack.c.l.bf16 %v4467_v1  ;;  %v4410_v5 = vunpack.c.h.bf16 %v4467_v1  ;;  %v4405_v6 = vunpack.c.l.bf16 %v4404_v2  ;;  %v4406_v7 = vunpack.c.h.bf16 %v4404_v2  ;;  %v4469_v8 = vld [vmem:[%s6120_s19 + $0x18] sm:$0xff]  }
  0x2c   : > { %284 = vst.msk [vmem:[#allocation2 + $0xd8] sm:$0x1] %vm274_vm2, %v8671_v0  ;;  %285 = vst.msk [vmem:[#allocation2 + $0xf0] sm:$0x1] %vm274_vm2, %v8671_v0  ;;  %v4470_v9 = vld [vmem:[%s6120_s19 + $0x20] sm:$0xff]   ;;  %v4471_v10 = vld [vmem:[%s6120_s19 + $0x28] sm:$0xff]   ;;  %v4413_v13 = vunpack.c.l.bf16 %v4468_v3  ;;  %v4414_v14 = vunpack.c.h.bf16 %v4468_v3  ;;  %v4417_v15 = vunpack.c.l.bf16 %v4469_v8  ;;  %v4418_v16 = vunpack.c.h.bf16 %v4469_v8 }
  0x2d   : > { %286 = vst.msk [vmem:[#allocation2 + $0x108] sm:$0x1] %vm274_vm2, %v8671_v0  ;;  %287 = vst.msk [vmem:[#allocation2 + $0x120] sm:$0x1] %vm274_vm2, %v8671_v0  ;;  %v486_v11 = vld [vmem:[#allocation2 + $0x1] sm:$0xff]  ;;  %v487_v12 = vld [vmem:[#allocation2 + $0x9] sm:$0xff]  ;;  %v4421_v19 = vunpack.c.l.bf16 %v4470_v9  ;;  %v4422_v20 = vunpack.c.h.bf16 %v4470_v9  ;;  %v4425_v21 = vunpack.c.l.bf16 %v4471_v10  ;;  %v4426_v25 = vunpack.c.h.bf16 %v4471_v10 }
  0x2e   : > { %288 = vst.msk [vmem:[#allocation2 + $0x138] sm:$0x1] %vm274_vm2, %v8671_v0  ;;  %289 = vst.msk [vmem:[#allocation2 + $0x150] sm:$0x1] %vm274_vm2, %v8671_v0  ;;  %v4472_v17 = vld [vmem:[%s6120_s19 + $0x30] sm:$0xff]   ;;  %v4605_v18 = vpack.i.bf16 %v487_v12, %v486_v11  ;;  %v4473_v22 = vld [vmem:[%s6120_s19 + $0x38] sm:$0xff]  }
  0x2f   : > { %290 = vst.msk [vmem:[#allocation2 + $0x168] sm:$0x1] %vm274_vm2, %v8671_v0  ;;  %291 = vst.msk [vmem:[#allocation2 + $0x180] sm:$0x1] %vm274_vm2, %v8671_v0  ;;  %v4474_v23 = vld [vmem:[%s6120_s19 + $0x40] sm:$0xff]   ;;  %v4475_v24 = vld [vmem:[%s6120_s19 + $0x48] sm:$0xff]   ;;  %v4429_v26 = vunpack.c.l.bf16 %v4472_v17  ;;  %v4430_v27 = vunpack.c.h.bf16 %v4472_v17  ;;  %v4433_v28 = vunpack.c.l.bf16 %v4473_v22  ;;  %v4434_v32 = vunpack.c.h.bf16 %v4473_v22 }
  0x30   : > { %294 = vst.msk [vmem:[#allocation2 + $0x29] sm:$0x1] %vm274_vm2, %v8671_v0  ;;  %295 = vst.msk [vmem:[#allocation2 + $0x41] sm:$0x1] %vm274_vm2, %v8671_v0  ;;  %v4476_v29 = vld [vmem:[%s6120_s19 + $0x50] sm:$0xff]   ;;  %v4477_v30 = vld [vmem:[%s6120_s19 + $0x58] sm:$0xff]   ;;  %4606 = vrot.lane.b32.xlu0 %v4605_v18, %s5915_s20  ;;  %v4437_v33 = vunpack.c.l.bf16 %v4474_v23  ;;  %v4438_v34 = vunpack.c.h.bf16 %v4474_v23  ;;  %v4441_v35 = vunpack.c.l.bf16 %v4475_v24  ;;  %v4442_v38 = vunpack.c.h.bf16 %v4475_v24 }
  0x31   : > { %296 = vst.msk [vmem:[#allocation2 + $0x59] sm:$0x1] %vm274_vm2, %v8671_v0  ;;  %297 = vst.msk [vmem:[#allocation2 + $0x71] sm:$0x1] %vm274_vm2, %v8671_v0  ;;  %v4478_v31 = vld [vmem:[%s6120_s19 + $0x60] sm:$0xff]   ;;  %v4479_v36 = vld [vmem:[%s6120_s19 + $0x68] sm:$0xff]   ;;  %v4445_v39 = vunpack.c.l.bf16 %v4476_v29  ;;  %v4446_v40 = vunpack.c.h.bf16 %v4476_v29  ;;  %v4449_v41 = vunpack.c.l.bf16 %v4477_v30  ;;  %v4450_v43 = vunpack.c.h.bf16 %v4477_v30 }
  0x32   : > { %298 = vst.msk [vmem:[#allocation2 + $0x89] sm:$0x1] %vm274_vm2, %v8671_v0  ;;  %299 = vst.msk [vmem:[#allocation2 + $0xa1] sm:$0x1] %vm274_vm2, %v8671_v0  ;;  %v4480_v37 = vld [vmem:[%s6120_s19 + $0x70] sm:$0xff]   ;;  %v4481_v42 = vld [vmem:[%s6120_s19 + $0x78] sm:$0xff]   ;;  %v4453_v44 = vunpack.c.l.bf16 %v4478_v31  ;;  %v4454_v45 = vunpack.c.h.bf16 %v4478_v31  ;;  %v4457_v46 = vunpack.c.l.bf16 %v4479_v36  ;;  %v4458_v47 = vunpack.c.h.bf16 %v4479_v36 }
  0x33   : > { %300 = vst.msk [vmem:[#allocation2 + $0xb9] sm:$0x1] %vm274_vm2, %v8671_v0  ;;  %301 = vst.msk [vmem:[#allocation2 + $0xd1] sm:$0x1] %vm274_vm2, %v8671_v0  ;;  %v4461_v48 = vunpack.c.l.bf16 %v4480_v37  ;;  %v4462_v49 = vunpack.c.h.bf16 %v4480_v37  ;;  %v4465_v50 = vunpack.c.l.bf16 %v4481_v42  ;;  %v4466_v51 = vunpack.c.h.bf16 %v4481_v42  ;;  %s5922_s18 = smov 32   ;;  %s4376_s19 = sld [smem:[#allocation4 + $0x1]] }
  0x34   : > { %302 = vst.msk [vmem:[#allocation2 + $0xe9] sm:$0x1] %vm274_vm2, %v8671_v0  ;;  %303 = vst.msk [vmem:[#allocation2 + $0x101] sm:$0x1] %vm274_vm2, %v8671_v0  ;;  %vm1963_vm9 = vcmask 228352   ;;  %vm1996_vm10 = vcmask 261120  }
  0x35   : > { %304 = vst.msk [vmem:[#allocation2 + $0x119] sm:$0x1] %vm274_vm2, %v8671_v0  ;;  %305 = vst.msk [vmem:[#allocation2 + $0x131] sm:$0x1] %vm274_vm2, %v8671_v0  ;;  %vm2072_vm11 = vcmask 293888   ;;  %vm314_vm12 = vcmask 123904  }
  0x36   : > { %306 = vst.msk [vmem:[#allocation2 + $0x149] sm:$0x1] %vm274_vm2, %v8671_v0  ;;  %307 = vst.msk [vmem:[#allocation2 + $0x161] sm:$0x1] %vm274_vm2, %v8671_v0  ;;  %vm320_vm13 = vcmask 122880   ;;  %s2286_s10 = sld [smem:[#allocation4]] }
  0x37   : > { %308 = vst.msk [vmem:[#allocation2 + $0x179] sm:$0x1] %vm274_vm2, %v8671_v0  ;;  %309 = vst.msk [vmem:[#allocation2 + $0x191] sm:$0x1] %vm274_vm2, %v8671_v0  ;;  %s5925_s12 = smov 64   ;;  %s5926_s13 = smov 112  }
  0x38   : > { %293 = vst.msk [vmem:[#allocation2 + $0x11] sm:$0x1] %vm274_vm2, %v8671_v0  ;;  %310 = vst.msk [vmem:[#allocation2 + $0x1a9] sm:$0x1] %vm274_vm2, %v8671_v0  ;;  %s5927_s14 = smov 96  }
  0x39   : > { %275 = vst.msk [vmem:[#allocation2] sm:$0x1] %vm274_vm2, %v8671_v0  ;;  %292 = vst.msk [vmem:[#allocation2 + $0x198] sm:$0x1] %vm274_vm2, %v8671_v0 }
  0x3a   : > { %424 = vst.msk [vmem:[#allocation2 + $0x31] sm:$0xff] %vm265_vm0, %v4409_v4  ;;  %425 = vst.msk [vmem:[#allocation2 + $0x39] sm:$0xff] %vm265_vm0, %v4410_v5 }
  0x3b   : > { %422 = vst.msk [vmem:[#allocation2 + $0x19] sm:$0xff] %vm265_vm0, %v4405_v6  ;;  %423 = vst.msk [vmem:[#allocation2 + $0x21] sm:$0xff] %vm265_vm0, %v4406_v7 }
  0x3c   : > { %426 = vst.msk [vmem:[#allocation2 + $0x49] sm:$0xff] %vm265_vm0, %v4413_v13  ;;  %427 = vst.msk [vmem:[#allocation2 + $0x51] sm:$0xff] %vm265_vm0, %v4414_v14 }
  0x3d   : > { %428 = vst.msk [vmem:[#allocation2 + $0x61] sm:$0xff] %vm265_vm0, %v4417_v15  ;;  %429 = vst.msk [vmem:[#allocation2 + $0x69] sm:$0xff] %vm265_vm0, %v4418_v16 }
  0x3e   : > { %430 = vst.msk [vmem:[#allocation2 + $0x79] sm:$0xff] %vm265_vm0, %v4421_v19  ;;  %431 = vst.msk [vmem:[#allocation2 + $0x81] sm:$0xff] %vm265_vm0, %v4422_v20 }
  0x3f   : > { %432 = vst.msk [vmem:[#allocation2 + $0x91] sm:$0xff] %vm265_vm0, %v4425_v21  ;;  %433 = vst.msk [vmem:[#allocation2 + $0x99] sm:$0xff] %vm265_vm0, %v4426_v25 }
  0x40   : > { %434 = vst.msk [vmem:[#allocation2 + $0xa9] sm:$0xff] %vm265_vm0, %v4429_v26  ;;  %435 = vst.msk [vmem:[#allocation2 + $0xb1] sm:$0xff] %vm265_vm0, %v4430_v27 }
  0x41   : > { %436 = vst.msk [vmem:[#allocation2 + $0xc1] sm:$0xff] %vm265_vm0, %v4433_v28  ;;  %437 = vst.msk [vmem:[#allocation2 + $0xc9] sm:$0xff] %vm265_vm0, %v4434_v32  ;;  %v490_v52 = vld [vmem:[#allocation2 + $0x31] sm:$0xff]  ;;  %v491_v53 = vld [vmem:[#allocation2 + $0x39] sm:$0xff] }
  0x42   : > { %438 = vst.msk [vmem:[#allocation2 + $0xd9] sm:$0xff] %vm265_vm0, %v4437_v33  ;;  %439 = vst.msk [vmem:[#allocation2 + $0xe1] sm:$0xff] %vm265_vm0, %v4438_v34  ;;  %v488_v54 = vld [vmem:[#allocation2 + $0x19] sm:$0xff]  ;;  %v6169_v55 = vpack.i.bf16 %v491_v53, %v490_v52  ;;  %v489_v56 = vld [vmem:[#allocation2 + $0x21] sm:$0xff] }
  0x43   : > { %440 = vst.msk [vmem:[#allocation2 + $0xf1] sm:$0xff] %vm265_vm0, %v4441_v35  ;;  %441 = vst.msk [vmem:[#allocation2 + $0xf9] sm:$0xff] %vm265_vm0, %v4442_v38  ;;  %v492_v57 = vld [vmem:[#allocation2 + $0x49] sm:$0xff]  ;;  %v493_v58 = vld [vmem:[#allocation2 + $0x51] sm:$0xff]  ;;  %v6173_v59 = vpack.i.bf16 %v489_v56, %v488_v54 }
  0x44   : > { %442 = vst.msk [vmem:[#allocation2 + $0x109] sm:$0xff] %vm265_vm0, %v4445_v39  ;;  %443 = vst.msk [vmem:[#allocation2 + $0x111] sm:$0xff] %vm265_vm0, %v4446_v40  ;;  %v494_v60 = vld [vmem:[#allocation2 + $0x61] sm:$0xff]  ;;  %v495_v61 = vld [vmem:[#allocation2 + $0x69] sm:$0xff]  ;;  %4616 = vrot.lane.b32.xlu1 %v6169_v55, %s5915_s20  ;;  %v6177_v62 = vpack.i.bf16 %v493_v58, %v492_v57 }
  0x45   : > { %444 = vst.msk [vmem:[#allocation2 + $0x121] sm:$0xff] %vm265_vm0, %v4449_v41  ;;  %445 = vst.msk [vmem:[#allocation2 + $0x129] sm:$0xff] %vm265_vm0, %v4450_v43  ;;  %4611 = vrot.lane.b32.xlu0 %v6173_v59, %s5915_s20  ;;  %v6181_v63 = vpack.i.bf16 %v495_v61, %v494_v60  ;;  %v496_v1 = vld [vmem:[#allocation2 + $0x79] sm:$0xff]  ;;  %v497_v2 = vld [vmem:[#allocation2 + $0x81] sm:$0xff] }
  0x46   : > { %446 = vst.msk [vmem:[#allocation2 + $0x139] sm:$0xff] %vm265_vm0, %v4453_v44  ;;  %447 = vst.msk [vmem:[#allocation2 + $0x141] sm:$0xff] %vm265_vm0, %v4454_v45  ;;  %v498_v3 = vld [vmem:[#allocation2 + $0x91] sm:$0xff]  ;;  %v499_v4 = vld [vmem:[#allocation2 + $0x99] sm:$0xff]  ;;  %v6185_v5 = vpack.i.bf16 %v497_v2, %v496_v1 }
  0x47   : > { %448 = vst.msk [vmem:[#allocation2 + $0x151] sm:$0xff] %vm265_vm0, %v4457_v46  ;;  %449 = vst.msk [vmem:[#allocation2 + $0x159] sm:$0xff] %vm265_vm0, %v4458_v47  ;;  %v6189_v6 = vpack.i.bf16 %v499_v4, %v498_v3  ;;  %v500_v7 = vld [vmem:[#allocation2 + $0xa9] sm:$0xff]  ;;  %v501_v8 = vld [vmem:[#allocation2 + $0xb1] sm:$0xff] }
  0x48   : > { %450 = vst.msk [vmem:[#allocation2 + $0x169] sm:$0xff] %vm265_vm0, %v4461_v48  ;;  %451 = vst.msk [vmem:[#allocation2 + $0x171] sm:$0xff] %vm265_vm0, %v4462_v49  ;;  %4621 = vrot.lane.b32.xlu1 %v6177_v62, %s5915_s20  ;;  %v502_v9 = vld [vmem:[#allocation2 + $0xc1] sm:$0xff]  ;;  %v503_v10 = vld [vmem:[#allocation2 + $0xc9] sm:$0xff]  ;;  %v6193_v11 = vpack.i.bf16 %v501_v8, %v500_v7 }
  0x49   : > { %452 = vst.msk [vmem:[#allocation2 + $0x181] sm:$0xff] %vm265_vm0, %v4465_v50  ;;  %453 = vst.msk [vmem:[#allocation2 + $0x189] sm:$0xff] %vm265_vm0, %v4466_v51  ;;  %4626 = vrot.lane.b32.xlu0 %v6181_v63, %s5915_s20  ;;  %v6197_v12 = vpack.i.bf16 %v503_v10, %v502_v9  ;;  %v504_v13 = vld [vmem:[#allocation2 + $0xd9] sm:$0xff]  ;;  %v505_v14 = vld [vmem:[#allocation2 + $0xe1] sm:$0xff] }
  0x4a   : > { %v506_v15 = vld [vmem:[#allocation2 + $0xf1] sm:$0xff]  ;;  %v507_v16 = vld [vmem:[#allocation2 + $0xf9] sm:$0xff]  ;;  %v6201_v17 = vpack.i.bf16 %v505_v14, %v504_v13  ;;  %v518_v33 = vld [vmem:[#allocation2 + $0x2] sm:$0xff]  ;;  %312 = vst.msk [vmem:[#allocation3] sm:$0xff] %vm311_vm3, %v8671_v0 }
  0x4b   : > { %v6205_v18 = vpack.i.bf16 %v507_v16, %v506_v15  ;;  %v508_v19 = vld [vmem:[#allocation2 + $0x109] sm:$0xff]  ;;  %v509_v20 = vld [vmem:[#allocation2 + $0x111] sm:$0xff]  ;;  %v520_v37 = vld [vmem:[#allocation2 + $0x1a] sm:$0xff]  ;;  %313 = vst.msk [vmem:[#allocation3 + $0x8] sm:$0xff] %vm311_vm3, %v8671_v0 }
  0x4c   : > { %4631 = vrot.lane.b32.xlu1 %v6185_v5, %s5915_s20  ;;  %v510_v21 = vld [vmem:[#allocation2 + $0x121] sm:$0xff]  ;;  %v511_v22 = vld [vmem:[#allocation2 + $0x129] sm:$0xff]  ;;  %v6209_v23 = vpack.i.bf16 %v509_v20, %v508_v19  ;;  %v522_v39 = vld [vmem:[#allocation2 + $0x32] sm:$0xff]  ;;  %317 = vst.msk [vmem:[#allocation3 + $0x198] sm:$0xff] %vm311_vm3, %v8671_v0 }
  0x4d   : > { %4636 = vrot.lane.b32.xlu0 %v6189_v6, %s5915_s20  ;;  %v6213_v24 = vpack.i.bf16 %v511_v22, %v510_v21  ;;  %v512_v25 = vld [vmem:[#allocation2 + $0x139] sm:$0xff]  ;;  %v513_v26 = vld [vmem:[#allocation2 + $0x141] sm:$0xff]  ;;  %v519_v34 = vld [vmem:[#allocation2 + $0xa] sm:$0xff]  ;;  %318 = vst.msk [vmem:[#allocation3 + $0x1a0] sm:$0xff] %vm311_vm3, %v8671_v0 }
  0x4e   : > { %v514_v27 = vld [vmem:[#allocation2 + $0x151] sm:$0xff]  ;;  %v515_v28 = vld [vmem:[#allocation2 + $0x159] sm:$0xff]  ;;  %v6217_v29 = vpack.i.bf16 %v513_v26, %v512_v25  ;;  %v4685_v36 = vpack.i.bf16 %v519_v34, %v518_v33  ;;  %v521_v38 = vld [vmem:[#allocation2 + $0x22] sm:$0xff] }
  0x4f   : > { %v6221_v30 = vpack.i.bf16 %v515_v28, %v514_v27  ;;  %v516_v31 = vld [vmem:[#allocation2 + $0x169] sm:$0xff]  ;;  %v517_v32 = vld [vmem:[#allocation2 + $0x171] sm:$0xff]  ;;  %v523_v40 = vld [vmem:[#allocation2 + $0x3a] sm:$0xff]  ;;  %v6231_v41 = vpack.i.bf16 %v521_v38, %v520_v37 }
  0x50   : > { %4641 = vrot.lane.b32.xlu1 %v6193_v11, %s5915_s20  ;;  %v6225_v35 = vpack.i.bf16 %v517_v32, %v516_v31  ;;  %v6234_v42 = vpack.i.bf16 %v523_v40, %v522_v39  ;;  %v524_v43 = vld [vmem:[#allocation2 + $0x4a] sm:$0xff]  ;;  %v525_v44 = vld [vmem:[#allocation2 + $0x52] sm:$0xff]  ;;  %v526_v45 = vld [vmem:[#allocation2 + $0x62] sm:$0xff] }
  0x51   : > { %4646 = vrot.lane.b32.xlu0 %v6197_v12, %s5915_s20  ;;  %v527_v46 = vld [vmem:[#allocation2 + $0x6a] sm:$0xff]  ;;  %v6238_v47 = vpack.i.bf16 %v525_v44, %v524_v43  ;;  %v528_v49 = vld [vmem:[#allocation2 + $0x7a] sm:$0xff]  ;;  %v529_v50 = vld [vmem:[#allocation2 + $0x82] sm:$0xff] }
  0x52   : > { %v6242_v48 = vpack.i.bf16 %v527_v46, %v526_v45  ;;  %v530_v51 = vld [vmem:[#allocation2 + $0x92] sm:$0xff]  ;;  %v531_v52 = vld [vmem:[#allocation2 + $0x9a] sm:$0xff]  ;;  %v6246_v53 = vpack.i.bf16 %v529_v50, %v528_v49  ;;  %v532_v56 = vld [vmem:[#allocation2 + $0xaa] sm:$0xff] }
  0x53   : > { %v6250_v54 = vpack.i.bf16 %v531_v52, %v530_v51  ;;  %v533_v57 = vld [vmem:[#allocation2 + $0xb2] sm:$0xff]  ;;  %v534_v58 = vld [vmem:[#allocation2 + $0xc2] sm:$0xff]  ;;  %v535_v60 = vld [vmem:[#allocation2 + $0xca] sm:$0xff] }
  0x54   : > { %4651 = vrot.lane.b32.xlu1 %v6201_v17, %s5915_s20  ;;  %v6254_v61 = vpack.i.bf16 %v533_v57, %v532_v56  ;;  %v6258_v1 = vpack.i.bf16 %v535_v60, %v534_v58  ;;  %v536_v2 = vld [vmem:[#allocation2 + $0xda] sm:$0xff]  ;;  %v537_v3 = vld [vmem:[#allocation2 + $0xe2] sm:$0xff]  ;;  %v538_v4 = vld [vmem:[#allocation2 + $0xf2] sm:$0xff] }
  0x55   : > { %4656 = vrot.lane.b32.xlu0 %v6205_v18, %s5915_s20  ;;  %v539_v7 = vld [vmem:[#allocation2 + $0xfa] sm:$0xff]  ;;  %v4730_v8 = vpack.i.bf16 %v537_v3, %v536_v2  ;;  %v540_v10 = vld [vmem:[#allocation2 + $0x10a] sm:$0xff]  ;;  %v541_v13 = vld [vmem:[#allocation2 + $0x112] sm:$0xff] }
  0x56   : > { %v4735_v9 = vpack.i.bf16 %v539_v7, %v538_v4  ;;  %v542_v14 = vld [vmem:[#allocation2 + $0x122] sm:$0xff]  ;;  %v543_v15 = vld [vmem:[#allocation2 + $0x12a] sm:$0xff]  ;;  %v4740_v16 = vpack.i.bf16 %v541_v13, %v540_v10  ;;  %v544_v20 = vld [vmem:[#allocation2 + $0x13a] sm:$0xff] }
  0x57   : > { %v4745_v19 = vpack.i.bf16 %v543_v15, %v542_v14  ;;  %v545_v21 = vld [vmem:[#allocation2 + $0x142] sm:$0xff]  ;;  %v546_v22 = vld [vmem:[#allocation2 + $0x152] sm:$0xff]  ;;  %v547_v25 = vld [vmem:[#allocation2 + $0x15a] sm:$0xff] }
  0x58   : > { %4661 = vrot.lane.b32.xlu1 %v6209_v23, %s5915_s20  ;;  %v4750_v26 = vpack.i.bf16 %v545_v21, %v544_v20  ;;  %v4755_v27 = vpack.i.bf16 %v547_v25, %v546_v22  ;;  %v548_v28 = vld [vmem:[#allocation2 + $0x16a] sm:$0xff]  ;;  %v549_v31 = vld [vmem:[#allocation2 + $0x172] sm:$0xff]  ;;  %v6270_v33 = vld [vmem:[#allocation2 + $0x20] sm:$0xff] }
  0x59   : > { %4666 = vrot.lane.b32.xlu0 %v6213_v24, %s5915_s20  ;;  %v6268_v32 = vld [vmem:[#allocation2 + $0x18] sm:$0xff]  ;;  %v4760_v34 = vpack.i.bf16 %v549_v31, %v548_v28  ;;  %v6276_v37 = vld [vmem:[#allocation2 + $0x30] sm:$0xff]  ;;  %v6280_v39 = vld [vmem:[#allocation2 + $0x48] sm:$0xff] }
  0x5a   : > { %v6278_v38 = vld [vmem:[#allocation2 + $0x38] sm:$0xff]  ;;  %v6282_v40 = vld [vmem:[#allocation2 + $0x50] sm:$0xff]  ;;  %v6294_v45 = vld [vmem:[#allocation2 + $0x60] sm:$0xff] }
  0x5b   : > { %v6287_v43 = vpack.i.bf16 %v6278_v38, %v6276_v37  ;;  %v6292_v44 = vpack.i.bf16 %v6282_v40, %v6280_v39  ;;  %v6296_v46 = vld [vmem:[#allocation2 + $0x68] sm:$0xff]  ;;  %v6298_v49 = vld [vmem:[#allocation2 + $0x78] sm:$0xff]  ;;  %v6300_v50 = vld [vmem:[#allocation2 + $0x80] sm:$0xff] }
  0x5c   : > { %4671 = vrot.lane.b32.xlu1 %v6217_v29, %s5915_s20  ;;  %v6306_v51 = vpack.i.bf16 %v6296_v46, %v6294_v45  ;;  %v6312_v52 = vpack.i.bf16 %v6300_v50, %v6298_v49  ;;  %v6314_v56 = vld [vmem:[#allocation2 + $0x90] sm:$0xff]  ;;  %v6316_v57 = vld [vmem:[#allocation2 + $0x98] sm:$0xff]  ;;  %v6318_v58 = vld [vmem:[#allocation2 + $0xa8] sm:$0xff] }
  0x5d   : > { %4676 = vrot.lane.b32.xlu0 %v6221_v30, %s5915_s20  ;;  %v6320_v60 = vld [vmem:[#allocation2 + $0xb0] sm:$0xff]  ;;  %v6326_v2 = vpack.i.bf16 %v6316_v57, %v6314_v56  ;;  %v564_v4 = vld [vmem:[#allocation2 + $0xc0] sm:$0xff]  ;;  %v6334_v7 = vld [vmem:[#allocation2 + $0xc8] sm:$0xff] }
  0x5e   : > { %v6332_v3 = vpack.i.bf16 %v6320_v60, %v6318_v58  ;;  %v6339_v10 = vpack.i.bf16 %v6334_v7, %v564_v4  ;;  %v568_v14 = vld [vmem:[#allocation2 + $0xf0] sm:$0xff]  ;;  %v569_v15 = vld [vmem:[#allocation2 + $0xf8] sm:$0xff]  ;;  %v572_v22 = vld [vmem:[#allocation2 + $0x120] sm:$0xff] }
  0x5f   : > { %v6347_v20 = vpack.i.bf16 %v569_v15, %v568_v14  ;;  %v573_v25 = vld [vmem:[#allocation2 + $0x128] sm:$0xff]  ;;  %v580_v15 = vld [vmem:[#allocation2 + $0x180] sm:$0xff] }
  0x60   : > { %4681 = vrot.lane.b32.xlu1 %v6225_v35, %s5915_s20  ;;  %v4820_v28 = vpack.i.bf16 %v573_v25, %v572_v22  ;;  %v578_v4 = vld [vmem:[#allocation2 + $0x168] sm:$0xff]  ;;  %s2417_s20 = ssub.f32 0.0, %s4376_s19 }
  0x61   : > { %4686 = vrot.lane.b32.xlu0 %v4685_v36, %s5916_s26  ;;  %v4765_v36 = vpack.i.bf16 %v6270_v33, %v6268_v32 }
  0x64   : > { %4691 = vrot.lane.b32.xlu1 %v6231_v41, %s5916_s26 }
  0x65   : > { %4696 = vrot.lane.b32.xlu0 %v6234_v42, %s5916_s26 }
  0x68   : > { %4701 = vrot.lane.b32.xlu1 %v6238_v47, %s5916_s26 }
  0x69   : > { %4706 = vrot.lane.b32.xlu0 %v6242_v48, %s5916_s26 }
  0x6c   : > { %4711 = vrot.lane.b32.xlu1 %v6246_v53, %s5916_s26 }
  0x6d   : > { %4716 = vrot.lane.b32.xlu0 %v6250_v54, %s5916_s26 }
  0x70   : > { %4721 = vrot.lane.b32.xlu1 %v6254_v61, %s5916_s26 }
  0x71   : > { %4726 = vrot.lane.b32.xlu0 %v6258_v1, %s5916_s26 }
  0x74   : > { %4731 = vrot.lane.b32.xlu1 %v4730_v8, %s5916_s26  ;;  %v566_v8 = vld [vmem:[#allocation2 + $0xd8] sm:$0xff] }
  0x75   : > { %4736 = vrot.lane.b32.xlu0 %v4735_v9, %s5916_s26  ;;  %v567_v9 = vld [vmem:[#allocation2 + $0xe0] sm:$0xff] }
  0x76   : > { %v6343_v13 = vpack.i.bf16 %v567_v9, %v566_v8  ;;  %v579_v8 = vld [vmem:[#allocation2 + $0x170] sm:$0xff] }
  0x77   : > { %v4835_v14 = vpack.i.bf16 %v579_v8, %v578_v4 }
  0x78   : > { %4741 = vrot.lane.b32.xlu1 %v4740_v16, %s5916_s26  ;;  %v570_v16 = vld [vmem:[#allocation2 + $0x108] sm:$0xff] }
  0x79   : > { %4746 = vrot.lane.b32.xlu0 %v4745_v19, %s5916_s26  ;;  %v571_v19 = vld [vmem:[#allocation2 + $0x110] sm:$0xff] }
  0x7a   : > { %v6351_v21 = vpack.i.bf16 %v571_v19, %v570_v16  ;;  %v581_v16 = vld [vmem:[#allocation2 + $0x188] sm:$0xff] }
  0x7b   : > { %v4840_v19 = vpack.i.bf16 %v581_v16, %v580_v15  ;;  %v688_v15 = vld [vmem:[#allocation2 + $0x99] sm:$0xff] }
  0x7c   : > { %4751 = vrot.lane.b32.xlu1 %v4750_v26, %s5916_s26  ;;  %v574_v26 = vld [vmem:[#allocation2 + $0x138] sm:$0xff] }
  0x7d   : > { %4756 = vrot.lane.b32.xlu0 %v4755_v27, %s5916_s26  ;;  %v575_v27 = vld [vmem:[#allocation2 + $0x140] sm:$0xff] }
  0x7e   : > { %v4825_v31 = vpack.i.bf16 %v575_v27, %v574_v26  ;;  %v5807_v27 = vld [vmem:[%s8666_s2 + $0x8] sm:$0xff]  }
  0x80   : > { %4761 = vrot.lane.b32.xlu1 %v4760_v34, %s5916_s26  ;;  %v576_v34 = vld [vmem:[#allocation2 + $0x150] sm:$0xff] }
  0x81   : > { %4766 = vrot.lane.b32.xlu0 %v4765_v36, %s5917_s28  ;;  %v577_v36 = vld [vmem:[#allocation2 + $0x158] sm:$0xff] }
  0x82   : > { %v4830_v9 = vpack.i.bf16 %v577_v36, %v576_v34 }
  0x84   : > { %4771 = vrot.lane.b32.xlu1 %v6287_v43, %s5917_s28 }
  0x85   : > { %4776 = vrot.lane.b32.xlu0 %v6292_v44, %s5917_s28 }
  0x88   : > { %4781 = vrot.lane.b32.xlu1 %v6306_v51, %s5917_s28 }
  0x89   : > { %4786 = vrot.lane.b32.xlu0 %v6312_v52, %s5917_s28 }
  0x8c   : > { %4791 = vrot.lane.b32.xlu1 %v6326_v2, %s5917_s28 }
  0x8d   : > { %4796 = vrot.lane.b32.xlu0 %v6332_v3, %s5917_s28 }
  0x90   : > { %4801 = vrot.lane.b32.xlu1 %v6339_v10, %s5917_s28 }
  0x91   : > { %4806 = vrot.lane.b32.xlu0 %v6343_v13, %s5917_s28 }
  0x94   : > { %4811 = vrot.lane.b32.xlu1 %v6347_v20, %s5917_s28 }
  0x95   : > { %4816 = vrot.lane.b32.xlu0 %v6351_v21, %s5917_s28 }
  0x98   : > { %4821 = vrot.lane.b32.xlu1 %v4820_v28, %s5917_s28 }
  0x99   : > { %4826 = vrot.lane.b32.xlu0 %v4825_v31, %s5917_s28  ;;  %v5808_v31 = vld [vmem:[%s8666_s2] sm:$0xff]  }
  0x9c   : > { %4831 = vrot.lane.b32.xlu1 %v4830_v9, %s5917_s28 }
  0x9d   : > { %4836 = vrot.lane.b32.xlu0 %v4835_v14, %s5917_s28 }
  0xa0   : > { %4841 = vrot.lane.b32.xlu1 %v4840_v19, %s5917_s28  ;;  %v690_v19 = vld [vmem:[#allocation2 + $0xb1] sm:$0xff] }
  0xa1   : > { %4846 = vrot.lane.b32.xlu0 %v6173_v59, %s5918_s29 }
  0xa2   : > { %v6388_v59 = vpop.permute.xlu0 %4606 }
  0xa4   : > { %4851 = vrot.lane.b32.xlu1 %v6169_v55, %s5918_s29 }
  0xa5   : > { %4856 = vrot.lane.b32.xlu0 %v6177_v62, %s5918_s29 }
  0xa8   : > { %4861 = vrot.lane.b32.xlu1 %v6181_v63, %s5918_s29 }
  0xa9   : > { %4866 = vrot.lane.b32.xlu0 %v6185_v5, %s5918_s29 }
  0xac   : > { %4871 = vrot.lane.b32.xlu1 %v6189_v6, %s5918_s29 }
  0xad   : > { %4876 = vrot.lane.b32.xlu0 %v6193_v11, %s5918_s29  ;;  %v612_v11 = vld [vmem:[#allocation2 + $0x181] sm:$0xff] }
  0xb0   : > { %4881 = vrot.lane.b32.xlu1 %v6197_v12, %s5918_s29  ;;  %v613_v12 = vld [vmem:[#allocation2 + $0x189] sm:$0xff] }
  0xb1   : > { %4886 = vrot.lane.b32.xlu0 %v6201_v17, %s5918_s29 }
  0xb4   : > { %4891 = vrot.lane.b32.xlu1 %v6205_v18, %s5918_s29  ;;  %v4920_v18 = vpack.i.bf16 %v613_v12, %v612_v11 }
  0xb5   : > { %4896 = vrot.lane.b32.xlu0 %v6209_v23, %s5918_s29 }
  0xb6   : > { %v6394_v22 = vpop.permute.xlu1 %4616 }
  0xb7   : > { %v6396_v6 = vpop.permute.xlu0 %4611 }
  0xb8   : > { %4901 = vrot.lane.b32.xlu1 %v6213_v24, %s5918_s29  ;;  %v5806_v24 = vld [vmem:[%s8666_s2 + $0x10] ss:$0 sps:$4 sm:$0x33]  }
  0xb9   : > { %4906 = vrot.lane.b32.xlu0 %v6217_v29, %s5918_s29  ;;  %4539 = vmatprep.subr.msk.bf16.mxu0 %vm2121_vm4, %v5806_v24 }
  0xba   : > { %v6402_v17 = vpop.permute.xlu1 %4621 }
  0xbb   : > { %v6404_v25 = vpop.permute.xlu0 %4626 }
  0xbc   : > { %4911 = vrot.lane.b32.xlu1 %v6221_v30, %s5918_s29  ;;  %v2123_v30 = vsel %vm2121_vm4, %v5806_v24, 0 }
  0xbd   : > { %4916 = vrot.lane.b32.xlu0 %v6225_v35, %s5918_s29  ;;  %4502 = vmatpush3.bf16.msra.mxu0 %v2123_v30  ;;  %v691_v30 = vld [vmem:[#allocation2 + $0xc1] sm:$0xff] }
  0xbe   : > { %v6410_v23 = vpop.permute.xlu1 %4631  ;;  %4503 = vmatprep.subr.bf16.mxu0 %v5807_v27 }
  0xbf   : > { %v6412_v26 = vpop.permute.xlu0 %4636 }
  0xc0   : > { %4921 = vrot.lane.b32.xlu1 %v4920_v18, %s5918_s29 }
  0xc1   : > { %4926 = vrot.lane.b32.xlu0 %v6231_v41, %s5919_s11  ;;  %4504 = vmatpush3.bf16.msra.mxu0 %v5807_v27  ;;  %v692_v27 = vld [vmem:[#allocation2 + $0xc9] sm:$0xff] }
  0xc2   : > { %v6420_v29 = vpop.permute.xlu1 %4641  ;;  %4505 = vmatprep.subr.bf16.mxu0 %v5808_v31 }
  0xc3   : > { %v6422_v35 = vpop.permute.xlu0 %4646 }
  0xc4   : > { %4931 = vrot.lane.b32.xlu1 %v6234_v42, %s5919_s11 }
  0xc5   : > { %4936 = vrot.lane.b32.xlu0 %v6238_v47, %s5919_s11  ;;  %4506 = vmatpush3.bf16.msra.mxu0 %v5808_v31 }
  0xc6   : > { %v6431_v28 = vpop.permute.xlu1 %4651 }
  0xc7   : > { %v6433_v41 = vpop.permute.xlu0 %4656 }
  0xc8   : > { %8718 = vst [vmem:[#allocation10_spill] sm:$0xff] %v6433_v41  ;;  %4941 = vrot.lane.b32.xlu1 %v6242_v48, %s5919_s11  ;;  %v4634_v41 = vunpack.i.h.bf16 %v6410_v23 }
  0xc9   : > { %4946 = vrot.lane.b32.xlu0 %v6246_v53, %s5919_s11 }
  0xca   : > { %v6442_v34 = vpop.permute.xlu1 %4661 }
  0xcb   : > { %8719 = vst [vmem:[#allocation11_spill] sm:$0xff] %v6442_v34  ;;  %v6444_v36 = vpop.permute.xlu0 %4666 }
  0xcc   : > { %8720 = vst [vmem:[#allocation12_spill] sm:$0xff] %v6444_v36  ;;  %4951 = vrot.lane.b32.xlu1 %v6287_v43, %s5920_s16 }
  0xcd   : > { %4956 = vrot.lane.b32.xlu0 %v6292_v44, %s5920_s16 }
  0xce   : > { %v6450_v4 = vpop.permute.xlu1 %4671 }
  0xcf   : > { %8721 = vst [vmem:[#allocation13_spill] sm:$0xff] %v6450_v4  ;;  %v6452_v8 = vpop.permute.xlu0 %4676 }
  0xd0   : > { %8722 = vst [vmem:[#allocation14_spill] sm:$0xff] %v6452_v8  ;;  %4961 = vrot.lane.b32.xlu1 %v6169_v55, %s5921_s17 }
  0xd1   : > { %4966 = vrot.lane.b32.xlu0 %v6177_v62, %s5921_s17 }
  0xd2   : > { %v6458_v9 = vpop.permute.xlu1 %4681 }
  0xd3   : > { %8723 = vst [vmem:[#allocation15_spill] sm:$0xff] %v6458_v9  ;;  %v6460_v14 = vpop.permute.xlu0 %4686  ;;  %v696_v9 = vld [vmem:[#allocation2 + $0xf9] sm:$0xff] }
  0xd4   : > { %4971 = vrot.lane.b32.xlu1 %v6234_v42, %s5922_s18 }
  0xd5   : > { %4976 = vrot.lane.b32.xlu0 %v6238_v47, %s5922_s18 }
  0xd6   : > { %v6466_v43 = vpop.permute.xlu1 %4691 }
  0xd7   : > { %v6468_v44 = vpop.permute.xlu0 %4696 }
  0xd8   : > { %4981 = vrot.lane.b32.xlu1 %v6306_v51, %s5920_s16 }
  0xd9   : > { %4986 = vrot.lane.b32.xlu0 %v6312_v52, %s5920_s16  ;;  %v687_v52 = vld [vmem:[#allocation2 + $0x91] sm:$0xff] }
  0xda   : > { %v6474_v55 = vpop.permute.xlu1 %4701 }
  0xdb   : > { %v6476_v62 = vpop.permute.xlu0 %4706 }
  0xdc   : > { %4991 = vrot.lane.b32.xlu1 %v6181_v63, %s5921_s17  ;;  %v5025_v63 = vpack.i.bf16 %v688_v15, %v687_v52  ;;  %v693_v52 = vld [vmem:[#allocation2 + $0xd9] sm:$0xff]  ;;  %v694_v15 = vld [vmem:[#allocation2 + $0xe1] sm:$0xff] }
  0xdd   : > { %4996 = vrot.lane.b32.xlu0 %v6185_v5, %s5921_s17  ;;  %v689_v5 = vld [vmem:[#allocation2 + $0xa9] sm:$0xff] }
  0xde   : > { %v6482_v42 = vpop.permute.xlu1 %4711 }
  0xdf   : > { %v6484_v47 = vpop.permute.xlu0 %4716 }
  0xe0   : > { %8724 = vst [vmem:[#allocation16_spill] sm:$0xff] %v6484_v47  ;;  %5001 = vrot.lane.b32.xlu1 %v6242_v48, %s5922_s18  ;;  %v4629_v47 = vunpack.i.h.bf16 %v6404_v25 }
  0xe1   : > { %5006 = vrot.lane.b32.xlu0 %v6246_v53, %s5922_s18  ;;  %v5030_v53 = vpack.i.bf16 %v690_v19, %v689_v5  ;;  %v725_v19 = vld [vmem:[#allocation2 + $0xda] sm:$0xff] }
  0xe2   : > { %v6490_v51 = vpop.permute.xlu1 %4721 }
  0xe3   : > { %8725 = vst [vmem:[#allocation17_spill] sm:$0xff] %v6490_v51  ;;  %v6492_v16 = vpop.permute.xlu0 %4726  ;;  %v708_v51 = vld [vmem:[#allocation2 + $0x189] sm:$0xff] }
  0xe4   : > { %8726 = vst [vmem:[#allocation18_spill] sm:$0xff] %v6492_v16  ;;  %5011 = vrot.lane.b32.xlu1 %v6250_v54, %s5919_s11 }
  0xe5   : > { %5016 = vrot.lane.b32.xlu0 %v6326_v2, %s5920_s16 }
  0xe6   : > { %v6498_v11 = vpop.permute.xlu1 %4731 }
  0xe7   : > { %8727 = vst [vmem:[#allocation19_spill] sm:$0xff] %v6498_v11  ;;  %v6500_v48 = vpop.permute.xlu0 %4736  ;;  %v674_v11 = vld [vmem:[#allocation2 + $0x170] sm:$0xff] }
  0xe8   : > { %8728 = vst [vmem:[#allocation20_spill] sm:$0xff] %v6500_v48  ;;  %5021 = vrot.lane.b32.xlu1 %v6332_v3, %s5920_s16  ;;  %v701_v48 = vld [vmem:[#allocation2 + $0x139] sm:$0xff] }
  0xe9   : > { %5026 = vrot.lane.b32.xlu0 %v5025_v63, %s5921_s17 }
  0xea   : > { %v6505_v12 = vpop.permute.xlu1 %4741 }
  0xeb   : > { %8729 = vst [vmem:[#allocation21_spill] sm:$0xff] %v6505_v12  ;;  %v6507_v18 = vpop.permute.xlu0 %4746  ;;  %v667_v12 = vld [vmem:[#allocation2 + $0x120] sm:$0xff] }
  0xec   : > { %8730 = vst [vmem:[#allocation22_spill] sm:$0xff] %v6507_v18  ;;  %5031 = vrot.lane.b32.xlu1 %v5030_v53, %s5921_s17  ;;  %v726_v53 = vld [vmem:[#allocation2 + $0xe2] sm:$0xff] }
  0xed   : > { %5036 = vrot.lane.b32.xlu0 %v6250_v54, %s5922_s18  ;;  %v5065_v54 = vpack.i.bf16 %v692_v27, %v691_v30  ;;  %v632_v30 = vld [vmem:[#allocation2 + $0xf2] sm:$0xff]  ;;  %v633_v27 = vld [vmem:[#allocation2 + $0xfa] sm:$0xff] }
  0xee   : > { %v6512_v2 = vpop.permute.xlu1 %4751 }
  0xef   : > { %8731 = vst [vmem:[#allocation23_spill] sm:$0xff] %v6512_v2  ;;  %v6514_v24 = vpop.permute.xlu0 %4756 }
  0xf0   : > { %8732 = vst [vmem:[#allocation24_spill] sm:$0xff] %v6514_v24  ;;  %5041 = vrot.lane.b32.xlu1 %v6254_v61, %s5922_s18 }
  0xf1   : > { %5046 = vrot.lane.b32.xlu0 %v6254_v61, %s5919_s11  ;;  %v5070_v61 = vpack.i.bf16 %v694_v15, %v693_v52  ;;  %v695_v15 = vld [vmem:[#allocation2 + $0xf1] sm:$0xff] }
  0xf2   : > { %v6520_v3 = vpop.permute.xlu1 %4761 }
  0xf3   : > { %8733 = vst [vmem:[#allocation25_spill] sm:$0xff] %v6520_v3  ;;  %v6522_v31 = vpop.permute.xlu0 %4766 }
  0xf4   : > { %5051 = vrot.lane.b32.xlu1 %v6258_v1, %s5919_s11 }
  0xf5   : > { %5056 = vrot.lane.b32.xlu0 %v6339_v10, %s5920_s16  ;;  %v5080_v10 = vpack.i.bf16 %v726_v53, %v725_v19  ;;  %v697_v19 = vld [vmem:[#allocation2 + $0x109] sm:$0xff]  ;;  %v698_v53 = vld [vmem:[#allocation2 + $0x111] sm:$0xff] }
  0xf6   : > { %v6528_v63 = vpop.permute.xlu1 %4771 }
  0xf7   : > { %v6530_v5 = vpop.permute.xlu0 %4776 }
  0xf8   : > { %5061 = vrot.lane.b32.xlu1 %v6343_v13, %s5920_s16 }
  0xf9   : > { %5066 = vrot.lane.b32.xlu0 %v5065_v54, %s5921_s17  ;;  %v5090_v54 = vpack.i.bf16 %v633_v27, %v632_v30  ;;  %v729_v30 = vld [vmem:[#allocation2 + $0x10a] sm:$0xff]  ;;  %v730_v27 = vld [vmem:[#allocation2 + $0x112] sm:$0xff] }
  0xfa   : > { %v6535_v0 = vpop.permute.xlu1 %4781 }
  0xfb   : > { %v6537_v3 = vpop.permute.xlu0 %4786 }
  0xfc   : > { %5071 = vrot.lane.b32.xlu1 %v5070_v61, %s5921_s17 }
  0xfd   : > { %5076 = vrot.lane.b32.xlu0 %v6258_v1, %s5922_s18  ;;  %v5105_v1 = vpack.i.bf16 %v696_v9, %v695_v15  ;;  %v636_v9 = vld [vmem:[#allocation2 + $0x122] sm:$0xff]  ;;  %v637_v15 = vld [vmem:[#allocation2 + $0x12a] sm:$0xff] }
  0xfe   : > { %v6542_v24 = vpop.permute.xlu1 %4791 }
  0xff   : > { %8734 = vst [vmem:[#allocation26_spill] sm:$0xff] %v6542_v24  ;;  %v6544_v13 = vpop.permute.xlu0 %4796 }
 0x100   : > { %8735 = vst [vmem:[#allocation27_spill] sm:$0xff] %v6544_v13  ;;  %5081 = vrot.lane.b32.xlu1 %v5080_v10, %s5922_s18  ;;  %v707_v13 = vld [vmem:[#allocation2 + $0x181] sm:$0xff] }
 0x101   : > { %5086 = vrot.lane.b32.xlu0 %v5080_v10, %s5919_s11  ;;  %v5110_v10 = vpack.i.bf16 %v698_v53, %v697_v19 }
 0x102   : > { %v6548_v52 = vpop.permute.xlu1 %4801 }
 0x103   : > { %8736 = vst [vmem:[#allocation28_spill] sm:$0xff] %v6548_v52  ;;  %v6550_v61 = vpop.permute.xlu0 %4806  ;;  %v706_v52 = vld [vmem:[#allocation2 + $0x171] sm:$0xff] }
 0x104   : > { %8737 = vst [vmem:[#allocation29_spill] sm:$0xff] %v6550_v61  ;;  %5091 = vrot.lane.b32.xlu1 %v5090_v54, %s5919_s11  ;;  %v673_v61 = vld [vmem:[#allocation2 + $0x168] sm:$0xff] }
 0x105   : > { %5096 = vrot.lane.b32.xlu0 %v6347_v20, %s5920_s16  ;;  %v5120_v20 = vpack.i.bf16 %v730_v27, %v729_v30  ;;  %v699_v30 = vld [vmem:[#allocation2 + $0x121] sm:$0xff]  ;;  %v5180_v16 = vpack.i.bf16 %v674_v11, %v673_v61  ;;  %v4609_v11 = vunpack.i.h.bf16 %v6388_v59 }
 0x106   : > { %v6555_v8 = vpop.permute.xlu1 %4811 }
 0x107   : > { %8738 = vst [vmem:[#allocation30_spill] sm:$0xff] %v6555_v8  ;;  %v6557_v2 = vpop.permute.xlu0 %4816  ;;  %v702_v8 = vld [vmem:[#allocation2 + $0x141] sm:$0xff] }
 0x108   : > { %8739 = vst [vmem:[#allocation31_spill] sm:$0xff] %v6557_v2  ;;  %5101 = vrot.lane.b32.xlu1 %v6351_v21, %s5920_s16  ;;  %v668_v21 = vld [vmem:[#allocation2 + $0x128] sm:$0xff] }
 0x109   : > { %5106 = vrot.lane.b32.xlu0 %v5105_v1, %s5921_s17  ;;  %v5130_v1 = vpack.i.bf16 %v637_v15, %v636_v9  ;;  %v5135_v53 = vpack.i.bf16 %v668_v21, %v667_v12  ;;  %v5150_v12 = vpack.i.bf16 %v702_v8, %v701_v48  ;;  %v733_v15 = vld [vmem:[#allocation2 + $0x13a] sm:$0xff]  ;;  %v734_v21 = vld [vmem:[#allocation2 + $0x142] sm:$0xff] }
 0x10a   : > { %v6562_v18 = vpop.permute.xlu1 %4821 }
 0x10b   : > { %8740 = vst [vmem:[#allocation32_spill] sm:$0xff] %v6562_v18  ;;  %v6564_v4 = vpop.permute.xlu0 %4826  ;;  %v670_v18 = vld [vmem:[#allocation2 + $0x140] sm:$0xff] }
 0x10c   : > { %8741 = vst [vmem:[#allocation33_spill] sm:$0xff] %v6564_v4  ;;  %5111 = vrot.lane.b32.xlu1 %v5110_v10, %s5921_s17  ;;  %v669_v4 = vld [vmem:[#allocation2 + $0x138] sm:$0xff] }
 0x10d   : > { %5116 = vrot.lane.b32.xlu0 %v5090_v54, %s5922_s18  ;;  %v700_v54 = vld [vmem:[#allocation2 + $0x129] sm:$0xff] }
 0x10e   : > { %v6568_v2 = vpop.permute.xlu1 %4831 }
 0x10f   : > { %8742 = vst [vmem:[#allocation34_spill] sm:$0xff] %v6568_v2  ;;  %v6570_v19 = vpop.permute.xlu0 %4836  ;;  %v5140_v2 = vpack.i.bf16 %v670_v18, %v669_v4  ;;  %v5160_v4 = vpack.i.bf16 %v734_v21, %v733_v15  ;;  %v640_v18 = vld [vmem:[#allocation2 + $0x152] sm:$0xff] }
 0x110   : > { %8743 = vst [vmem:[#allocation35_spill] sm:$0xff] %v6570_v19  ;;  %5121 = vrot.lane.b32.xlu1 %v5120_v20, %s5922_s18  ;;  %v5145_v19 = vpack.i.bf16 %v700_v54, %v699_v30  ;;  %v671_v54 = vld [vmem:[#allocation2 + $0x150] sm:$0xff] }
 0x111   : > { %5126 = vrot.lane.b32.xlu0 %v5120_v20, %s5919_s11  ;;  %v703_v15 = vld [vmem:[#allocation2 + $0x151] sm:$0xff] }
 0x112   : > { %v6574_v10 = vpop.permute.xlu1 %4841 }
 0x113   : > { %8744 = vst [vmem:[#allocation36_spill] sm:$0xff] %v6574_v10  ;;  %v6576_v27 = vpop.permute.xlu0 %4846 }
 0x114   : > { %5131 = vrot.lane.b32.xlu1 %v5130_v1, %s5919_s11 }
 0x115   : > { %5136 = vrot.lane.b32.xlu0 %v5135_v53, %s5920_s16  ;;  %v641_v53 = vld [vmem:[#allocation2 + $0x15a] sm:$0xff] }
 0x116   : > { %v6580_v9 = vpop.permute.xlu1 %4851  ;;  %v5170_v48 = vpack.i.bf16 %v641_v53, %v640_v18 }
 0x117   : > { %v6582_v20 = vpop.permute.xlu0 %4856 }
 0x118   : > { %5141 = vrot.lane.b32.xlu1 %v5140_v2, %s5920_s16  ;;  %v672_v2 = vld [vmem:[#allocation2 + $0x158] sm:$0xff] }
 0x119   : > { %5146 = vrot.lane.b32.xlu0 %v5145_v19, %s5921_s17  ;;  %v5175_v19 = vpack.i.bf16 %v672_v2, %v671_v54  ;;  %v737_v54 = vld [vmem:[#allocation2 + $0x16a] sm:$0xff]  ;;  %v738_v2 = vld [vmem:[#allocation2 + $0x172] sm:$0xff] }
 0x11a   : > { %v6586_v10 = vpop.permute.xlu1 %4861  ;;  %v5200_v61 = vpack.i.bf16 %v738_v2, %v737_v54  ;;  %v4613_v2 = vunpack.i.l.bf16 %v6396_v6 }
 0x11b   : > { %v6588_v36 = vpop.permute.xlu0 %4866 }
 0x11c   : > { %8745 = vst [vmem:[#allocation37_spill] sm:$0xff] %v6588_v36  ;;  %5151 = vrot.lane.b32.xlu1 %v5150_v12, %s5921_s17  ;;  %v710_v36 = vld [vmem:[#allocation2 + $0x1a1] sm:$0xff] }
 0x11d   : > { %5156 = vrot.lane.b32.xlu0 %v5130_v1, %s5922_s18  ;;  %v704_v1 = vld [vmem:[#allocation2 + $0x159] sm:$0xff] }
 0x11e   : > { %v6592_v30 = vpop.permute.xlu1 %4871  ;;  %v5185_v34 = vpack.i.bf16 %v704_v1, %v703_v15  ;;  %v644_v15 = vld [vmem:[#allocation2 + $0x182] sm:$0xff]  ;;  %v645_v1 = vld [vmem:[#allocation2 + $0x18a] sm:$0xff] }
 0x11f   : > { %8746 = vst [vmem:[#allocation38_spill] sm:$0xff] %v6592_v30  ;;  %v6594_v8 = vpop.permute.xlu0 %4876  ;;  %v709_v30 = vld [vmem:[#allocation2 + $0x199] sm:$0xff] }
 0x120   : > { %8747 = vst [vmem:[#allocation39_spill] sm:$0xff] %v6594_v8  ;;  %5161 = vrot.lane.b32.xlu1 %v5160_v4, %s5922_s18  ;;  %v705_v8 = vld [vmem:[#allocation2 + $0x169] sm:$0xff] }
 0x121   : > { %5166 = vrot.lane.b32.xlu0 %v5160_v4, %s5919_s11  ;;  %v5190_v53 = vpack.i.bf16 %v706_v52, %v705_v8  ;;  %v676_v8 = vld [vmem:[#allocation2 + $0x188] sm:$0xff] }
 0x122   : > { %v6598_v12 = vpop.permute.xlu1 %4881 }
 0x123   : > { %8748 = vst [vmem:[#allocation40_spill] sm:$0xff] %v6598_v12  ;;  %v6600_v21 = vpop.permute.xlu0 %4886 }
 0x124   : > { %8749 = vst [vmem:[#allocation41_spill] sm:$0xff] %v6600_v21  ;;  %5171 = vrot.lane.b32.xlu1 %v5170_v48, %s5919_s11 }
 0x125   : > { %5176 = vrot.lane.b32.xlu0 %v5175_v19, %s5920_s16  ;;  %v455_v19 = vld [vmem:[#allocation2 + $0x8] sm:$0xff] }
 0x126   : > { %v6604_v18 = vpop.permute.xlu1 %4891  ;;  %v6625_v54 = vsel %vm265_vm0, %v455_v19, %v4609_v11 }
 0x127   : > { %8750 = vst [vmem:[#allocation42_spill] sm:$0xff] %v6604_v18  ;;  %v6606_v4 = vpop.permute.xlu0 %4896 }
 0x128   : > { %8751 = vst [vmem:[#allocation43_spill] sm:$0xff] %v6606_v4  ;;  %5181 = vrot.lane.b32.xlu1 %v5180_v16, %s5920_s16  ;;  %v4608_v16 = vunpack.i.l.bf16 %v6388_v59  ;;  %v454_v4 = vld [vmem:[#allocation2] sm:$0xff]  ;;  %v6630_v59 = vpack.i.bf16 %v645_v1, %v644_v15  ;;  %v4633_v15 = vunpack.i.l.bf16 %v6410_v23  ;;  %v1769_v23 = vsel %vm265_vm0, %v6268_v32, %v4613_v2 }
 0x129   : > { %5186 = vrot.lane.b32.xlu0 %v5185_v34, %s5921_s17  ;;  %v675_v34 = vld [vmem:[#allocation2 + $0x180] sm:$0xff]  ;;  %v5230_v32 = vpack.i.bf16 %v710_v36, %v709_v30  ;;  %v4643_v36 = vunpack.i.l.bf16 %v6420_v29  ;;  %v4688_v30 = vunpack.i.l.bf16 %v6460_v14 }
 0x12a   : > { %v6610_v21 = vpop.permute.xlu1 %4901  ;;  %v5215_v11 = vpack.i.bf16 %v676_v8, %v675_v34  ;;  %v1767_v19 = vsel %vm265_vm0, %v454_v4, %v4608_v16  ;;  %v5225_v16 = vpack.i.bf16 %v708_v51, %v707_v13  ;;  %v6650_v34 = vld [vmem:[#allocation2 + $0x1a2] sm:$0xff]  ;;  %v6666_v13 = vsel %vm265_vm0, %v6296_v46, %v4629_v47 }
 0x12b   : > { %8752 = vst [vmem:[#allocation44_spill] sm:$0xff] %v6610_v21  ;;  %v6612_v12 = vpop.permute.xlu0 %4906  ;;  %v4619_v21 = vunpack.i.h.bf16 %v6394_v22  ;;  %v4644_v47 = vunpack.i.h.bf16 %v6420_v29  ;;  %v4649_v29 = vunpack.i.h.bf16 %v6422_v35 }
 0x12c   : > { %8753 = vst [vmem:[#allocation45_spill] sm:$0xff] %v6612_v12  ;;  %5191 = vrot.lane.b32.xlu1 %v5190_v53, %s5921_s17  ;;  %v4618_v12 = vunpack.i.l.bf16 %v6394_v22  ;;  %v677_v53 = vld [vmem:[#allocation2 + $0x198] sm:$0xff]  ;;  %v4624_v22 = vunpack.i.h.bf16 %v6402_v17 }
 0x12d   : > { %5196 = vrot.lane.b32.xlu0 %v5170_v48, %s5922_s18  ;;  %v4614_v48 = vunpack.i.h.bf16 %v6396_v6  ;;  %v4628_v6 = vunpack.i.l.bf16 %v6404_v25  ;;  %v1772_v24 = vsel %vm265_vm0, %v6278_v38, %v4619_v21  ;;  %v6648_v25 = vld [vmem:[#allocation2 + $0x19a] sm:$0xff] }
 0x12e   : > { %v6618_v52 = vpop.permute.xlu1 %4911  ;;  %v1774_v38 = vsel %vm265_vm0, %v6282_v40, %v4624_v22  ;;  %v6679_v40 = vsel %vm265_vm0, %v6298_v49, %v4633_v15  ;;  %v5240_v46 = vpack.i.bf16 %v6650_v34, %v6648_v25  ;;  %v6715_v22 = vsel %vm265_vm0, %v6320_v60, %v4644_v47 }
 0x12f   : > { %8754 = vst [vmem:[#allocation46_spill] sm:$0xff] %v6618_v52  ;;  %v6622_v18 = vpop.permute.xlu0 %4916  ;;  %v678_v52 = vld [vmem:[#allocation2 + $0x1a0] sm:$0xff]  ;;  %v1770_v8 = vsel %vm265_vm0, %v6270_v33, %v4614_v48  ;;  %v6671_v33 = vsel %vm265_vm0, %v6294_v45, %v4628_v6  ;;  %v4689_v45 = vunpack.i.h.bf16 %v6460_v14  ;;  %v4648_v14 = vunpack.i.l.bf16 %v6422_v35 }
 0x130   : > { %8755 = vst [vmem:[#allocation47_spill] sm:$0xff] %v6622_v18  ;;  %5201 = vrot.lane.b32.xlu1 %v5200_v61, %s5922_s18  ;;  %v4623_v18 = vunpack.i.l.bf16 %v6402_v17  ;;  %v1771_v17 = vsel %vm265_vm0, %v6276_v37, %v4618_v12  ;;  %v5220_v4 = vpack.i.bf16 %v678_v52, %v677_v53  ;;  %v4639_v37 = vunpack.i.h.bf16 %v6412_v26 }
 0x131   : > { %5206 = vrot.lane.b32.xlu0 %v5200_v61, %s5919_s11  ;;  %v4638_v12 = vunpack.i.l.bf16 %v6412_v26  ;;  %v6675_v26 = vsel %vm265_vm0, %v6300_v50, %v4634_v41  ;;  %v4694_v41 = vunpack.i.h.bf16 %v6466_v43  ;;  %v4699_v52 = vunpack.i.h.bf16 %v6468_v44 }
 0x132   : > { %v6640_v1 = vpop.permute.xlu1 %4921  ;;  %v1773_v51 = vsel %vm265_vm0, %v6280_v39, %v4623_v18  ;;  %v6693_v50 = vsel %vm265_vm0, %v6316_v57, %v4639_v37  ;;  %v4693_v18 = vunpack.i.l.bf16 %v6466_v43  ;;  %v4698_v53 = vunpack.i.l.bf16 %v6468_v44 }
 0x133   : > { %v6646_v61 = vpop.permute.xlu0 %4926  ;;  %v6697_v49 = vsel %vm265_vm0, %v6314_v56, %v4638_v12  ;;  %v4704_v57 = vunpack.i.h.bf16 %v6474_v55  ;;  %v4703_v56 = vunpack.i.l.bf16 %v6474_v55  ;;  %v4769_v48 = vunpack.i.h.bf16 %v6522_v31 }
 0x134   : > { %5211 = vrot.lane.b32.xlu1 %v6630_v59, %s5919_s11  ;;  %v4768_v43 = vunpack.i.l.bf16 %v6522_v31  ;;  %v6719_v44 = vsel %vm265_vm0, %v6318_v58, %v4643_v36  ;;  %v1800_v55 = vsel %vm1799_vm5, %v1767_v19, %v4688_v30  ;;  %v1802_v31 = vsel %vm1799_vm5, %v1769_v23, %v4693_v18  ;;  %s5924_s11 = smov 80  }
 0x135   : > { %5216 = vrot.lane.b32.xlu0 %v5215_v11, %s5920_s16  ;;  %v1801_v11 = vsel %vm1799_vm5, %v6625_v54, %v4689_v45  ;;  %v1803_v15 = vsel %vm1799_vm5, %v1770_v8, %v4694_v41  ;;  %v4773_v60 = vunpack.i.l.bf16 %v6528_v63  ;;  %v6732_v58 = vsel %vm1799_vm5, %v1772_v24, %v4699_v52 }
 0x136   : > { %v6681_v39 = vpop.permute.xlu1 %4931  ;;  %v6735_v54 = vsel %vm1799_vm5, %v1771_v17, %v4698_v53  ;;  %v4709_v19 = vunpack.i.h.bf16 %v6476_v62  ;;  %v6742_v25 = vsel %vm1799_vm5, %v1774_v38, %v4704_v57  ;;  %v1833_v24 = vsel %vm1832_vm6, %v1800_v55, %v4768_v43 }
 0x137   : > { %v6689_v21 = vpop.permute.xlu0 %4936  ;;  %v1834_v34 = vsel %vm1832_vm6, %v1801_v11, %v4769_v48  ;;  %v4779_v23 = vunpack.i.h.bf16 %v6530_v5  ;;  %v4778_v8 = vunpack.i.l.bf16 %v6530_v5  ;;  %v4849_v37 = vunpack.i.h.bf16 %v6576_v27 }
 0x138   : > { %5221 = vrot.lane.b32.xlu1 %v5220_v4, %s5920_s16  ;;  %v4774_v4 = vunpack.i.h.bf16 %v6528_v63  ;;  %v6745_v63 = vsel %vm1799_vm5, %v1773_v51, %v4703_v56  ;;  %v1835_v38 = vsel %vm1832_vm6, %v1802_v31, %v4773_v60  ;;  %v4853_v47 = vunpack.i.l.bf16 %v6580_v9 }
 0x139   : > { %5226 = vrot.lane.b32.xlu0 %v5225_v16, %s5921_s17  ;;  %v4708_v16 = vunpack.i.l.bf16 %v6476_v62  ;;  %v4784_v36 = vunpack.i.h.bf16 %v6535_v0  ;;  %v4783_v45 = vunpack.i.l.bf16 %v6535_v0  ;;  %v4929_v30 = vunpack.i.h.bf16 %v6646_v61 }
 0x13a   : > { %v6711_v2 = vpop.permute.xlu1 %4941  ;;  %v1836_v51 = vsel %vm1832_vm6, %v1803_v15, %v4774_v4  ;;  %v4928_v41 = vunpack.i.l.bf16 %v6646_v61  ;;  %v4933_v18 = vunpack.i.l.bf16 %v6681_v39  ;;  %v1867_v0 = vsel %vm311_vm3, %v1835_v38, %v4853_v47 }
 0x13b   : > { %v6724_v6 = vpop.permute.xlu0 %4946  ;;  %v4944_v5 = vunpack.i.h.bf16 %v6711_v2 }
 0x13c   : > { %5231 = vrot.lane.b32.xlu1 %v5230_v32, %s5921_s17  ;;  %v4854_v32 = vunpack.i.h.bf16 %v6580_v9  ;;  %v1900_v60 = vsel %vm1897_vm7, %v1867_v0, %v4933_v18  ;;  %v4713_v0 = vunpack.i.l.bf16 %v6482_v42  ;;  %v4948_v62 = vunpack.i.l.bf16 %v6724_v6 }
 0x13d   : > { %5236 = vrot.lane.b32.xlu0 %v6630_v59, %s5922_s18  ;;  %v4848_v59 = vunpack.i.l.bf16 %v6576_v27  ;;  %v4934_v27 = vunpack.i.h.bf16 %v6681_v39 }
 0x13e   : > { %v4952_v17 = vpop.permute.xlu1 %4951  ;;  %v1868_v11 = vsel %vm311_vm3, %v1836_v51, %v4854_v32 }
 0x13f   : > { %v4957_v12 = vpop.permute.xlu0 %4956  ;;  %v4954_v52 = vunpack.i.h.bf16 %v4952_v17  ;;  %v4953_v53 = vunpack.i.l.bf16 %v4952_v17  ;;  %v1865_v9 = vsel %vm311_vm3, %v1833_v24, %v4848_v59  ;;  %v1901_v24 = vsel %vm1897_vm7, %v1868_v11, %v4934_v27 }
 0x140   : > { %5241 = vrot.lane.b32.xlu1 %v5240_v46, %s5922_s18  ;;  %v1866_v46 = vsel %vm311_vm3, %v1834_v34, %v4849_v37  ;;  %v4959_v56 = vunpack.i.h.bf16 %v4957_v12  ;;  %v4958_v48 = vunpack.i.l.bf16 %v4957_v12  ;;  %v1898_v31 = vsel %vm1897_vm7, %v1865_v9, %v4928_v41 }
 0x141   : > { %v1899_v39 = vsel %vm1897_vm7, %v1866_v46, %v4929_v30  ;;  %v1931_v17 = vsel %vm1930_vm8, %v1898_v31, %v4953_v53  ;;  %v4714_v9 = vunpack.i.h.bf16 %v6482_v42  ;;  %v4859_v11 = vunpack.i.h.bf16 %v6582_v20 }
 0x142   : > { %v4962_v57 = vpop.permute.xlu1 %4961  ;;  %v1932_v37 = vsel %vm1930_vm8, %v1899_v39, %v4954_v52  ;;  %v1933_v59 = vsel %vm1930_vm8, %v1900_v60, %v4958_v48  ;;  %v1934_v12 = vsel %vm1930_vm8, %v1901_v24, %v4959_v56  ;;  %v1837_v39 = vsel %vm1832_vm6, %v6735_v54, %v4778_v8 }
 0x143   : > { %v4967_v43 = vpop.permute.xlu0 %4966  ;;  %v4964_v61 = vunpack.i.h.bf16 %v4962_v57  ;;  %v4963_v55 = vunpack.i.l.bf16 %v4962_v57  ;;  %v4863_v60 = vunpack.i.l.bf16 %v6586_v10  ;;  %v1839_v24 = vsel %vm1832_vm6, %v6745_v63, %v4783_v45 }
 0x144   : > { %v4969_v15 = vunpack.i.h.bf16 %v4967_v43  ;;  %v4968_v4 = vunpack.i.l.bf16 %v4967_v43  ;;  %v4938_v54 = vunpack.i.l.bf16 %v6689_v21 }
 0x145   : > { %v1964_v41 = vsel %vm1963_vm9, %v1931_v17, %v4963_v55  ;;  %v1965_v18 = vsel %vm1963_vm9, %v1932_v37, %v4964_v61  ;;  %v4858_v61 = vunpack.i.l.bf16 %v6582_v20  ;;  %v1840_v20 = vsel %vm1832_vm6, %v6742_v25, %v4784_v36 }
 0x146   : > { %v4972_v34 = vpop.permute.xlu1 %4971  ;;  %v1966_v27 = vsel %vm1963_vm9, %v1933_v59, %v4968_v4  ;;  %v1967_v57 = vsel %vm1963_vm9, %v1934_v12, %v4969_v15  ;;  %v1838_v15 = vsel %vm1832_vm6, %v6732_v58, %v4779_v23  ;;  %v4864_v4 = vunpack.i.h.bf16 %v6586_v10 }
 0x147   : > { %v4974_v38 = vunpack.i.h.bf16 %v4972_v34  ;;  %v4973_v51 = vunpack.i.l.bf16 %v4972_v34  ;;  %v4977_v32 = vpop.permute.xlu0 %4976  ;;  %v4939_v34 = vunpack.i.h.bf16 %v6689_v21  ;;  %v4943_v58 = vunpack.i.l.bf16 %v6711_v2 }
 0x148   : > { %v4979_v47 = vunpack.i.h.bf16 %v4977_v32  ;;  %v4978_v30 = vunpack.i.l.bf16 %v4977_v32  ;;  %v1869_v17 = vsel %vm311_vm3, %v1837_v39, %v4858_v61  ;;  %v1870_v63 = vsel %vm311_vm3, %v1838_v15, %v4859_v11 }
 0x149   : > { %v1997_v53 = vsel %vm1996_vm10, %v1964_v41, %v4973_v51  ;;  %v1998_v52 = vsel %vm1996_vm10, %v1965_v18, %v4974_v38  ;;  %v1871_v36 = vsel %vm311_vm3, %v1839_v24, %v4863_v60  ;;  %v1872_v21 = vsel %vm311_vm3, %v1840_v20, %v4864_v4 }
 0x14a   : > { %v1999_v46 = vsel %vm1996_vm10, %v1966_v27, %v4978_v30  ;;  %v2000_v56 = vsel %vm1996_vm10, %v1967_v57, %v4979_v47  ;;  %v4982_v48 = vpop.permute.xlu1 %4981  ;;  %v2029_v43 = vpack.c.bf16 %v1998_v52, %v1997_v53  ;;  %v1902_v38 = vsel %vm1897_vm7, %v1869_v17, %v4938_v54 }
 0x14b   : > { %v4987_v55 = vpop.permute.xlu0 %4986  ;;  %v2030_v31 = vpack.c.bf16 %v2000_v56, %v1999_v46  ;;  %v4984_v23 = vunpack.i.h.bf16 %v4982_v48  ;;  %v4983_v10 = vunpack.i.l.bf16 %v4982_v48  ;;  %v1903_v2 = vsel %vm1897_vm7, %v1870_v63, %v4939_v34 }
 0x14c   : > { %4507 = vmatprep.mubr.msk.bf16.mxu0 %vm2072_vm11, %v2029_v43  ;;  %v4989_v45 = vunpack.i.h.bf16 %v4987_v55  ;;  %v4988_v37 = vunpack.i.l.bf16 %v4987_v55  ;;  %v1904_v47 = vsel %vm1897_vm7, %v1871_v36, %v4943_v58  ;;  %v1905_v30 = vsel %vm1897_vm7, %v1872_v21, %v4944_v5 }
 0x14d   : > { %4508 = vmatmul.mubr.msk.bf16.vlgmr.msra.gmra.mxu0 %vm2072_vm11, %v2030_v31  ;;  %v1935_v41 = vsel %vm1930_vm8, %v1902_v38, %v4983_v10  ;;  %v1936_v18 = vsel %vm1930_vm8, %v1903_v2, %v4984_v23  ;;  %v4788_v4 = vunpack.i.l.bf16 %v6537_v3  ;;  %v6831_v54 = vsel %vm265_vm0, %v6334_v7, %v4649_v29 }
 0x14e   : > { %v4992_v8 = vpop.permute.xlu1 %4991  ;;  %v1938_v57 = vsel %vm1930_vm8, %v1905_v30, %v4989_v45  ;;  %v1937_v53 = vsel %vm1930_vm8, %v1904_v47, %v4988_v37  ;;  %v4654_v5 = vunpack.i.h.bf16 %v6431_v28  ;;  %v4789_v58 = vunpack.i.h.bf16 %v6537_v3  ;;  %v8757_v45 = vld [vmem:[#allocation37_spill] sm:$0xff] }
 0x14f   : > { %v4997_v25 = vpop.permute.xlu0 %4996  ;;  %v4994_v59 = vunpack.i.h.bf16 %v4992_v8  ;;  %v4993_v12 = vunpack.i.l.bf16 %v4992_v8  ;;  %v8756_v8 = vld [vmem:[#allocation26_spill] sm:$0xff]  ;;  %v4869_v37 = vunpack.i.h.bf16 %v8757_v45  ;;  %v4653_v36 = vunpack.i.l.bf16 %v6431_v28 }
 0x150   : > { %v4999_v51 = vunpack.i.h.bf16 %v4997_v25  ;;  %v4998_v32 = vunpack.i.l.bf16 %v4997_v25  ;;  %v4794_v17 = vunpack.i.h.bf16 %v8756_v8  ;;  %v4793_v63 = vunpack.i.l.bf16 %v8756_v8 }
 0x151   : > { %v1968_v48 = vsel %vm1963_vm9, %v1935_v41, %v4993_v12  ;;  %v1969_v43 = vsel %vm1963_vm9, %v1936_v18, %v4994_v59  ;;  %v4868_v25 = vunpack.i.l.bf16 %v8757_v45  ;;  %v1808_v7 = vsel %vm1799_vm5, %v6671_v33, %v4708_v16  ;;  %v8759_v45 = vld [vmem:[#allocation10_spill] sm:$0xff] }
 0x152   : > { %v5002_v27 = vpop.permute.xlu1 %5001  ;;  %v1970_v55 = vsel %vm1963_vm9, %v1937_v53, %v4998_v32  ;;  %v1971_v31 = vsel %vm1963_vm9, %v1938_v57, %v4999_v51  ;;  %v1809_v3 = vsel %vm1799_vm5, %v6666_v13, %v4709_v19  ;;  %v1811_v29 = vsel %vm1799_vm5, %v6675_v26, %v4714_v9  ;;  %v8758_v19 = vld [vmem:[#allocation38_spill] sm:$0xff] }
 0x153   : > { %v5004_v52 = vunpack.i.h.bf16 %v5002_v27  ;;  %v5003_v46 = vunpack.i.l.bf16 %v5002_v27  ;;  %v5007_v56 = vpop.permute.xlu0 %5006  ;;  %v1810_v21 = vsel %vm1799_vm5, %v6679_v40, %v4713_v0  ;;  %v1841_v59 = vsel %vm1832_vm6, %v1808_v7, %v4788_v4 }
 0x154   : > { %v5009_v11 = vunpack.i.h.bf16 %v5007_v56  ;;  %v5008_v61 = vunpack.i.l.bf16 %v5007_v56  ;;  %v4949_v33 = vunpack.i.h.bf16 %v6724_v6  ;;  %v1842_v13 = vsel %vm1832_vm6, %v1809_v3, %v4789_v58 }
 0x155   : > { %v2001_v39 = vsel %vm1996_vm10, %v1968_v48, %v5003_v46  ;;  %v2002_v15 = vsel %vm1996_vm10, %v1969_v43, %v5004_v52  ;;  %v4873_v12 = vunpack.i.l.bf16 %v8758_v19  ;;  %v1843_v2 = vsel %vm1832_vm6, %v1810_v21, %v4793_v63 }
 0x156   : > { %v2003_v60 = vsel %vm1996_vm10, %v1970_v55, %v5008_v61  ;;  %v2004_v24 = vsel %vm1996_vm10, %v1971_v31, %v5009_v11  ;;  %v5012_v20 = vpop.permute.xlu1 %5011  ;;  %v2031_v34 = vpack.c.bf16 %v2002_v15, %v2001_v39  ;;  %v1844_v42 = vsel %vm1832_vm6, %v1811_v29, %v4794_v17 }
 0x157   : > { %v5017_v23 = vpop.permute.xlu0 %5016  ;;  %v2032_v10 = vpack.c.bf16 %v2004_v24, %v2003_v60  ;;  %v1873_v40 = vsel %vm311_vm3, %v1841_v59, %v4868_v25  ;;  %v1874_v0 = vsel %vm311_vm3, %v1842_v13, %v4869_v37  ;;  %v4874_v51 = vunpack.i.h.bf16 %v8758_v19  ;;  %v8760_v25 = vld [vmem:[#allocation16_spill] sm:$0xff]  ;;  %v8761_v59 = vld [vmem:[#allocation17_spill] sm:$0xff]  ;;  %v5811_v13 = vld [vmem:[#allocation2 + $0xc0] sm:$0xff] }
 0x158   : > { %4511 = vmatprep.mubr.msk.bf16.mxu0 %vm2072_vm11, %v2031_v34  ;;  %v5019_v38 = vunpack.i.h.bf16 %v5017_v23  ;;  %v5018_v26 = vunpack.i.l.bf16 %v5017_v23  ;;  %v5013_v32 = vunpack.i.l.bf16 %v5012_v20  ;;  %v1906_v30 = vsel %vm1897_vm7, %v1873_v40, %v4948_v62 }
 0x159   : > { %4512 = vmatmul.mubr.msk.bf16.gmra.mxu0 %vm2072_vm11, %v2032_v10  ;;  %v1907_v41 = vsel %vm1897_vm7, %v1874_v0, %v4949_v33  ;;  %v5014_v18 = vunpack.i.h.bf16 %v5012_v20  ;;  %v1875_v53 = vsel %vm311_vm3, %v1843_v2, %v4873_v12  ;;  %v1876_v31 = vsel %vm311_vm3, %v1844_v42, %v4874_v51  ;;  %v5812_v42 = vld [vmem:[#allocation2 + $0xe0] sm:$0xff]  ;;  %v5813_v0 = vld [vmem:[#allocation2 + $0xd8] sm:$0xff] }
 0x15a   : > { %v5022_v16 = vpop.permute.xlu1 %5021  ;;  %v1939_v52 = vsel %vm1930_vm8, %v1906_v30, %v5018_v26  ;;  %v1940_v46 = vsel %vm1930_vm8, %v1907_v41, %v5019_v38  ;;  %v1908_v39 = vsel %vm1897_vm7, %v1875_v53, %v5013_v32  ;;  %v4659_v37 = vunpack.i.h.bf16 %v8759_v45  ;;  %v8762_v38 = vld [vmem:[#allocation27_spill] sm:$0xff] }
 0x15b   : > { %v5027_v9 = vpop.permute.xlu0 %5026  ;;  %v5023_v27 = vunpack.i.l.bf16 %v5022_v16  ;;  %v5024_v56 = vunpack.i.h.bf16 %v5022_v16  ;;  %v1909_v60 = vsel %vm1897_vm7, %v1876_v31, %v5014_v18  ;;  %v4719_v7 = vunpack.i.h.bf16 %v8760_v25  ;;  %v8764_v41 = vld [vmem:[#allocation39_spill] sm:$0xff] }
 0x15c   : > { %v5029_v6 = vunpack.i.h.bf16 %v5027_v9  ;;  %v5028_v47 = vunpack.i.l.bf16 %v5027_v9  ;;  %v4718_v21 = vunpack.i.l.bf16 %v8760_v25  ;;  %v4724_v33 = vunpack.i.h.bf16 %v8761_v59 }
 0x15d   : > { %v1941_v24 = vsel %vm1930_vm8, %v1908_v39, %v5023_v27  ;;  %v1942_v23 = vsel %vm1930_vm8, %v1909_v60, %v5024_v56  ;;  %v6894_v19 = vsel %vm265_vm0, %v5811_v13, %v4648_v14  ;;  %v4723_v12 = vunpack.i.l.bf16 %v8761_v59  ;;  %v5814_v27 = vld [vmem:[#allocation2 + $0xf8] sm:$0xff] }
 0x15e   : > { %v5032_v57 = vpop.permute.xlu1 %5031  ;;  %v1972_v15 = vsel %vm1963_vm9, %v1939_v52, %v5028_v47  ;;  %v1973_v4 = vsel %vm1963_vm9, %v1940_v46, %v5029_v6  ;;  %v4798_v26 = vunpack.i.l.bf16 %v8762_v38  ;;  %v6901_v40 = vsel %vm265_vm0, %v5812_v42, %v4654_v5  ;;  %v8763_v6 = vld [vmem:[#allocation28_spill] sm:$0xff] }
 0x15f   : > { %v5037_v48 = vpop.permute.xlu0 %5036  ;;  %v5034_v43 = vunpack.i.h.bf16 %v5032_v57  ;;  %v5033_v11 = vunpack.i.l.bf16 %v5032_v57  ;;  %v6906_v35 = vsel %vm265_vm0, %v5813_v0, %v4653_v36  ;;  %v4658_v14 = vunpack.i.l.bf16 %v8759_v45 }
 0x160   : > { %v5039_v61 = vunpack.i.h.bf16 %v5037_v48  ;;  %v5038_v55 = vunpack.i.l.bf16 %v5037_v48  ;;  %v4799_v51 = vunpack.i.h.bf16 %v8762_v38  ;;  %v4804_v47 = vunpack.i.h.bf16 %v8763_v6 }
 0x161   : > { %v1974_v3 = vsel %vm1963_vm9, %v1941_v24, %v5033_v11  ;;  %v1975_v29 = vsel %vm1963_vm9, %v1942_v23, %v5034_v43  ;;  %v4803_v30 = vunpack.i.l.bf16 %v8763_v6  ;;  %v4879_v18 = vunpack.i.h.bf16 %v8764_v41 }
 0x162   : > { %v2005_v20 = vsel %vm1996_vm10, %v1972_v15, %v5038_v55  ;;  %v2006_v34 = vsel %vm1996_vm10, %v1973_v4, %v5039_v61  ;;  %v5042_v58 = vpop.permute.xlu1 %5041  ;;  %v4878_v5 = vunpack.i.l.bf16 %v8764_v41  ;;  %v6916_v28 = vsel %vm265_vm0, %v5814_v27, %v4659_v37  ;;  %v8765_v61 = vld [vmem:[#allocation40_spill] sm:$0xff]  ;;  %v8767_v41 = vld [vmem:[#allocation18_spill] sm:$0xff] }
 0x163   : > { %v5044_v10 = vunpack.i.h.bf16 %v5042_v58  ;;  %v5043_v8 = vunpack.i.l.bf16 %v5042_v58  ;;  %v5047_v17 = vpop.permute.xlu0 %5046  ;;  %v2033_v63 = vpack.c.bf16 %v2006_v34, %v2005_v20  ;;  %v1812_v36 = vsel %vm1799_vm5, %v6697_v49, %v4718_v21 }
 0x164   : > { %v1813_v57 = vsel %vm1799_vm5, %v6693_v50, %v4719_v7  ;;  %v1815_v53 = vsel %vm1799_vm5, %v6715_v22, %v4724_v33  ;;  %v1814_v52 = vsel %vm1799_vm5, %v6719_v44, %v4723_v12  ;;  %v1845_v46 = vsel %vm1832_vm6, %v1812_v36, %v4798_v26 }
 0x165   : > { %v2007_v62 = vsel %vm1996_vm10, %v1974_v3, %v5043_v8  ;;  %v2008_v16 = vsel %vm1996_vm10, %v1975_v29, %v5044_v10  ;;  %4515 = vmatprep.mubr.msk.bf16.mxu0 %vm2072_vm11, %v2033_v63  ;;  %v5049_v56 = vunpack.i.h.bf16 %v5047_v17  ;;  %v5048_v48 = vunpack.i.l.bf16 %v5047_v17 }
 0x166   : > { %v5052_v9 = vpop.permute.xlu1 %5051  ;;  %v2034_v2 = vpack.c.bf16 %v2008_v16, %v2007_v62  ;;  %v1846_v11 = vsel %vm1832_vm6, %v1813_v57, %v4799_v51  ;;  %v4883_v55 = vunpack.i.l.bf16 %v8765_v61  ;;  %v1847_v50 = vsel %vm1832_vm6, %v1814_v52, %v4803_v30  ;;  %v8768_v57 = vld [vmem:[#allocation19_spill] sm:$0xff] }
 0x167   : > { %v5057_v32 = vpop.permute.xlu0 %5056  ;;  %v1848_v15 = vsel %vm1832_vm6, %v1815_v53, %v4804_v47  ;;  %v1877_v22 = vsel %vm311_vm3, %v1845_v46, %v4878_v5  ;;  %v1878_v44 = vsel %vm311_vm3, %v1846_v11, %v4879_v18  ;;  %v4884_v4 = vunpack.i.h.bf16 %v8765_v61  ;;  %v8766_v47 = vld [vmem:[#allocation11_spill] sm:$0xff]  ;;  %v8769_v11 = vld [vmem:[#allocation29_spill] sm:$0xff] }
 0x168   : > { %4516 = vmatmul.mubr.msk.bf16.gmra.mxu0 %vm2072_vm11, %v2034_v2  ;;  %v5059_v31 = vunpack.i.h.bf16 %v5057_v32  ;;  %v5058_v49 = vunpack.i.l.bf16 %v5057_v32  ;;  %v5053_v60 = vunpack.i.l.bf16 %v5052_v9  ;;  %v1910_v34 = vsel %vm1897_vm7, %v1877_v22, %v5048_v48 }
 0x169   : > { %v1911_v58 = vsel %vm1897_vm7, %v1878_v44, %v5049_v56  ;;  %v5054_v23 = vunpack.i.h.bf16 %v5052_v9  ;;  %v1879_v17 = vsel %vm311_vm3, %v1847_v50, %v4883_v55  ;;  %v1880_v33 = vsel %vm311_vm3, %v1848_v15, %v4884_v4  ;;  %v5815_v56 = vld [vmem:[#allocation2 + $0xf0] sm:$0xff]  ;;  %v8771_v4 = vld [vmem:[#allocation30_spill] sm:$0xff] }
 0x16a   : > { %v5062_v43 = vpop.permute.xlu1 %5061  ;;  %v1943_v63 = vsel %vm1930_vm8, %v1910_v34, %v5058_v49  ;;  %v1944_v37 = vsel %vm1930_vm8, %v1911_v58, %v5059_v31  ;;  %v1912_v62 = vsel %vm1897_vm7, %v1879_v17, %v5053_v60  ;;  %v4664_v30 = vunpack.i.h.bf16 %v8766_v47  ;;  %v8772_v60 = vld [vmem:[#allocation41_spill] sm:$0xff]  ;;  %v5816_v34 = vld [vmem:[#allocation2 + $0x110] sm:$0xff] }
 0x16b   : > { %v5067_v39 = vpop.permute.xlu0 %5066  ;;  %v5063_v10 = vunpack.i.l.bf16 %v5062_v43  ;;  %v5064_v25 = vunpack.i.h.bf16 %v5062_v43  ;;  %v1913_v12 = vsel %vm1897_vm7, %v1880_v33, %v5054_v23  ;;  %v4729_v18 = vunpack.i.h.bf16 %v8767_v41 }
 0x16c   : > { %v5069_v24 = vunpack.i.h.bf16 %v5067_v39  ;;  %v5068_v20 = vunpack.i.l.bf16 %v5067_v39  ;;  %v4728_v36 = vunpack.i.l.bf16 %v8767_v41  ;;  %v4734_v53 = vunpack.i.h.bf16 %v8768_v57  ;;  %v8770_v39 = vld [vmem:[#allocation12_spill] sm:$0xff] }
 0x16d   : > { %v1945_v38 = vsel %vm1930_vm8, %v1912_v62, %v5063_v10  ;;  %v1946_v42 = vsel %vm1930_vm8, %v1913_v12, %v5064_v25  ;;  %v6960_v48 = vsel %vm265_vm0, %v5815_v56, %v4658_v14  ;;  %v4733_v43 = vunpack.i.l.bf16 %v8768_v57 }
 0x16e   : > { %v5072_v8 = vpop.permute.xlu1 %5071  ;;  %v1976_v16 = vsel %vm1963_vm9, %v1943_v63, %v5068_v20  ;;  %v1977_v13 = vsel %vm1963_vm9, %v1944_v37, %v5069_v24  ;;  %v4808_v61 = vunpack.i.l.bf16 %v8769_v11  ;;  %v4663_v49 = vunpack.i.l.bf16 %v8766_v47 }
 0x16f   : > { %v5077_v7 = vpop.permute.xlu0 %5076  ;;  %v5074_v3 = vunpack.i.h.bf16 %v5072_v8  ;;  %v5073_v29 = vunpack.i.l.bf16 %v5072_v8  ;;  %v4669_v50 = vunpack.i.h.bf16 %v8770_v39  ;;  %v4668_v15 = vunpack.i.l.bf16 %v8770_v39 }
 0x170   : > { %v5079_v21 = vunpack.i.h.bf16 %v5077_v7  ;;  %v5078_v59 = vunpack.i.l.bf16 %v5077_v7  ;;  %v4809_v22 = vunpack.i.h.bf16 %v8769_v11  ;;  %v4814_v45 = vunpack.i.h.bf16 %v8771_v4 }
 0x171   : > { %v1978_v5 = vsel %vm1963_vm9, %v1945_v38, %v5073_v29  ;;  %v1979_v27 = vsel %vm1963_vm9, %v1946_v42, %v5074_v3  ;;  %v4813_v14 = vunpack.i.l.bf16 %v8771_v4  ;;  %v4889_v24 = vunpack.i.h.bf16 %v8772_v60  ;;  %v8773_v29 = vld [vmem:[#allocation42_spill] sm:$0xff] }
 0x172   : > { %v2009_v26 = vsel %vm1996_vm10, %v1976_v16, %v5078_v59  ;;  %v2010_v9 = vsel %vm1996_vm10, %v1977_v13, %v5079_v21  ;;  %v5082_v2 = vpop.permute.xlu1 %5081  ;;  %v4888_v20 = vunpack.i.l.bf16 %v8772_v60  ;;  %v6974_v58 = vsel %vm265_vm0, %v5816_v34, %v4664_v30 }
 0x173   : > { %v5084_v0 = vunpack.i.h.bf16 %v5082_v2  ;;  %v5083_v51 = vunpack.i.l.bf16 %v5082_v2  ;;  %v5087_v32 = vpop.permute.xlu0 %5086  ;;  %v2035_v6 = vpack.c.bf16 %v2010_v9, %v2009_v26  ;;  %v1816_v23 = vsel %vm1799_vm5, %v6894_v19, %v4728_v36 }
 0x174   : > { %v1817_v10 = vsel %vm1799_vm5, %v6831_v54, %v4729_v18  ;;  %v1819_v8 = vsel %vm1799_vm5, %v6901_v40, %v4734_v53  ;;  %v1818_v17 = vsel %vm1799_vm5, %v6906_v35, %v4733_v43  ;;  %v1849_v63 = vsel %vm1832_vm6, %v1816_v23, %v4808_v61  ;;  %v8775_v23 = vld [vmem:[#allocation21_spill] sm:$0xff] }
 0x175   : > { %v2011_v52 = vsel %vm1996_vm10, %v1978_v5, %v5083_v51  ;;  %v2012_v46 = vsel %vm1996_vm10, %v1979_v27, %v5084_v0  ;;  %4519 = vmatprep.mubr.msk.bf16.mxu0 %vm2072_vm11, %v2035_v6  ;;  %v5089_v37 = vunpack.i.h.bf16 %v5087_v32  ;;  %v5088_v25 = vunpack.i.l.bf16 %v5087_v32 }
 0x176   : > { %v5092_v55 = vpop.permute.xlu1 %5091  ;;  %v2036_v31 = vpack.c.bf16 %v2012_v46, %v2011_v52  ;;  %v1850_v3 = vsel %vm1832_vm6, %v1817_v10, %v4809_v22  ;;  %v4893_v21 = vunpack.i.l.bf16 %v8773_v29  ;;  %v1851_v54 = vsel %vm1832_vm6, %v1818_v17, %v4813_v14  ;;  %v8774_v14 = vld [vmem:[#allocation20_spill] sm:$0xff] }
 0x177   : > { %v5097_v44 = vpop.permute.xlu0 %5096  ;;  %v1852_v62 = vsel %vm1832_vm6, %v1819_v8, %v4814_v45  ;;  %v1881_v40 = vsel %vm311_vm3, %v1849_v63, %v4888_v20  ;;  %v1882_v35 = vsel %vm311_vm3, %v1850_v3, %v4889_v24  ;;  %v4894_v16 = vunpack.i.h.bf16 %v8773_v29 }
 0x178   : > { %4520 = vmatmul.mubr.msk.bf16.gmra.mxu0 %vm2072_vm11, %v2036_v31  ;;  %v5099_v59 = vunpack.i.h.bf16 %v5097_v44  ;;  %v5098_v19 = vunpack.i.l.bf16 %v5097_v44  ;;  %v5093_v13 = vunpack.i.l.bf16 %v5092_v55  ;;  %v1914_v26 = vsel %vm1897_vm7, %v1881_v40, %v5088_v25 }
 0x179   : > { %v1915_v9 = vsel %vm1897_vm7, %v1882_v35, %v5089_v37  ;;  %v5094_v2 = vunpack.i.h.bf16 %v5092_v55  ;;  %v1883_v51 = vsel %vm311_vm3, %v1851_v54, %v4893_v21  ;;  %v1884_v57 = vsel %vm311_vm3, %v1852_v62, %v4894_v16  ;;  %v8776_v37 = vld [vmem:[#allocation31_spill] sm:$0xff]  ;;  %v8778_v62 = vld [vmem:[#allocation13_spill] sm:$0xff]  ;;  %v8779_v35 = vld [vmem:[#allocation32_spill] sm:$0xff] }
 0x17a   : > { %v5102_v7 = vpop.permute.xlu1 %5101  ;;  %v1947_v32 = vsel %vm1930_vm8, %v1914_v26, %v5098_v19  ;;  %v1948_v6 = vsel %vm1930_vm8, %v1915_v9, %v5099_v59  ;;  %v1916_v53 = vsel %vm1897_vm7, %v1883_v51, %v5093_v13  ;;  %v4739_v60 = vunpack.i.h.bf16 %v8774_v14  ;;  %v5817_v59 = vld [vmem:[#allocation2 + $0x108] sm:$0xff] }
 0x17b   : > { %v5107_v33 = vpop.permute.xlu0 %5106  ;;  %v5103_v42 = vunpack.i.l.bf16 %v5102_v7  ;;  %v5104_v30 = vunpack.i.h.bf16 %v5102_v7  ;;  %v1917_v56 = vsel %vm1897_vm7, %v1884_v57, %v5094_v2  ;;  %v4738_v24 = vunpack.i.l.bf16 %v8774_v14  ;;  %v8780_v26 = vld [vmem:[#allocation43_spill] sm:$0xff] }
 0x17c   : > { %v5109_v12 = vunpack.i.h.bf16 %v5107_v33  ;;  %v5108_v38 = vunpack.i.l.bf16 %v5107_v33  ;;  %v4744_v10 = vunpack.i.h.bf16 %v8775_v23  ;;  %v4743_v63 = vunpack.i.l.bf16 %v8775_v23  ;;  %v5818_v33 = vld [vmem:[#allocation2 + $0x128] sm:$0xff] }
 0x17d   : > { %v1949_v43 = vsel %vm1930_vm8, %v1916_v53, %v5103_v42  ;;  %v1950_v31 = vsel %vm1930_vm8, %v1917_v56, %v5104_v30  ;;  %v4819_v25 = vunpack.i.h.bf16 %v8776_v37  ;;  %v4818_v7 = vunpack.i.l.bf16 %v8776_v37 }
 0x17e   : > { %v5112_v0 = vpop.permute.xlu1 %5111  ;;  %v1980_v52 = vsel %vm1963_vm9, %v1947_v32, %v5108_v38  ;;  %v1981_v46 = vsel %vm1963_vm9, %v1948_v6, %v5109_v12  ;;  %v8777_v21 = vmov 0.0   ;;  %v1789_v19 = vsel %vm265_vm0, %v5817_v59, %v4663_v49 }
 0x17f   : > { %v5117_v41 = vpop.permute.xlu0 %5116  ;;  %v5114_v18 = vunpack.i.h.bf16 %v5112_v0  ;;  %v5113_v5 = vunpack.i.l.bf16 %v5112_v0  ;;  %315 = vst.msk [vmem:[#allocation3 + $0x10] sm:$0x3] %vm314_vm12, %v8777_v21  ;;  %319 = vst.msk [vmem:[#allocation3 + $0x1a8] sm:$0x3] %vm314_vm12, %v8777_v21  ;;  %v7025_v54 = vsel %vm265_vm0, %v5818_v33, %v4669_v50  ;;  %v4674_v40 = vunpack.i.h.bf16 %v8778_v62 }
 0x180   : > { %v5119_v27 = vunpack.i.h.bf16 %v5117_v41  ;;  %v5118_v36 = vunpack.i.l.bf16 %v5117_v41  ;;  %v4823_v16 = vunpack.i.l.bf16 %v8779_v35  ;;  %v4673_v12 = vunpack.i.l.bf16 %v8778_v62  ;;  %321 = vst.msk [vmem:[#allocation3] sm:$0x1] %vm320_vm13, %v8777_v21  ;;  %322 = vst.msk [vmem:[#allocation3 + $0x18] sm:$0x1] %vm320_vm13, %v8777_v21 }
 0x181   : > { %v1982_v20 = vsel %vm1963_vm9, %v1949_v43, %v5113_v5  ;;  %v1983_v34 = vsel %vm1963_vm9, %v1950_v31, %v5114_v18  ;;  %v4824_v38 = vunpack.i.h.bf16 %v8779_v35  ;;  %v4899_v9 = vunpack.i.h.bf16 %v8780_v26  ;;  %v8781_v18 = vld [vmem:[#allocation44_spill] sm:$0xff]  ;;  %323 = vst.msk [vmem:[#allocation3 + $0x30] sm:$0x1] %vm320_vm13, %v8777_v21  ;;  %324 = vst.msk [vmem:[#allocation3 + $0x48] sm:$0x1] %vm320_vm13, %v8777_v21 }
 0x182   : > { %v2013_v11 = vsel %vm1996_vm10, %v1980_v52, %v5118_v36  ;;  %v2014_v61 = vsel %vm1996_vm10, %v1981_v46, %v5119_v27  ;;  %v5122_v55 = vpop.permute.xlu1 %5121  ;;  %v4898_v47 = vunpack.i.l.bf16 %v8780_v26  ;;  %v1820_v49 = vsel %vm1799_vm5, %v6960_v48, %v4738_v24  ;;  %v5819_v26 = vld [vmem:[#allocation2 + $0x120] sm:$0xff]  ;;  %325 = vst.msk [vmem:[#allocation3 + $0x60] sm:$0x1] %vm320_vm13, %v8777_v21  ;;  %326 = vst.msk [vmem:[#allocation3 + $0x78] sm:$0x1] %vm320_vm13, %v8777_v21 }
 0x183   : > { %v5124_v22 = vunpack.i.h.bf16 %v5122_v55  ;;  %v5123_v44 = vunpack.i.l.bf16 %v5122_v55  ;;  %v5127_v4 = vpop.permute.xlu0 %5126  ;;  %v2037_v45 = vpack.c.bf16 %v2014_v61, %v2013_v11  ;;  %v1821_v50 = vsel %vm1799_vm5, %v6916_v28, %v4739_v60  ;;  %v2740_v11 = vld [vmem:[#allocation3 + $0x1] sm:$0xff]  ;;  %327 = vst.msk [vmem:[#allocation3 + $0x90] sm:$0x1] %vm320_vm13, %v8777_v21  ;;  %328 = vst.msk [vmem:[#allocation3 + $0xa8] sm:$0x1] %vm320_vm13, %v8777_v21 }
 0x184   : > { %v1823_v2 = vsel %vm1799_vm5, %v6974_v58, %v4744_v10  ;;  %v5128_v42 = vunpack.i.l.bf16 %v5127_v4  ;;  %v1822_v0 = vsel %vm1799_vm5, %v1789_v19, %v4743_v63  ;;  %v1853_v51 = vsel %vm1832_vm6, %v1820_v49, %v4818_v7  ;;  %329 = vst.msk [vmem:[#allocation3 + $0xc0] sm:$0x1] %vm320_vm13, %v8777_v21  ;;  %330 = vst.msk [vmem:[#allocation3 + $0xd8] sm:$0x1] %vm320_vm13, %v8777_v21 }
 0x185   : > { %v2015_v8 = vsel %vm1996_vm10, %v1982_v20, %v5123_v44  ;;  %v2016_v17 = vsel %vm1996_vm10, %v1983_v34, %v5124_v22  ;;  %4523 = vmatprep.mubr.msk.bf16.mxu0 %vm2072_vm11, %v2037_v45  ;;  %v1854_v32 = vsel %vm1832_vm6, %v1821_v50, %v4819_v25  ;;  %v5129_v6 = vunpack.i.h.bf16 %v5127_v4  ;;  %331 = vst.msk [vmem:[#allocation3 + $0xf0] sm:$0x1] %vm320_vm13, %v8777_v21 }
 0x186   : > { %v5132_v3 = vpop.permute.xlu1 %5131  ;;  %v2038_v29 = vpack.c.bf16 %v2016_v17, %v2015_v8  ;;  %v1855_v41 = vsel %vm1832_vm6, %v1822_v0, %v4823_v16  ;;  %v4903_v5 = vunpack.i.l.bf16 %v8781_v18  ;;  %v1856_v28 = vsel %vm1832_vm6, %v1823_v2, %v4824_v38  ;;  %v2741_v61 = vld [vmem:[#allocation3 + $0x9] sm:$0xff]  ;;  %v8783_v0 = vld [vmem:[#allocation23_spill] sm:$0xff]  ;;  %332 = vst.msk [vmem:[#allocation3 + $0x108] sm:$0x1] %vm320_vm13, %v8777_v21  ;;  %333 = vst.msk [vmem:[#allocation3 + $0x120] sm:$0x1] %vm320_vm13, %v8777_v21 }
 0x187   : > { %v5137_v13 = vpop.permute.xlu0 %5136  ;;  %v1885_v58 = vsel %vm311_vm3, %v1853_v51, %v4898_v47  ;;  %v1886_v57 = vsel %vm311_vm3, %v1854_v32, %v4899_v9  ;;  %v4904_v53 = vunpack.i.h.bf16 %v8781_v18  ;;  %v5133_v46 = vunpack.i.l.bf16 %v5132_v3  ;;  %v8782_v47 = vld [vmem:[#allocation22_spill] sm:$0xff]  ;;  %334 = vst.msk [vmem:[#allocation3 + $0x138] sm:$0x1] %vm320_vm13, %v8777_v21  ;;  %335 = vst.msk [vmem:[#allocation3 + $0x150] sm:$0x1] %vm320_vm13, %v8777_v21 }
 0x188   : > { %4524 = vmatmul.mubr.msk.bf16.gmra.mxu0 %vm2072_vm11, %v2038_v29  ;;  %v5139_v48 = vunpack.i.h.bf16 %v5137_v13  ;;  %v5138_v27 = vunpack.i.l.bf16 %v5137_v13  ;;  %v1918_v52 = vsel %vm1897_vm7, %v1885_v58, %v5128_v42  ;;  %v1919_v55 = vsel %vm1897_vm7, %v1886_v57, %v5129_v6  ;;  %336 = vst.msk [vmem:[#allocation3 + $0x168] sm:$0x1] %vm320_vm13, %v8777_v21  ;;  %337 = vst.msk [vmem:[#allocation3 + $0x180] sm:$0x1] %vm320_vm13, %v8777_v21 }
 0x189   : > { %v5134_v31 = vunpack.i.h.bf16 %v5132_v3  ;;  %v5245_v4 = vpack.i.bf16 %v2741_v61, %v2740_v11  ;;  %v1887_v45 = vsel %vm311_vm3, %v1855_v41, %v4903_v5  ;;  %v1888_v17 = vsel %vm311_vm3, %v1856_v28, %v4904_v53  ;;  %v8785_v41 = vld [vmem:[#allocation33_spill] sm:$0xff]  ;;  %338 = vst.msk [vmem:[#allocation3 + $0x198] sm:$0x1] %vm320_vm13, %v8777_v21  ;;  %339 = vst.msk [vmem:[#allocation3 + $0x11] sm:$0x1] %vm320_vm13, %v8777_v21 }
 0x18a   : > { %v5142_v30 = vpop.permute.xlu1 %5141  ;;  %v1951_v14 = vsel %vm1930_vm8, %v1918_v52, %v5138_v27  ;;  %v1952_v60 = vsel %vm1930_vm8, %v1919_v55, %v5139_v48  ;;  %v1920_v63 = vsel %vm1897_vm7, %v1887_v45, %v5133_v46  ;;  %v1791_v9 = vsel %vm265_vm0, %v5819_v26, %v4668_v15  ;;  %v5820_v27 = vld [vmem:[#allocation2 + $0x140] sm:$0xff]  ;;  %v5821_v28 = vld [vmem:[#allocation2 + $0x138] sm:$0xff]  ;;  %340 = vst.msk [vmem:[#allocation3 + $0x29] sm:$0x1] %vm320_vm13, %v8777_v21 }
 0x18b   : > { %v5147_v36 = vpop.permute.xlu0 %5146  ;;  %v5143_v22 = vunpack.i.l.bf16 %v5142_v30  ;;  %v5144_v24 = vunpack.i.h.bf16 %v5142_v30  ;;  %5246 = vrot.lane.b32.xlu0 %v5245_v4, %s5918_s29  ;;  %v1921_v7 = vsel %vm1897_vm7, %v1888_v17, %v5134_v31  ;;  %v4749_v49 = vunpack.i.h.bf16 %v8782_v47  ;;  %v8784_v30 = vld [vmem:[#allocation14_spill] sm:$0xff]  ;;  %v8787_v11 = vld [vmem:[#allocation45_spill] sm:$0xff]  ;;  %341 = vst.msk [vmem:[#allocation3 + $0x41] sm:$0x1] %vm320_vm13, %v8777_v21  ;;  %342 = vst.msk [vmem:[#allocation3 + $0x59] sm:$0x1] %vm320_vm13, %v8777_v21 }
 0x18c   : > { %v5149_v56 = vunpack.i.h.bf16 %v5147_v36  ;;  %v5148_v43 = vunpack.i.l.bf16 %v5147_v36  ;;  %v4748_v42 = vunpack.i.l.bf16 %v8782_v47  ;;  %v4754_v51 = vunpack.i.h.bf16 %v8783_v0  ;;  %v8786_v46 = vld [vmem:[#allocation34_spill] sm:$0xff]  ;;  %343 = vst.msk [vmem:[#allocation3 + $0x71] sm:$0x1] %vm320_vm13, %v8777_v21  ;;  %344 = vst.msk [vmem:[#allocation3 + $0x89] sm:$0x1] %vm320_vm13, %v8777_v21 }
 0x18d   : > { %v1953_v3 = vsel %vm1930_vm8, %v1920_v63, %v5143_v22  ;;  %v1954_v33 = vsel %vm1930_vm8, %v1921_v7, %v5144_v24  ;;  %v4679_v39 = vunpack.i.h.bf16 %v8784_v30  ;;  %v4753_v15 = vunpack.i.l.bf16 %v8783_v0  ;;  %345 = vst.msk [vmem:[#allocation3 + $0xa1] sm:$0x1] %vm320_vm13, %v8777_v21  ;;  %346 = vst.msk [vmem:[#allocation3 + $0xb9] sm:$0x1] %vm320_vm13, %v8777_v21 }
 0x18e   : > { %v5152_v44 = vpop.permute.xlu1 %5151  ;;  %v1984_v37 = vsel %vm1963_vm9, %v1951_v14, %v5148_v43  ;;  %v1985_v25 = vsel %vm1963_vm9, %v1952_v60, %v5149_v56  ;;  %v4828_v18 = vunpack.i.l.bf16 %v8785_v41  ;;  %v1794_v36 = vsel %vm265_vm0, %v5820_v27, %v4674_v40  ;;  %v8788_v40 = vld [vmem:[#allocation15_spill] sm:$0xff]  ;;  %347 = vst.msk [vmem:[#allocation3 + $0xd1] sm:$0x1] %vm320_vm13, %v8777_v21  ;;  %348 = vst.msk [vmem:[#allocation3 + $0xe9] sm:$0x1] %vm320_vm13, %v8777_v21 }
 0x18f   : > { %v5157_v20 = vpop.permute.xlu0 %5156  ;;  %v5154_v34 = vunpack.i.h.bf16 %v5152_v44  ;;  %v5153_v23 = vunpack.i.l.bf16 %v5152_v44  ;;  %v1793_v58 = vsel %vm265_vm0, %v5821_v28, %v4673_v12  ;;  %v4678_v57 = vunpack.i.l.bf16 %v8784_v30  ;;  %v5825_v30 = vld [vmem:[#allocation2 + $0x168] sm:$0xff]  ;;  %349 = vst.msk [vmem:[#allocation3 + $0x101] sm:$0x1] %vm320_vm13, %v8777_v21  ;;  %350 = vst.msk [vmem:[#allocation3 + $0x119] sm:$0x1] %vm320_vm13, %v8777_v21 }
 0x190   : > { %v5159_v10 = vunpack.i.h.bf16 %v5157_v20  ;;  %v5158_v8 = vunpack.i.l.bf16 %v5157_v20  ;;  %v4829_v53 = vunpack.i.h.bf16 %v8785_v41  ;;  %v4834_v56 = vunpack.i.h.bf16 %v8786_v46  ;;  %v8789_v20 = vld [vmem:[#allocation46_spill] sm:$0xff]  ;;  %351 = vst.msk [vmem:[#allocation3 + $0x131] sm:$0x1] %vm320_vm13, %v8777_v21  ;;  %352 = vst.msk [vmem:[#allocation3 + $0x149] sm:$0x1] %vm320_vm13, %v8777_v21 }
 0x191   : > { %v1986_v50 = vsel %vm1963_vm9, %v1953_v3, %v5153_v23  ;;  %v1987_v2 = vsel %vm1963_vm9, %v1954_v33, %v5154_v34  ;;  %v4833_v43 = vunpack.i.l.bf16 %v8786_v46  ;;  %v4909_v61 = vunpack.i.h.bf16 %v8787_v11  ;;  %v8790_v46 = vld [vmem:[#allocation24_spill] sm:$0xff]  ;;  %353 = vst.msk [vmem:[#allocation3 + $0x161] sm:$0x1] %vm320_vm13, %v8777_v21  ;;  %354 = vst.msk [vmem:[#allocation3 + $0x179] sm:$0x1] %vm320_vm13, %v8777_v21 }
 0x192   : > { %v2017_v29 = vsel %vm1996_vm10, %v1984_v37, %v5158_v8  ;;  %v2018_v59 = vsel %vm1996_vm10, %v1985_v25, %v5159_v10  ;;  %v5162_v19 = vpop.permute.xlu1 %5161  ;;  %v4908_v55 = vunpack.i.l.bf16 %v8787_v11  ;;  %v4684_v31 = vunpack.i.h.bf16 %v8788_v40  ;;  %355 = vst.msk [vmem:[#allocation3 + $0x191] sm:$0x1] %vm320_vm13, %v8777_v21  ;;  %356 = vst.msk [vmem:[#allocation3 + $0x1a9] sm:$0x1] %vm320_vm13, %v8777_v21 }
 0x193   : > { %v5164_v35 = vunpack.i.h.bf16 %v5162_v19  ;;  %v5163_v16 = vunpack.i.l.bf16 %v5162_v19  ;;  %v5167_v13 = vpop.permute.xlu0 %5166  ;;  %v2039_v38 = vpack.c.bf16 %v2018_v59, %v2017_v29  ;;  %v1824_v62 = vsel %vm1799_vm5, %v1791_v9, %v4748_v42 }
 0x194   : > { %v1825_v12 = vsel %vm1799_vm5, %v7025_v54, %v4749_v49  ;;  %v1827_v22 = vsel %vm1799_vm5, %v1794_v36, %v4754_v51  ;;  %v1826_v44 = vsel %vm1799_vm5, %v1793_v58, %v4753_v15  ;;  %v1857_v4 = vsel %vm1832_vm6, %v1824_v62, %v4828_v18 }
 0x195   : > { %v2019_v32 = vsel %vm1996_vm10, %v1986_v50, %v5163_v16  ;;  %v2020_v6 = vsel %vm1996_vm10, %v1987_v2, %v5164_v35  ;;  %4527 = vmatprep.mubr.msk.bf16.mxu0 %vm2072_vm11, %v2039_v38  ;;  %v5169_v45 = vunpack.i.h.bf16 %v5167_v13  ;;  %v5168_v14 = vunpack.i.l.bf16 %v5167_v13 }
 0x196   : > { %v5172_v5 = vpop.permute.xlu1 %5171  ;;  %v2040_v48 = vpack.c.bf16 %v2020_v6, %v2019_v32  ;;  %v1858_v24 = vsel %vm1832_vm6, %v1825_v12, %v4829_v53  ;;  %v4913_v34 = vunpack.i.l.bf16 %v8789_v20  ;;  %v1859_v17 = vsel %vm1832_vm6, %v1826_v44, %v4833_v43 }
 0x197   : > { %v5177_v52 = vpop.permute.xlu0 %5176  ;;  %v1860_v54 = vsel %vm1832_vm6, %v1827_v22, %v4834_v56  ;;  %v1889_v63 = vsel %vm311_vm3, %v1857_v4, %v4908_v55  ;;  %v1890_v37 = vsel %vm311_vm3, %v1858_v24, %v4909_v61  ;;  %v4914_v25 = vunpack.i.h.bf16 %v8789_v20  ;;  %v8791_v55 = vld [vmem:[#allocation25_spill] sm:$0xff]  ;;  %v8792_v4 = vld [vmem:[#allocation35_spill] sm:$0xff] }
 0x198   : > { %4528 = vmatmul.mubr.msk.bf16.gmra.mxu0 %vm2072_vm11, %v2040_v48  ;;  %v5179_v23 = vunpack.i.h.bf16 %v5177_v52  ;;  %v5178_v10 = vunpack.i.l.bf16 %v5177_v52  ;;  %v5173_v7 = vunpack.i.l.bf16 %v5172_v5  ;;  %v1922_v59 = vsel %vm1897_vm7, %v1889_v63, %v5168_v14  ;;  %v5822_v24 = vld [vmem:[#allocation2 + $0x158] sm:$0xff]  ;;  %v8793_v63 = vld [vmem:[#allocation36_spill] sm:$0xff] }
 0x199   : > { %v1923_v19 = vsel %vm1897_vm7, %v1890_v37, %v5169_v45  ;;  %v5174_v33 = vunpack.i.h.bf16 %v5172_v5  ;;  %v1891_v13 = vsel %vm311_vm3, %v1859_v17, %v4913_v34  ;;  %v1892_v0 = vsel %vm311_vm3, %v1860_v54, %v4914_v25  ;;  %v5823_v34 = vld [vmem:[#allocation2 + $0x150] sm:$0xff] }
 0x19a   : > { %v5182_v60 = vpop.permute.xlu1 %5181  ;;  %v1955_v38 = vsel %vm1930_vm8, %v1922_v59, %v5178_v10  ;;  %v1956_v26 = vsel %vm1930_vm8, %v1923_v19, %v5179_v23  ;;  %v1924_v51 = vsel %vm1897_vm7, %v1891_v13, %v5173_v7  ;;  %v4683_v52 = vunpack.i.l.bf16 %v8788_v40  ;;  %v5824_v10 = vld [vmem:[#allocation2 + $0x170] sm:$0xff]  ;;  %v8794_v7 = vld [vmem:[#allocation47_spill] sm:$0xff] }
 0x19b   : > { %v5187_v8 = vpop.permute.xlu0 %5186  ;;  %v5183_v35 = vunpack.i.l.bf16 %v5182_v60  ;;  %v5184_v9 = vunpack.i.h.bf16 %v5182_v60  ;;  %v1925_v15 = vsel %vm1897_vm7, %v1892_v0, %v5174_v33  ;;  %v4759_v56 = vunpack.i.h.bf16 %v8790_v46 }
 0x19c   : > { %v5189_v3 = vunpack.i.h.bf16 %v5187_v8  ;;  %v5188_v29 = vunpack.i.l.bf16 %v5187_v8  ;;  %v4758_v61 = vunpack.i.l.bf16 %v8790_v46  ;;  %v4764_v62 = vunpack.i.h.bf16 %v8791_v55 }
 0x19d   : > { %v1957_v41 = vsel %vm1930_vm8, %v1924_v51, %v5183_v35  ;;  %v1958_v27 = vsel %vm1930_vm8, %v1925_v15, %v5184_v9  ;;  %v4763_v44 = vunpack.i.l.bf16 %v8791_v55  ;;  %v4838_v45 = vunpack.i.l.bf16 %v8792_v4 }
 0x19e   : > { %v5192_v16 = vpop.permute.xlu1 %5191  ;;  %v1988_v32 = vsel %vm1963_vm9, %v1955_v38, %v5188_v29  ;;  %v1989_v6 = vsel %vm1963_vm9, %v1956_v26, %v5189_v3  ;;  %v1796_v20 = vsel %vm265_vm0, %v5822_v24, %v4679_v39  ;;  %v1795_v23 = vsel %vm265_vm0, %v5823_v34, %v4678_v57 }
 0x19f   : > { %v5197_v47 = vpop.permute.xlu0 %5196  ;;  %v5194_v49 = vunpack.i.h.bf16 %v5192_v16  ;;  %v5193_v50 = vunpack.i.l.bf16 %v5192_v16  ;;  %v1798_v8 = vsel %vm265_vm0, %v5824_v10, %v4684_v31  ;;  %v4839_v17 = vunpack.i.h.bf16 %v8792_v4 }
 0x1a0   : > { %v5199_v2 = vunpack.i.h.bf16 %v5197_v47  ;;  %v5198_v42 = vunpack.i.l.bf16 %v5197_v47  ;;  %v4844_v37 = vunpack.i.h.bf16 %v8793_v63  ;;  %v4843_v25 = vunpack.i.l.bf16 %v8793_v63 }
 0x1a1   : > { %v1990_v43 = vsel %vm1963_vm9, %v1957_v41, %v5193_v50  ;;  %v1991_v11 = vsel %vm1963_vm9, %v1958_v27, %v5194_v49  ;;  %v4919_v3 = vunpack.i.h.bf16 %v8794_v7  ;;  %v4918_v39 = vunpack.i.l.bf16 %v8794_v7 }
 0x1a2   : > { %v2021_v18 = vsel %vm1996_vm10, %v1988_v32, %v5198_v42  ;;  %v2022_v5 = vsel %vm1996_vm10, %v1989_v6, %v5199_v2  ;;  %v5202_v48 = vpop.permute.xlu1 %5201  ;;  %v1797_v57 = vsel %vm265_vm0, %v5825_v30, %v4683_v52  ;;  %v1828_v40 = vsel %vm1799_vm5, %v1795_v23, %v4758_v61 }
 0x1a3   : > { %v5204_v36 = vunpack.i.h.bf16 %v5202_v48  ;;  %v5203_v28 = vunpack.i.l.bf16 %v5202_v48  ;;  %v5207_v58 = vpop.permute.xlu0 %5206  ;;  %v2041_v53 = vpack.c.bf16 %v2022_v5, %v2021_v18  ;;  %v1829_v31 = vsel %vm1799_vm5, %v1796_v20, %v4759_v56 }
 0x1a4   : > { %v1831_v29 = vsel %vm1799_vm5, %v1798_v8, %v4764_v62  ;;  %v1830_v59 = vsel %vm1799_vm5, %v1797_v57, %v4763_v44  ;;  %v1861_v19 = vsel %vm1832_vm6, %v1828_v40, %v4838_v45  ;;  %v5209_v33 = vunpack.i.h.bf16 %v5207_v58 }
 0x1a5   : > { %v2023_v12 = vsel %vm1996_vm10, %v1990_v43, %v5203_v28  ;;  %v2024_v22 = vsel %vm1996_vm10, %v1991_v11, %v5204_v36  ;;  %4531 = vmatprep.mubr.msk.bf16.mxu0 %vm2072_vm11, %v2041_v53  ;;  %v5208_v35 = vunpack.i.l.bf16 %v5207_v58  ;;  %v1862_v13 = vsel %vm1832_vm6, %v1829_v31, %v4839_v17  ;;  %v7253_v17 = vld [vmem:[%s8667_s3] ss:$0 sm:$0xff] }
 0x1a6   : > { %v5212_v14 = vpop.permute.xlu1 %5211  ;;  %v2042_v60 = vpack.c.bf16 %v2024_v22, %v2023_v12  ;;  %v4923_v38 = vunpack.i.l.bf16 %v6640_v1  ;;  %v1863_v49 = vsel %vm1832_vm6, %v1830_v59, %v4843_v25  ;;  %v1864_v50 = vsel %vm1832_vm6, %v1831_v29, %v4844_v37 }
 0x1a7   : > { %v5217_v54 = vpop.permute.xlu0 %5216  ;;  %v1893_v2 = vsel %vm311_vm3, %v1861_v19, %v4918_v39  ;;  %v1894_v42 = vsel %vm311_vm3, %v1862_v13, %v4919_v3  ;;  %v4924_v0 = vunpack.i.h.bf16 %v6640_v1  ;;  %v5213_v51 = vunpack.i.l.bf16 %v5212_v14 }
 0x1a8   : > { %4532 = vmatmul.mubr.msk.bf16.gmra.mxu0 %vm2072_vm11, %v2042_v60  ;;  %v5219_v26 = vunpack.i.h.bf16 %v5217_v54  ;;  %v5218_v9 = vunpack.i.l.bf16 %v5217_v54  ;;  %v1926_v15 = vsel %vm1897_vm7, %v1893_v2, %v5208_v35  ;;  %v1927_v41 = vsel %vm1897_vm7, %v1894_v42, %v5209_v33 }
 0x1a9   : > { %v5214_v18 = vunpack.i.h.bf16 %v5212_v14  ;;  %v1895_v27 = vsel %vm311_vm3, %v1863_v49, %v4923_v38  ;;  %v1896_v43 = vsel %vm311_vm3, %v1864_v50, %v4924_v0  ;;  %v7255_v63 = vstv %s2417_s20  ;;  %s4402_s20 = sshll.u32 %s5986_s25, 8 }
 0x1aa   : > { %v5222_v16 = vpop.permute.xlu1 %5221  ;;  %v1959_v36 = vsel %vm1930_vm8, %v1926_v15, %v5218_v9  ;;  %v1960_v28 = vsel %vm1930_vm8, %v1927_v41, %v5219_v26  ;;  %v1928_v11 = vsel %vm1897_vm7, %v1895_v27, %v5213_v51 }
 0x1ab   : > { %v5227_v47 = vpop.permute.xlu0 %5226  ;;  %v5223_v5 = vunpack.i.l.bf16 %v5222_v16  ;;  %v5224_v58 = vunpack.i.h.bf16 %v5222_v16  ;;  %v1929_v62 = vsel %vm1897_vm7, %v1896_v43, %v5214_v18 }
 0x1ac   : > { %v5229_v32 = vunpack.i.h.bf16 %v5227_v47  ;;  %v5228_v6 = vunpack.i.l.bf16 %v5227_v47 }
 0x1ad   : > { %v1961_v12 = vsel %vm1930_vm8, %v1928_v11, %v5223_v5  ;;  %v1962_v45 = vsel %vm1930_vm8, %v1929_v62, %v5224_v58 }
 0x1ae   : > { %v5232_v48 = vpop.permute.xlu1 %5231  ;;  %v1992_v61 = vsel %vm1963_vm9, %v1959_v36, %v5228_v6  ;;  %v1993_v55 = vsel %vm1963_vm9, %v1960_v28, %v5229_v32 }
 0x1af   : > { %v5237_v53 = vpop.permute.xlu0 %5236  ;;  %v5234_v52 = vunpack.i.h.bf16 %v5232_v48  ;;  %v5233_v1 = vunpack.i.l.bf16 %v5232_v48 }
 0x1b0   : > { %v5239_v46 = vunpack.i.h.bf16 %v5237_v53  ;;  %v5238_v56 = vunpack.i.l.bf16 %v5237_v53 }
 0x1b1   : > { %v1994_v20 = vsel %vm1963_vm9, %v1961_v12, %v5233_v1  ;;  %v1995_v34 = vsel %vm1963_vm9, %v1962_v45, %v5234_v52 }
 0x1b2   : > { %v2025_v22 = vsel %vm1996_vm10, %v1992_v61, %v5238_v56  ;;  %v2026_v44 = vsel %vm1996_vm10, %v1993_v55, %v5239_v46  ;;  %v5242_v4 = vpop.permute.xlu1 %5241 }
 0x1b3   : > { %v5244_v14 = vunpack.i.h.bf16 %v5242_v4  ;;  %v5243_v60 = vunpack.i.l.bf16 %v5242_v4  ;;  %v2043_v24 = vpack.c.bf16 %v2026_v44, %v2025_v22 }
 0x1b5   : > { %v2027_v23 = vsel %vm1996_vm10, %v1994_v20, %v5243_v60  ;;  %v2028_v10 = vsel %vm1996_vm10, %v1995_v34, %v5244_v14  ;;  %4535 = vmatprep.mubr.msk.bf16.mxu0 %vm2072_vm11, %v2043_v24 }
 0x1b6   : > { %v2044_v8 = vpack.c.bf16 %v2028_v10, %v2027_v23 }
 0x1b8   : > { %4536 = vmatmul.mubr.msk.bf16.gmra.mxu0 %vm2072_vm11, %v2044_v8 }
 0x20d   : > { %v4509_v54 = vpop.f32.mrf.mxu0 }
 0x20e   : > { %v7258_v37 = vadd.f32 %v4509_v54, %v7253_v17 }
 0x20f   : > { %v2159_v25 = vpop.f32.mrf.mxu0 }
 0x210   : > { %v7261_v7 = vadd.f32 %v7253_v17, %v2159_v25  ;;  %vm2387_vm14 = vcmp.gt.f32.partialorder %v7258_v37, 0.0  ;;  %v2421_v21 = vmul.f32 %v7255_v63, %v7258_v37  ;;  %v2453_v3 = vsub.f32 0.0, %v7258_v37 }
 0x211   : > { %v4510_v39 = vpop.f32.mrf.mxu0 }
 0x212   : > { %v7268_v30 = vadd.f32 %v4510_v39, %v7253_v17  ;;  %v2485_v57 = vsel %vm2387_vm14, %v2421_v21, %v2453_v3  ;;  %v2419_v40 = vmul.f32 %v7255_v63, %v7261_v7  ;;  %vm2385_vm15 = vcmp.gt.f32.partialorder %v7261_v7, 0.0 }
 0x213   : > { %2551 = vrot.lane.b32.xlu0 %v2485_v57, %s5916_s26  ;;  %v2162_v31 = vpop.f32.mrf.mxu0  ;;  %v2451_v29 = vsub.f32 0.0, %v7261_v7 }
 0x214   : > { %v7276_v59 = vadd.f32 %v7253_v17, %v2162_v31  ;;  %vm2388_vm0 = vcmp.gt.f32.partialorder %v7268_v30, 0.0  ;;  %v2422_v19 = vmul.f32 %v7255_v63, %v7268_v30  ;;  %v2454_v33 = vsub.f32 0.0, %v7268_v30 }
 0x215   : > { %v2483_v16 = vsel %vm2385_vm15, %v2419_v40, %v2451_v29 }
 0x216   : > { %v2486_v35 = vsel %vm2388_vm0, %v2422_v19, %v2454_v33  ;;  %v2420_v13 = vmul.f32 %v7255_v63, %v7276_v59  ;;  %v2452_v38 = vsub.f32 0.0, %v7276_v59  ;;  %vm2386_vm1 = vcmp.gt.f32.partialorder %v7276_v59, 0.0 }
 0x217   : > { %2553 = vrot.lane.b32.xlu1 %v2486_v35, %s5916_s26  ;;  %2547 = vrot.lane.b32.xlu0 %v2483_v16, %s5916_s26 }
 0x218   : > { %v2484_v47 = vsel %vm2386_vm1, %v2420_v13, %v2452_v38 }
 0x219   : > { %v4513_v26 = vpop.f32.mrf.mxu0 }
 0x21a   : > { %v7289_v9 = vadd.f32 %v4513_v26, %v7253_v17 }
 0x21b   : > { %v2175_v49 = vpop.f32.mrf.mxu0  ;;  %2549 = vrot.lane.b32.xlu1 %v2484_v47, %s5916_s26 }
 0x21c   : > { %v7293_v50 = vadd.f32 %v7253_v17, %v2175_v49  ;;  %vm2391_vm2 = vcmp.gt.f32.partialorder %v7289_v9, 0.0  ;;  %v2425_v2 = vmul.f32 %v7255_v63, %v7289_v9  ;;  %v2457_v42 = vsub.f32 0.0, %v7289_v9 }
 0x21d   : > { %v4514_v0 = vpop.f32.mrf.mxu0 }
 0x21e   : > { %v7300_v51 = vadd.f32 %v4514_v0, %v7253_v17  ;;  %v2489_v32 = vsel %vm2391_vm2, %v2425_v2, %v2457_v42  ;;  %v2423_v6 = vmul.f32 %v7255_v63, %v7293_v50  ;;  %vm2389_vm4 = vcmp.gt.f32.partialorder %v7293_v50, 0.0 }
 0x21f   : > { %v2178_v15 = vpop.f32.mrf.mxu0  ;;  %2559 = vrot.lane.b32.xlu0 %v2489_v32, %s5916_s26  ;;  %v2455_v41 = vsub.f32 0.0, %v7293_v50 }
 0x220   : > { %v7308_v18 = vadd.f32 %v7253_v17, %v2178_v15  ;;  %vm2392_vm6 = vcmp.gt.f32.partialorder %v7300_v51, 0.0  ;;  %v2426_v5 = vmul.f32 %v7255_v63, %v7300_v51  ;;  %v2458_v48 = vsub.f32 0.0, %v7300_v51 }
 0x221   : > { %v2487_v36 = vsel %vm2389_vm4, %v2423_v6, %v2455_v41 }
 0x222   : > { %v2490_v27 = vsel %vm2392_vm6, %v2426_v5, %v2458_v48  ;;  %v2424_v28 = vmul.f32 %v7255_v63, %v7308_v18  ;;  %v2456_v58 = vsub.f32 0.0, %v7308_v18  ;;  %vm2390_vm7 = vcmp.gt.f32.partialorder %v7308_v18, 0.0 }
 0x223   : > { %2561 = vrot.lane.b32.xlu1 %v2490_v27, %s5916_s26  ;;  %2555 = vrot.lane.b32.xlu0 %v2487_v36, %s5916_s26 }
 0x224   : > { %v2488_v53 = vsel %vm2390_vm7, %v2424_v28, %v2456_v58 }
 0x227   : > { %2557 = vrot.lane.b32.xlu1 %v2488_v53, %s5916_s26 }
 0x228   : > { %v4517_v52 = vpop.f32.mrf.mxu0 }
 0x229   : > { %v7322_v1 = vadd.f32 %v4517_v52, %v7253_v17 }
 0x22a   : > { %v2191_v46 = vpop.f32.mrf.mxu0 }
 0x22b   : > { %v7325_v56 = vadd.f32 %v7253_v17, %v2191_v46  ;;  %vm2395_vm8 = vcmp.gt.f32.partialorder %v7322_v1, 0.0  ;;  %v2429_v43 = vmul.f32 %v7255_v63, %v7322_v1  ;;  %v2461_v11 = vsub.f32 0.0, %v7322_v1 }
 0x22c   : > { %v4518_v61 = vpop.f32.mrf.mxu0 }
 0x22d   : > { %v7332_v55 = vadd.f32 %v4518_v61, %v7253_v17  ;;  %v2493_v62 = vsel %vm2395_vm8, %v2429_v43, %v2461_v11  ;;  %v2427_v12 = vmul.f32 %v7255_v63, %v7325_v56  ;;  %vm2393_vm9 = vcmp.gt.f32.partialorder %v7325_v56, 0.0 }
 0x22e   : > { %v2194_v22 = vpop.f32.mrf.mxu0  ;;  %2567 = vrot.lane.b32.xlu0 %v2493_v62, %s5916_s26  ;;  %v2459_v44 = vsub.f32 0.0, %v7325_v56 }
 0x22f   : > { %v7340_v4 = vadd.f32 %v7253_v17, %v2194_v22  ;;  %vm2396_vm11 = vcmp.gt.f32.partialorder %v7332_v55, 0.0  ;;  %v2430_v45 = vmul.f32 %v7255_v63, %v7332_v55  ;;  %v2462_v14 = vsub.f32 0.0, %v7332_v55 }
 0x230   : > { %v2491_v24 = vsel %vm2393_vm9, %v2427_v12, %v2459_v44 }
 0x231   : > { %v2494_v60 = vsel %vm2396_vm11, %v2430_v45, %v2462_v14  ;;  %v2428_v20 = vmul.f32 %v7255_v63, %v7340_v4  ;;  %v2460_v34 = vsub.f32 0.0, %v7340_v4  ;;  %vm2394_vm12 = vcmp.gt.f32.partialorder %v7340_v4, 0.0 }
 0x232   : > { %2569 = vrot.lane.b32.xlu1 %v2494_v60, %s5916_s26  ;;  %2563 = vrot.lane.b32.xlu0 %v2491_v24, %s5916_s26 }
 0x233   : > { %v2492_v23 = vsel %vm2394_vm12, %v2428_v20, %v2460_v34 }
 0x236   : > { %2565 = vrot.lane.b32.xlu1 %v2492_v23, %s5916_s26 }
 0x238   : > { %v4521_v10 = vpop.f32.mrf.mxu0 }
 0x239   : > { %v7354_v8 = vadd.f32 %v4521_v10, %v7253_v17 }
 0x23a   : > { %v2207_v54 = vpop.f32.mrf.mxu0 }
 0x23b   : > { %v7357_v25 = vadd.f32 %v7253_v17, %v2207_v54  ;;  %vm2399_vm13 = vcmp.gt.f32.partialorder %v7354_v8, 0.0  ;;  %v2433_v21 = vmul.f32 %v7255_v63, %v7354_v8  ;;  %v2465_v3 = vsub.f32 0.0, %v7354_v8 }
 0x23c   : > { %v4522_v39 = vpop.f32.mrf.mxu0 }
 0x23d   : > { %v7364_v57 = vadd.f32 %v4522_v39, %v7253_v17  ;;  %v2497_v40 = vsel %vm2399_vm13, %v2433_v21, %v2465_v3  ;;  %v2431_v31 = vmul.f32 %v7255_v63, %v7357_v25  ;;  %vm2397_vm14 = vcmp.gt.f32.partialorder %v7357_v25, 0.0 }
 0x23e   : > { %v2210_v29 = vpop.f32.mrf.mxu0  ;;  %2575 = vrot.lane.b32.xlu0 %v2497_v40, %s5916_s26  ;;  %v2463_v19 = vsub.f32 0.0, %v7357_v25 }
 0x23f   : > { %v7372_v33 = vadd.f32 %v7253_v17, %v2210_v29  ;;  %vm2400_vm15 = vcmp.gt.f32.partialorder %v7364_v57, 0.0  ;;  %v2434_v35 = vmul.f32 %v7255_v63, %v7364_v57  ;;  %v2466_v16 = vsub.f32 0.0, %v7364_v57 }
 0x240   : > { %v2495_v38 = vsel %vm2397_vm14, %v2431_v31, %v2463_v19 }
 0x241   : > { %v2498_v13 = vsel %vm2400_vm15, %v2434_v35, %v2466_v16  ;;  %v2432_v26 = vmul.f32 %v7255_v63, %v7372_v33  ;;  %v2464_v47 = vsub.f32 0.0, %v7372_v33  ;;  %vm2398_vm0 = vcmp.gt.f32.partialorder %v7372_v33, 0.0 }
 0x242   : > { %2577 = vrot.lane.b32.xlu1 %v2498_v13, %s5916_s26  ;;  %2571 = vrot.lane.b32.xlu0 %v2495_v38, %s5916_s26 }
 0x243   : > { %v2496_v49 = vsel %vm2398_vm0, %v2432_v26, %v2464_v47 }
 0x246   : > { %2573 = vrot.lane.b32.xlu1 %v2496_v49, %s5916_s26 }
 0x248   : > { %v4525_v2 = vpop.f32.mrf.mxu0 }
 0x249   : > { %v7386_v42 = vadd.f32 %v4525_v2, %v7253_v17 }
 0x24a   : > { %v2223_v0 = vpop.f32.mrf.mxu0 }
 0x24b   : > { %v7389_v32 = vadd.f32 %v7253_v17, %v2223_v0  ;;  %vm2403_vm1 = vcmp.gt.f32.partialorder %v7386_v42, 0.0  ;;  %v2437_v6 = vmul.f32 %v7255_v63, %v7386_v42  ;;  %v2469_v15 = vsub.f32 0.0, %v7386_v42 }
 0x24c   : > { %v4526_v41 = vpop.f32.mrf.mxu0 }
 0x24d   : > { %v7396_v5 = vadd.f32 %v4526_v41, %v7253_v17  ;;  %v2501_v48 = vsel %vm2403_vm1, %v2437_v6, %v2469_v15  ;;  %v2435_v27 = vmul.f32 %v7255_v63, %v7389_v32  ;;  %vm2401_vm2 = vcmp.gt.f32.partialorder %v7389_v32, 0.0 }
 0x24e   : > { %v2226_v36 = vpop.f32.mrf.mxu0  ;;  %2583 = vrot.lane.b32.xlu0 %v2501_v48, %s5916_s26  ;;  %v2467_v28 = vsub.f32 0.0, %v7389_v32 }
 0x24f   : > { %v7404_v58 = vadd.f32 %v7253_v17, %v2226_v36  ;;  %vm2404_vm4 = vcmp.gt.f32.partialorder %v7396_v5, 0.0  ;;  %v2438_v53 = vmul.f32 %v7255_v63, %v7396_v5  ;;  %v2470_v52 = vsub.f32 0.0, %v7396_v5 }
 0x250   : > { %v2499_v43 = vsel %vm2401_vm2, %v2435_v27, %v2467_v28 }
 0x251   : > { %v2502_v46 = vsel %vm2404_vm4, %v2438_v53, %v2470_v52  ;;  %v2436_v11 = vmul.f32 %v7255_v63, %v7404_v58  ;;  %v2468_v61 = vsub.f32 0.0, %v7404_v58  ;;  %vm2402_vm6 = vcmp.gt.f32.partialorder %v7404_v58, 0.0 }
 0x252   : > { %2585 = vrot.lane.b32.xlu1 %v2502_v46, %s5916_s26  ;;  %2579 = vrot.lane.b32.xlu0 %v2499_v43, %s5916_s26  ;;  %vm2290_vm4 = vcmp.ge.f32.partialorder %v7258_v37, 0.0 }
 0x253   : > { %v2500_v62 = vsel %vm2402_vm6, %v2436_v11, %v2468_v61 }
 0x256   : > { %2581 = vrot.lane.b32.xlu1 %v2500_v62, %s5916_s26 }
 0x258   : > { %v4529_v12 = vpop.f32.mrf.mxu0 }
 0x259   : > { %v7418_v22 = vadd.f32 %v4529_v12, %v7253_v17 }
 0x25a   : > { %v2239_v44 = vpop.f32.mrf.mxu0 }
 0x25b   : > { %v7421_v45 = vadd.f32 %v7253_v17, %v2239_v44  ;;  %vm2407_vm7 = vcmp.gt.f32.partialorder %v7418_v22, 0.0  ;;  %v2441_v14 = vmul.f32 %v7255_v63, %v7418_v22  ;;  %v2473_v60 = vsub.f32 0.0, %v7418_v22 }
 0x25c   : > { %v4530_v24 = vpop.f32.mrf.mxu0 }
 0x25d   : > { %v7428_v20 = vadd.f32 %v4530_v24, %v7253_v17  ;;  %v2505_v34 = vsel %vm2407_vm7, %v2441_v14, %v2473_v60  ;;  %v2439_v23 = vmul.f32 %v7255_v63, %v7421_v45  ;;  %vm2405_vm8 = vcmp.gt.f32.partialorder %v7421_v45, 0.0 }
 0x25e   : > { %v2242_v10 = vpop.f32.mrf.mxu0  ;;  %2591 = vrot.lane.b32.xlu0 %v2505_v34, %s5916_s26  ;;  %v2471_v54 = vsub.f32 0.0, %v7421_v45  ;;  %vm2291_vm7 = vcmp.ge.f32.partialorder %v7268_v30, 0.0 }
 0x25f   : > { %v7436_v21 = vadd.f32 %v7253_v17, %v2242_v10  ;;  %vm2408_vm9 = vcmp.gt.f32.partialorder %v7428_v20, 0.0  ;;  %v2442_v3 = vmul.f32 %v7255_v63, %v7428_v20  ;;  %v2474_v39 = vsub.f32 0.0, %v7428_v20 }
 0x260   : > { %v2503_v31 = vsel %vm2405_vm8, %v2439_v23, %v2471_v54  ;;  %v7496_v54 = vstv %s2286_s10  ;;  %vm2288_vm8 = vcmp.ge.f32.partialorder %v7261_v7, 0.0 }
 0x261   : > { %v2506_v40 = vsel %vm2408_vm9, %v2442_v3, %v2474_v39  ;;  %v2440_v29 = vmul.f32 %v7255_v63, %v7436_v21  ;;  %v2472_v19 = vsub.f32 0.0, %v7436_v21  ;;  %vm2406_vm11 = vcmp.gt.f32.partialorder %v7436_v21, 0.0 }
 0x262   : > { %2593 = vrot.lane.b32.xlu1 %v2506_v40, %s5916_s26  ;;  %2587 = vrot.lane.b32.xlu0 %v2503_v31, %s5916_s26  ;;  %v7504_v31 = vpop.permute.xlu0 %5246  ;;  %vm2289_vm9 = vcmp.ge.f32.partialorder %v7276_v59, 0.0 }
 0x263   : > { %v2504_v35 = vsel %vm2406_vm11, %v2440_v29, %v2472_v19  ;;  %vm2294_vm11 = vcmp.ge.f32.partialorder %v7289_v9, 0.0 }
 0x266   : > { %2589 = vrot.lane.b32.xlu1 %v2504_v35, %s5916_s26  ;;  %v2323_v35 = vmul.f32 %v7496_v54, %v7258_v37 }
 0x268   : > { %v4533_v16 = vpop.f32.mrf.mxu0 }
 0x269   : > { %v7450_v13 = vadd.f32 %v4533_v16, %v7253_v17 }
 0x26a   : > { %v2255_v38 = vpop.f32.mrf.mxu0 }
 0x26b   : > { %v7453_v26 = vadd.f32 %v7253_v17, %v2255_v38  ;;  %vm2411_vm12 = vcmp.gt.f32.partialorder %v7450_v13, 0.0  ;;  %v2445_v47 = vmul.f32 %v7255_v63, %v7450_v13  ;;  %v2477_v49 = vsub.f32 0.0, %v7450_v13 }
 0x26c   : > { %v4534_v2 = vpop.f32.mrf.mxu0 }
 0x26d   : > { %v7460_v0 = vadd.f32 %v4534_v2, %v7253_v17  ;;  %v2509_v6 = vsel %vm2411_vm12, %v2445_v47, %v2477_v49  ;;  %v2443_v15 = vmul.f32 %v7255_v63, %v7453_v26  ;;  %vm2409_vm13 = vcmp.gt.f32.partialorder %v7453_v26, 0.0 }
 0x26e   : > { %v2258_v41 = vpop.f32.mrf.mxu0  ;;  %2599 = vrot.lane.b32.xlu0 %v2509_v6, %s5916_s26  ;;  %v2475_v48 = vsub.f32 0.0, %v7453_v26  ;;  %v2355_v2 = vsel %vm2290_vm4, %v7258_v37, %v2323_v35  ;;  %vm2295_vm12 = vcmp.ge.f32.partialorder %v7300_v51, 0.0  ;;  %vm2302_vm4 = vcmp.ge.f32.partialorder %v7354_v8, 0.0 }
 0x26f   : > { %v7468_v27 = vadd.f32 %v7253_v17, %v2258_v41  ;;  %vm2412_vm14 = vcmp.gt.f32.partialorder %v7460_v0, 0.0  ;;  %v2446_v36 = vmul.f32 %v7255_v63, %v7460_v0  ;;  %v2478_v28 = vsub.f32 0.0, %v7460_v0 }
 0x270   : > { %v2507_v52 = vsel %vm2409_vm13, %v2443_v15, %v2475_v48  ;;  %v2324_v15 = vmul.f32 %v7496_v54, %v7268_v30  ;;  %vm2292_vm13 = vcmp.ge.f32.partialorder %v7293_v50, 0.0 }
 0x271   : > { %v2510_v53 = vsel %vm2412_vm14, %v2446_v36, %v2478_v28  ;;  %v2444_v46 = vmul.f32 %v7255_v63, %v7468_v27  ;;  %v2476_v43 = vsub.f32 0.0, %v7468_v27  ;;  %vm2410_vm15 = vcmp.gt.f32.partialorder %v7468_v27, 0.0 }
 0x272   : > { %2601 = vrot.lane.b32.xlu1 %v2510_v53, %s5916_s26  ;;  %2595 = vrot.lane.b32.xlu0 %v2507_v52, %s5916_s26  ;;  %v2356_v37 = vsel %vm2291_vm7, %v7268_v30, %v2324_v15  ;;  %v2322_v53 = vmul.f32 %v7496_v54, %v7276_v59  ;;  %v2327_v30 = vmul.f32 %v7496_v54, %v7289_v9  ;;  %vm2293_vm14 = vcmp.ge.f32.partialorder %v7308_v18, 0.0 }
 0x273   : > { %v2508_v11 = vsel %vm2410_vm15, %v2444_v46, %v2476_v43  ;;  %vm2298_vm15 = vcmp.ge.f32.partialorder %v7322_v1, 0.0  ;;  %vm2300_vm7 = vcmp.ge.f32.partialorder %v7357_v25, 0.0 }
 0x276   : > { %2597 = vrot.lane.b32.xlu1 %v2508_v11, %s5916_s26  ;;  %v2354_v11 = vsel %vm2289_vm9, %v7276_v59, %v2322_v53  ;;  %v2325_v59 = vmul.f32 %v7496_v54, %v7293_v50  ;;  %vm2306_vm9 = vcmp.ge.f32.partialorder %v7386_v42, 0.0 }
 0x278   : > { %v4537_v61 = vpop.f32.mrf.mxu0 }
 0x279   : > { %v7482_v62 = vadd.f32 %v4537_v61, %v7253_v17  ;;  %v2359_v61 = vsel %vm2294_vm11, %v7289_v9, %v2327_v30  ;;  %v2332_v30 = vmul.f32 %v7496_v54, %v7332_v55  ;;  %vm2307_vm11 = vcmp.ge.f32.partialorder %v7396_v5, 0.0 }
 0x27a   : > { %v2271_v12 = vpop.f32.mrf.mxu0 }
 0x27b   : > { %v7485_v44 = vadd.f32 %v7253_v17, %v2271_v12  ;;  %vm2415_vm0 = vcmp.gt.f32.partialorder %v7482_v62, 0.0  ;;  %v2449_v14 = vmul.f32 %v7255_v63, %v7482_v62  ;;  %v2481_v60 = vsub.f32 0.0, %v7482_v62 }
 0x27c   : > { %v4538_v24 = vpop.f32.mrf.mxu0 }
 0x27d   : > { %v7492_v34 = vadd.f32 %v4538_v24, %v7253_v17  ;;  %v2513_v23 = vsel %vm2415_vm0, %v2449_v14, %v2481_v60  ;;  %v2447_v10 = vmul.f32 %v7255_v63, %v7485_v44  ;;  %vm2413_vm1 = vcmp.gt.f32.partialorder %v7485_v44, 0.0 }
 0x27e   : > { %v2274_v3 = vpop.f32.mrf.mxu0  ;;  %2607 = vrot.lane.b32.xlu0 %v2513_v23, %s5916_s26  ;;  %v2479_v39 = vsub.f32 0.0, %v7485_v44  ;;  %v2328_v60 = vmul.f32 %v7496_v54, %v7300_v51  ;;  %vm2299_vm0 = vcmp.ge.f32.partialorder %v7332_v55, 0.0 }
 0x27f   : > { %v7502_v40 = vadd.f32 %v7253_v17, %v2274_v3  ;;  %vm2416_vm2 = vcmp.gt.f32.partialorder %v7492_v34, 0.0  ;;  %v2450_v29 = vmul.f32 %v7255_v63, %v7492_v34  ;;  %v2482_v19 = vsub.f32 0.0, %v7492_v34 }
 0x280   : > { %v2511_v38 = vsel %vm2413_vm1, %v2447_v10, %v2479_v39  ;;  %v2360_v35 = vsel %vm2295_vm12, %v7300_v51, %v2328_v60  ;;  %vm2296_vm1 = vcmp.ge.f32.partialorder %v7325_v56, 0.0  ;;  %vm2304_vm12 = vcmp.ge.f32.partialorder %v7389_v32, 0.0 }
 0x281   : > { %v2514_v16 = vsel %vm2416_vm2, %v2450_v29, %v2482_v19  ;;  %v2448_v47 = vmul.f32 %v7255_v63, %v7502_v40  ;;  %v2480_v17 = vsub.f32 0.0, %v7502_v40  ;;  %vm2414_vm6 = vcmp.gt.f32.partialorder %v7502_v40, 0.0 }
 0x282   : > { %2609 = vrot.lane.b32.xlu1 %v2514_v16, %s5916_s26  ;;  %2603 = vrot.lane.b32.xlu0 %v2511_v38, %s5916_s26  ;;  %v2321_v63 = vmul.f32 %v7496_v54, %v7261_v7  ;;  %v2357_v38 = vsel %vm2292_vm13, %v7293_v50, %v2325_v59  ;;  %vm2297_vm2 = vcmp.ge.f32.partialorder %v7340_v4, 0.0  ;;  %vm2305_vm13 = vcmp.ge.f32.partialorder %v7404_v58, 0.0 }
 0x283   : > { %v2512_v6 = vsel %vm2414_vm6, %v2448_v47, %v2480_v17  ;;  %v2326_v17 = vmul.f32 %v7496_v54, %v7308_v18  ;;  %vm2303_vm6 = vcmp.ge.f32.partialorder %v7364_v57, 0.0 }
 0x284   : > { %v2353_v28 = vsel %vm2288_vm8, %v7261_v7, %v2321_v63  ;;  %vm2301_vm8 = vcmp.ge.f32.partialorder %v7372_v33, 0.0 }
 0x285   : > { %v2552_v49 = vpop.permute.xlu0 %2551  ;;  %v2358_v50 = vsel %vm2293_vm14, %v7308_v18, %v2326_v17  ;;  %vm2310_vm14 = vcmp.ge.f32.partialorder %v7418_v22, 0.0 }
 0x286   : > { %v2645_v41 = vsel %vm1799_vm5, %v2355_v2, %v2552_v49  ;;  %2605 = vrot.lane.b32.xlu1 %v2512_v6, %s5916_s26  ;;  %s5923_s26 = smov 48  }
 0x287   : > { %2678 = vst.msk [vmem:[#allocation3 + $0x31] sm:$0xff] %vm311_vm3, %v2645_v41 }
 0x289   : > { %v2554_v48 = vpop.permute.xlu1 %2553  ;;  %v2548_v36 = vpop.permute.xlu0 %2547 }
 0x28a   : > { %v2646_v52 = vsel %vm1799_vm5, %v2356_v37, %v2554_v48  ;;  %v2643_v46 = vsel %vm1799_vm5, %v2353_v28, %v2548_v36  ;;  %v2331_v37 = vmul.f32 %v7496_v54, %v7322_v1 }
 0x28b   : > { %2679 = vst.msk [vmem:[#allocation3 + $0x39] sm:$0xff] %vm311_vm3, %v2646_v52  ;;  %2676 = vst.msk [vmem:[#allocation3 + $0x19] sm:$0xff] %vm311_vm3, %v2643_v46 }
 0x28d   : > { %v2550_v43 = vpop.permute.xlu1 %2549 }
 0x28e   : > { %v2644_v7 = vsel %vm1799_vm5, %v2354_v11, %v2550_v43  ;;  %v7545_v14 = vld [vmem:[#allocation3 + $0x30] sm:$0xff]  ;;  %v2363_v43 = vsel %vm2298_vm15, %v7322_v1, %v2331_v37  ;;  %v2336_v37 = vmul.f32 %v7496_v54, %v7364_v57  ;;  %vm2311_vm15 = vcmp.ge.f32.partialorder %v7428_v20, 0.0 }
 0x28f   : > { %2677 = vst.msk [vmem:[#allocation3 + $0x21] sm:$0xff] %vm311_vm3, %v2644_v7  ;;  %v2744_v10 = vld [vmem:[#allocation3 + $0x31] sm:$0xff]  ;;  %v2329_v7 = vmul.f32 %v7496_v54, %v7325_v56 }
 0x291   : > { %v2560_v12 = vpop.permute.xlu0 %2559 }
 0x292   : > { %v2649_v24 = vsel %vm1799_vm5, %v2359_v61, %v2560_v12  ;;  %v7552_v23 = vld [vmem:[#allocation3 + $0x38] sm:$0xff] }
 0x293   : > { %v2745_v3 = vld [vmem:[#allocation3 + $0x39] sm:$0xff]  ;;  %2682 = vst.msk [vmem:[#allocation3 + $0x61] sm:$0xff] %vm311_vm3, %v2649_v24  ;;  %v7559_v9 = vpack.i.bf16 %v7552_v23, %v7545_v14 }
 0x294   : > { %v7561_v39 = vpack.i.bf16 %v2745_v3, %v2744_v10  ;;  %v2870_v29 = vld [vmem:[#allocation3 + $0x32] sm:$0xff]  ;;  %v2871_v19 = vld [vmem:[#allocation3 + $0x3a] sm:$0xff]  ;;  %v2364_v3 = vsel %vm2299_vm0, %v7332_v55, %v2332_v30  ;;  %v2368_v30 = vsel %vm2303_vm6, %v7364_v57, %v2336_v37  ;;  %vm2308_vm0 = vcmp.ge.f32.partialorder %v7421_v45, 0.0 }
 0x295   : > { %5261 = vrot.lane.b32.xlu1 %v7559_v9, %s5923_s26  ;;  %v2562_v16 = vpop.permute.xlu1 %2561  ;;  %v2556_v47 = vpop.permute.xlu0 %2555  ;;  %v5270_v51 = vpack.i.bf16 %v2871_v19, %v2870_v29  ;;  %v2742_v41 = vld [vmem:[#allocation3 + $0x19] sm:$0xff]  ;;  %v2361_v19 = vsel %vm2296_vm1, %v7325_v56, %v2329_v7  ;;  %vm2309_vm1 = vcmp.ge.f32.partialorder %v7436_v21, 0.0  ;;  %vm2312_vm6 = vcmp.ge.f32.partialorder %v7453_v26, 0.0 }
 0x296   : > { %5251 = vrot.lane.b32.xlu0 %v7561_v39, %s5918_s29  ;;  %v2650_v49 = vsel %vm1799_vm5, %v2360_v35, %v2562_v16  ;;  %v2647_v2 = vsel %vm1799_vm5, %v2357_v38, %v2556_v47  ;;  %v2743_v6 = vld [vmem:[#allocation3 + $0x21] sm:$0xff]  ;;  %v2330_v16 = vmul.f32 %v7496_v54, %v7340_v4 }
 0x297   : > { %2683 = vst.msk [vmem:[#allocation3 + $0x69] sm:$0xff] %vm311_vm3, %v2650_v49  ;;  %2680 = vst.msk [vmem:[#allocation3 + $0x49] sm:$0xff] %vm311_vm3, %v2647_v2  ;;  %v7581_v48 = vpack.i.bf16 %v2743_v6, %v2742_v41  ;;  %v2774_v36 = vld [vmem:[#allocation3 + $0x1a] sm:$0xff]  ;;  %v2775_v28 = vld [vmem:[#allocation3 + $0x22] sm:$0xff]  ;;  %v2335_v6 = vmul.f32 %v7496_v54, %v7354_v8 }
 0x298   : > { %v7594_v52 = vpack.i.bf16 %v2775_v28, %v2774_v36  ;;  %v2362_v56 = vsel %vm2297_vm2, %v7340_v4, %v2330_v16  ;;  %v2333_v36 = vmul.f32 %v7496_v54, %v7357_v25  ;;  %vm2314_vm2 = vcmp.ge.f32.partialorder %v7450_v13, 0.0 }
 0x299   : > { %5271 = vrot.lane.b32.xlu1 %v5270_v51, %s5924_s11  ;;  %v2558_v15 = vpop.permute.xlu1 %2557 }
 0x29a   : > { %5256 = vrot.lane.b32.xlu0 %v5270_v51, %s5922_s18  ;;  %v2648_v63 = vsel %vm1799_vm5, %v2358_v50, %v2558_v15  ;;  %v7590_v18 = vld [vmem:[#allocation3 + $0x60] sm:$0xff] }
 0x29b   : > { %2681 = vst.msk [vmem:[#allocation3 + $0x51] sm:$0xff] %vm311_vm3, %v2648_v63  ;;  %v2748_v1 = vld [vmem:[#allocation3 + $0x61] sm:$0xff]  ;;  %v2367_v63 = vsel %vm2302_vm4, %v7354_v8, %v2335_v6  ;;  %vm2315_vm4 = vcmp.ge.f32.partialorder %v7460_v0, 0.0 }
 0x29d   : > { %5276 = vrot.lane.b32.xlu1 %v7581_v48, %s5918_s29 }
 0x29e   : > { %5266 = vrot.lane.b32.xlu0 %v7561_v39, %s5925_s12  ;;  %v7592_v53 = vld [vmem:[#allocation3 + $0x68] sm:$0xff] }
 0x29f   : > { %v5295_v46 = vpack.i.bf16 %v7592_v53, %v7590_v18  ;;  %v2749_v61 = vld [vmem:[#allocation3 + $0x69] sm:$0xff] }
 0x2a0   : > { %v2568_v11 = vpop.permute.xlu0 %2567  ;;  %v2874_v12 = vld [vmem:[#allocation3 + $0x62] sm:$0xff]  ;;  %v2875_v60 = vld [vmem:[#allocation3 + $0x6a] sm:$0xff]  ;;  %v5285_v24 = vpack.i.bf16 %v2749_v61, %v2748_v1  ;;  %v2365_v61 = vsel %vm2300_vm7, %v7357_v25, %v2333_v36  ;;  %vm2313_vm7 = vcmp.ge.f32.partialorder %v7468_v27, 0.0 }
 0x2a1   : > { %v2653_v59 = vsel %vm1799_vm5, %v2363_v43, %v2568_v11  ;;  %5296 = vrot.lane.b32.xlu1 %v5295_v46, %s5923_s26  ;;  %v5305_v10 = vpack.i.bf16 %v2875_v60, %v2874_v12  ;;  %v2746_v2 = vld [vmem:[#allocation3 + $0x49] sm:$0xff]  ;;  %v2334_v60 = vmul.f32 %v7496_v54, %v7372_v33 }
 0x2a2   : > { %5281 = vrot.lane.b32.xlu0 %v7594_v52, %s5922_s18  ;;  %2686 = vst.msk [vmem:[#allocation3 + $0x91] sm:$0xff] %vm311_vm3, %v2653_v59  ;;  %v2747_v17 = vld [vmem:[#allocation3 + $0x51] sm:$0xff]  ;;  %v7636_v4 = vld [vmem:[#allocation3 + $0x48] sm:$0xff] }
 0x2a3   : > { %v7626_v51 = vpack.i.bf16 %v2747_v17, %v2746_v2  ;;  %v7630_v50 = vld [vmem:[#allocation3 + $0x50] sm:$0xff]  ;;  %v2340_v17 = vmul.f32 %v7496_v54, %v7396_v5 }
 0x2a4   : > { %v2570_v29 = vpop.permute.xlu1 %2569  ;;  %v2564_v35 = vpop.permute.xlu0 %2563  ;;  %v7640_v15 = vpack.i.bf16 %v7630_v50, %v7636_v4  ;;  %v2778_v28 = vld [vmem:[#allocation3 + $0x4a] sm:$0xff]  ;;  %v2779_v43 = vld [vmem:[#allocation3 + $0x52] sm:$0xff] }
 0x2a5   : > { %v2654_v38 = vsel %vm1799_vm5, %v2364_v3, %v2570_v29  ;;  %v2651_v47 = vsel %vm1799_vm5, %v2361_v19, %v2564_v35  ;;  %5306 = vrot.lane.b32.xlu1 %v5305_v10, %s5924_s11  ;;  %v5325_v8 = vpack.i.bf16 %v2779_v43, %v2778_v28  ;;  %v2338_v43 = vmul.f32 %v7496_v54, %v7404_v58 }
 0x2a6   : > { %5286 = vrot.lane.b32.xlu0 %v5285_v24, %s5918_s29  ;;  %2687 = vst.msk [vmem:[#allocation3 + $0x99] sm:$0xff] %vm311_vm3, %v2654_v38  ;;  %2684 = vst.msk [vmem:[#allocation3 + $0x79] sm:$0xff] %vm311_vm3, %v2651_v47 }
 0x2a8   : > { %v2566_v55 = vpop.permute.xlu1 %2565 }
 0x2a9   : > { %v2652_v49 = vsel %vm1799_vm5, %v2362_v56, %v2566_v55  ;;  %5316 = vrot.lane.b32.xlu1 %v5285_v24, %s5926_s13  ;;  %v7667_v25 = vld [vmem:[#allocation3 + $0x90] sm:$0xff]  ;;  %v2339_v56 = vmul.f32 %v7496_v54, %v7386_v42 }
 0x2aa   : > { %5291 = vrot.lane.b32.xlu0 %v5305_v10, %s5922_s18  ;;  %2685 = vst.msk [vmem:[#allocation3 + $0x81] sm:$0xff] %vm311_vm3, %v2652_v49  ;;  %v2752_v16 = vld [vmem:[#allocation3 + $0x91] sm:$0xff]  ;;  %v2337_v49 = vmul.f32 %v7496_v54, %v7389_v32 }
 0x2ac   : > { %v2369_v36 = vsel %vm2304_vm12, %v7389_v32, %v2337_v49  ;;  %v2342_v49 = vmul.f32 %v7496_v54, %v7436_v21  ;;  %vm2317_vm12 = vcmp.ge.f32.partialorder %v7502_v40, 0.0 }
 0x2ad   : > { %5321 = vrot.lane.b32.xlu1 %v7626_v51, %s5918_s29  ;;  %v2753_v3 = vld [vmem:[#allocation3 + $0x99] sm:$0xff] }
 0x2ae   : > { %5301 = vrot.lane.b32.xlu0 %v5285_v24, %s5925_s12  ;;  %v2366_v24 = vsel %vm2301_vm8, %v7372_v33, %v2334_v60  ;;  %v2878_v29 = vld [vmem:[#allocation3 + $0x92] sm:$0xff]  ;;  %v2879_v19 = vld [vmem:[#allocation3 + $0x9a] sm:$0xff]  ;;  %v5345_v38 = vpack.i.bf16 %v2753_v3, %v2752_v16  ;;  %v2371_v33 = vsel %vm2306_vm9, %v7386_v42, %v2339_v56  ;;  %v2341_v3 = vmul.f32 %v7496_v54, %v7421_v45 }
 0x2af   : > { %v5365_v47 = vpack.i.bf16 %v2879_v19, %v2878_v29  ;;  %v2750_v42 = vld [vmem:[#allocation3 + $0x79] sm:$0xff]  ;;  %vm2318_vm8 = vcmp.ge.f32.partialorder %v7482_v62, 0.0  ;;  %vm2319_vm9 = vcmp.ge.f32.partialorder %v7492_v34, 0.0 }
 0x2b0   : > { %v2576_v41 = vpop.permute.xlu0 %2575  ;;  %v7706_v32 = vld [vmem:[#allocation3 + $0x78] sm:$0xff] }
 0x2b1   : > { %v2657_v11 = vsel %vm1799_vm5, %v2367_v63, %v2576_v41  ;;  %5331 = vrot.lane.b32.xlu1 %v7640_v15, %s5923_s26  ;;  %v2751_v2 = vld [vmem:[#allocation3 + $0x81] sm:$0xff]  ;;  %v2372_v41 = vsel %vm2307_vm11, %v7396_v5, %v2340_v17  ;;  %vm2316_vm11 = vcmp.ge.f32.partialorder %v7485_v44, 0.0 }
 0x2b2   : > { %5311 = vrot.lane.b32.xlu0 %v5295_v46, %s5927_s14  ;;  %2690 = vst.msk [vmem:[#allocation3 + $0xc1] sm:$0xff] %vm311_vm3, %v2657_v11  ;;  %v7658_v46 = vld [vmem:[#allocation3 + $0x98] sm:$0xff]  ;;  %v5380_v63 = vpack.i.bf16 %v2751_v2, %v2750_v42  ;;  %v7697_v11 = vld [vmem:[#allocation3 + $0x80] sm:$0xff] }
 0x2b3   : > { %v5355_v57 = vpack.i.bf16 %v7658_v46, %v7667_v25  ;;  %v5390_v5 = vpack.i.bf16 %v7697_v11, %v7706_v32  ;;  %v2783_v60 = vld [vmem:[#allocation3 + $0x82] sm:$0xff] }
 0x2b4   : > { %v2578_v7 = vpop.permute.xlu1 %2577  ;;  %v2572_v12 = vpop.permute.xlu0 %2571 }
 0x2b5   : > { %v2658_v59 = vsel %vm1799_vm5, %v2368_v30, %v2578_v7  ;;  %v2655_v1 = vsel %vm1799_vm5, %v2365_v61, %v2572_v12  ;;  %5341 = vrot.lane.b32.xlu1 %v5325_v8, %s5924_s11  ;;  %v2370_v7 = vsel %vm2305_vm13, %v7404_v58, %v2338_v43  ;;  %v2782_v12 = vld [vmem:[#allocation3 + $0x7a] sm:$0xff]  ;;  %vm3990_vm13 = vcmask 523264  }
 0x2b6   : > { %5326 = vrot.lane.b32.xlu0 %v5325_v8, %s5922_s18  ;;  %2691 = vst.msk [vmem:[#allocation3 + $0xc9] sm:$0xff] %vm311_vm3, %v2658_v59  ;;  %2688 = vst.msk [vmem:[#allocation3 + $0xa9] sm:$0xff] %vm311_vm3, %v2655_v1  ;;  %v5385_v1 = vpack.i.bf16 %v2783_v60, %v2782_v12  ;;  %v2348_v12 = vmul.f32 %v7496_v54, %v7460_v0  ;;  %v2345_v60 = vmul.f32 %v7496_v54, %v7453_v26 }
 0x2b8   : > { %v2574_v10 = vpop.permute.xlu1 %2573 }
 0x2b9   : > { %v2656_v35 = vsel %vm1799_vm5, %v2366_v24, %v2574_v10  ;;  %5356 = vrot.lane.b32.xlu1 %v5355_v57, %s5923_s26  ;;  %v2343_v24 = vmul.f32 %v7496_v54, %v7418_v22 }
 0x2ba   : > { %5336 = vrot.lane.b32.xlu0 %v7626_v51, %s5925_s12  ;;  %2689 = vst.msk [vmem:[#allocation3 + $0xb1] sm:$0xff] %vm311_vm3, %v2656_v35 }
 0x2bb   : > { %v2375_v58 = vsel %vm2310_vm14, %v7418_v22, %v2343_v24  ;;  %vm4023_vm14 = vcmask 654336  }
 0x2bd   : > { %5366 = vrot.lane.b32.xlu1 %v5365_v47, %s5924_s11  ;;  %v2819_v29 = vld [vmem:[#allocation3 + $0xc8] sm:$0xff] }
 0x2be   : > { %5346 = vrot.lane.b32.xlu0 %v5345_v38, %s5918_s29  ;;  %v2757_v2 = vld [vmem:[#allocation3 + $0xc9] sm:$0xff] }
 0x2bf   : > { %v2883_v42 = vld [vmem:[#allocation3 + $0xca] sm:$0xff] }
 0x2c0   : > { %v2584_v55 = vpop.permute.xlu0 %2583 }
 0x2c1   : > { %v2661_v6 = vsel %vm1799_vm5, %v2371_v33, %v2584_v55  ;;  %5376 = vrot.lane.b32.xlu1 %v5345_v38, %s5926_s13  ;;  %v2373_v55 = vsel %vm2308_vm0, %v7421_v45, %v2341_v3  ;;  %v2756_v45 = vld [vmem:[#allocation3 + $0xc1] sm:$0xff]  ;;  %v7758_v24 = vld [vmem:[#allocation3 + $0xb0] sm:$0xff]  ;;  %v2380_v3 = vsel %vm2315_vm4, %v7460_v0, %v2348_v12  ;;  %vm4089_vm0 = vcmask 916480  }
 0x2c2   : > { %5351 = vrot.lane.b32.xlu0 %v5365_v47, %s5922_s18  ;;  %2694 = vst.msk [vmem:[#allocation3 + $0xf1] sm:$0xff] %vm311_vm3, %v2661_v6  ;;  %v2882_v6 = vld [vmem:[#allocation3 + $0xc2] sm:$0xff] }
 0x2c4   : > { %v2586_v37 = vpop.permute.xlu1 %2585  ;;  %v2580_v28 = vpop.permute.xlu0 %2579 }
 0x2c5   : > { %v2662_v8 = vsel %vm1799_vm5, %v2372_v41, %v2586_v37  ;;  %v2659_v30 = vsel %vm1799_vm5, %v2369_v36, %v2580_v28  ;;  %5381 = vrot.lane.b32.xlu1 %v5380_v63, %s5918_s29  ;;  %v5430_v37 = vpack.i.bf16 %v2883_v42, %v2882_v6  ;;  %v2374_v36 = vsel %vm2309_vm1, %v7436_v21, %v2342_v49  ;;  %v2754_v21 = vld [vmem:[#allocation3 + $0xa9] sm:$0xff] }
 0x2c6   : > { %5361 = vrot.lane.b32.xlu0 %v5345_v38, %s5925_s12  ;;  %2695 = vst.msk [vmem:[#allocation3 + $0xf9] sm:$0xff] %vm311_vm3, %v2662_v8  ;;  %2692 = vst.msk [vmem:[#allocation3 + $0xd9] sm:$0xff] %vm311_vm3, %v2659_v30  ;;  %v2818_v38 = vld [vmem:[#allocation3 + $0xc0] sm:$0xff]  ;;  %v2347_v8 = vmul.f32 %v7496_v54, %v7450_v13  ;;  %v2755_v30 = vld [vmem:[#allocation3 + $0xb1] sm:$0xff] }
 0x2c7   : > { %v5420_v47 = vpack.i.bf16 %v2819_v29, %v2818_v38 }
 0x2c8   : > { %v2582_v61 = vpop.permute.xlu1 %2581 }
 0x2c9   : > { %v2660_v59 = vsel %vm1799_vm5, %v2370_v7, %v2582_v61  ;;  %5391 = vrot.lane.b32.xlu1 %v5390_v5, %s5923_s26  ;;  %v2379_v7 = vsel %vm2314_vm2, %v7450_v13, %v2347_v8  ;;  %v7766_v13 = vld [vmem:[#allocation3 + $0xa8] sm:$0xff] }
 0x2ca   : > { %5371 = vrot.lane.b32.xlu0 %v5355_v57, %s5927_s14  ;;  %2693 = vst.msk [vmem:[#allocation3 + $0xe1] sm:$0xff] %vm311_vm3, %v2660_v59  ;;  %v2344_v57 = vmul.f32 %v7496_v54, %v7428_v20  ;;  %v2786_v59 = vld [vmem:[#allocation3 + $0xaa] sm:$0xff] }
 0x2cc   : > { %v2376_v56 = vsel %vm2311_vm15, %v7428_v20, %v2344_v57  ;;  %v5415_v20 = vpack.i.bf16 %v2757_v2, %v2756_v45  ;;  %v5455_v57 = vpack.i.bf16 %v7758_v24, %v7766_v13  ;;  %vm4056_vm15 = vcmask 785408  }
 0x2cd   : > { %5401 = vrot.lane.b32.xlu1 %v5385_v1, %s5924_s11 }
 0x2ce   : > { %5386 = vrot.lane.b32.xlu0 %v5385_v1, %s5922_s18  ;;  %v2787_v1 = vld [vmem:[#allocation3 + $0xb2] sm:$0xff] }
 0x2d0   : > { %v2592_v10 = vpop.permute.xlu0 %2591 }
 0x2d1   : > { %v2665_v19 = vsel %vm1799_vm5, %v2375_v58, %v2592_v10  ;;  %5411 = vrot.lane.b32.xlu1 %v5380_v63, %s5926_s13  ;;  %v2979_v35 = vld [vmem:[#allocation3 + $0xda] sm:$0xff]  ;;  %v2980_v16 = vld [vmem:[#allocation3 + $0xe2] sm:$0xff]  ;;  %v5450_v10 = vpack.i.bf16 %v2787_v1, %v2786_v59 }
 0x2d2   : > { %5396 = vrot.lane.b32.xlu0 %v5380_v63, %s5925_s12  ;;  %2698 = vst.msk [vmem:[#allocation3 + $0x121] sm:$0xff] %vm311_vm3, %v2665_v19  ;;  %v4137_v22 = vpack.c.bf16 %v2980_v16, %v2979_v35  ;;  %v2377_v19 = vsel %vm2312_vm6, %v7453_v26, %v2345_v60  ;;  %v2346_v16 = vmul.f32 %v7496_v54, %v7468_v27  ;;  %v2916_v45 = vld [vmem:[#allocation3 + $0xe0] sm:$0xff]  ;;  %v7832_v60 = vld [vmem:[#allocation3 + $0x18] sm:$0xff] }
 0x2d3   : > { %v2963_v1 = vld [vmem:[#allocation3 + $0x199] sm:$0xff] }
 0x2d4   : > { %v2594_v33 = vpop.permute.xlu1 %2593  ;;  %4379 = vmatprep.subr.msk.bf16.mxu1 %vm311_vm3, %v4137_v22  ;;  %v2588_v17 = vpop.permute.xlu0 %2587  ;;  %v2378_v26 = vsel %vm2313_vm7, %v7468_v27, %v2346_v16  ;;  %v2760_v27 = vld [vmem:[#allocation3 + $0xf1] sm:$0xff] }
 0x2d5   : > { %v2666_v63 = vsel %vm1799_vm5, %v2376_v56, %v2594_v33  ;;  %v2663_v41 = vsel %vm1799_vm5, %v2373_v55, %v2588_v17  ;;  %5421 = vrot.lane.b32.xlu1 %v5420_v47, %s5923_s26  ;;  %v2351_v56 = vmul.f32 %v7496_v54, %v7482_v62  ;;  %v2761_v33 = vld [vmem:[#allocation3 + $0xf9] sm:$0xff]  ;;  %v2759_v55 = vld [vmem:[#allocation3 + $0xe1] sm:$0xff] }
 0x2d6   : > { %5406 = vrot.lane.b32.xlu0 %v5390_v5, %s5927_s14  ;;  %2699 = vst.msk [vmem:[#allocation3 + $0x129] sm:$0xff] %vm311_vm3, %v2666_v63  ;;  %2696 = vst.msk [vmem:[#allocation3 + $0x109] sm:$0xff] %vm311_vm3, %v2663_v41  ;;  %v5445_v5 = vpack.i.bf16 %v2755_v30, %v2754_v21  ;;  %v2758_v17 = vld [vmem:[#allocation3 + $0xd9] sm:$0xff]  ;;  %v7791_v49 = vpack.i.bf16 %v2761_v33, %v2760_v27  ;;  %v2352_v63 = vmul.f32 %v7496_v54, %v7492_v34 }
 0x2d7   : > { %v7793_v2 = vpack.i.bf16 %v2759_v55, %v2758_v17  ;;  %v2383_v6 = vsel %vm2318_vm8, %v7482_v62, %v2351_v56  ;;  %v2349_v41 = vmul.f32 %v7496_v54, %v7485_v44  ;;  %v2915_v62 = vld [vmem:[#allocation3 + $0xd8] sm:$0xff]  ;;  %v2350_v30 = vmul.f32 %v7496_v54, %v7502_v40 }
 0x2d8   : > { %v2590_v28 = vpop.permute.xlu1 %2589 }
 0x2d9   : > { %v2664_v43 = vsel %vm1799_vm5, %v2374_v36, %v2590_v28  ;;  %5431 = vrot.lane.b32.xlu1 %v5430_v37, %s5924_s11  ;;  %v7808_v37 = vpack.i.bf16 %v2916_v45, %v2915_v62  ;;  %v2384_v36 = vsel %vm2319_vm9, %v7492_v34, %v2352_v63  ;;  %v2773_v34 = vld [vmem:[#allocation3 + $0xa] sm:$0xff]  ;;  %v2382_v54 = vsel %vm2317_vm12, %v7502_v40, %v2350_v30  ;;  %v2931_v40 = vld [vmem:[#allocation3 + $0x198] sm:$0xff] }
 0x2da   : > { %5416 = vrot.lane.b32.xlu0 %v5415_v20, %s5918_s29  ;;  %2697 = vst.msk [vmem:[#allocation3 + $0x111] sm:$0xff] %vm311_vm3, %v2664_v43  ;;  %v2381_v43 = vsel %vm2316_vm11, %v7485_v44, %v2349_v41  ;;  %v2772_v44 = vld [vmem:[#allocation3 + $0x2] sm:$0xff] }
 0x2dd   : > { %5441 = vrot.lane.b32.xlu1 %v5415_v20, %s5926_s13 }
 0x2de   : > { %5426 = vrot.lane.b32.xlu0 %v5415_v20, %s5925_s12 }
 0x2e0   : > { %v2600_v61 = vpop.permute.xlu0 %2599 }
 0x2e1   : > { %v2669_v58 = vsel %vm1799_vm5, %v2379_v7, %v2600_v61  ;;  %5446 = vrot.lane.b32.xlu1 %v5445_v5, %s5918_s29  ;;  %v7824_v61 = vld [vmem:[#allocation3 + $0x20] sm:$0xff] }
 0x2e2   : > { %5436 = vrot.lane.b32.xlu0 %v5420_v47, %s5927_s14  ;;  %2702 = vst.msk [vmem:[#allocation3 + $0x151] sm:$0xff] %vm311_vm3, %v2669_v58  ;;  %v5515_v59 = vpack.i.bf16 %v7824_v61, %v7832_v60  ;;  %v2964_v58 = vld [vmem:[#allocation3 + $0x1a1] sm:$0xff] }
 0x2e4   : > { %v2602_v29 = vpop.permute.xlu1 %2601  ;;  %v2596_v35 = vpop.permute.xlu0 %2595 }
 0x2e5   : > { %v2670_v22 = vsel %vm1799_vm5, %v2380_v3, %v2602_v29  ;;  %v2667_v38 = vsel %vm1799_vm5, %v2377_v19, %v2596_v35  ;;  %5456 = vrot.lane.b32.xlu1 %v5455_v57, %s5923_s26  ;;  %v2763_v19 = vld [vmem:[#allocation3 + $0x111] sm:$0xff]  ;;  %v2762_v35 = vld [vmem:[#allocation3 + $0x109] sm:$0xff] }
 0x2e6   : > { %5451 = vrot.lane.b32.xlu0 %v5450_v10, %s5922_s18  ;;  %2703 = vst.msk [vmem:[#allocation3 + $0x159] sm:$0xff] %vm311_vm3, %v2670_v22  ;;  %2700 = vst.msk [vmem:[#allocation3 + $0x139] sm:$0xff] %vm311_vm3, %v2667_v38  ;;  %v2796_v38 = vld [vmem:[#allocation3 + $0x122] sm:$0xff] }
 0x2e8   : > { %v2598_v0 = vpop.permute.xlu1 %2597 }
 0x2e9   : > { %v2668_v47 = vsel %vm1799_vm5, %v2378_v26, %v2598_v0  ;;  %5466 = vrot.lane.b32.xlu1 %v5450_v10, %s5924_s11  ;;  %v2797_v26 = vld [vmem:[#allocation3 + $0x12a] sm:$0xff] }
 0x2ea   : > { %5461 = vrot.lane.b32.xlu0 %v5445_v5, %s5925_s12  ;;  %2701 = vst.msk [vmem:[#allocation3 + $0x141] sm:$0xff] %vm311_vm3, %v2668_v47  ;;  %v7866_v47 = vld [vmem:[#allocation3 + $0x150] sm:$0xff]  ;;  %v7872_v55 = vpack.i.bf16 %v2797_v26, %v2796_v38 }
 0x2eb   : > { %8795 = vst [vmem:[#allocation26_spill] sm:$0xff] %v7866_v47  ;;  %v2768_v63 = vld [vmem:[#allocation3 + $0x151] sm:$0xff] }
 0x2ed   : > { %5476 = vrot.lane.b32.xlu1 %v5445_v5, %s5926_s13  ;;  %v7860_v0 = vld [vmem:[#allocation3 + $0x158] sm:$0xff] }
 0x2ee   : > { %5471 = vrot.lane.b32.xlu0 %v5455_v57, %s5927_s14  ;;  %v5545_v57 = vpack.i.bf16 %v2964_v58, %v2963_v1  ;;  %v7876_v27 = vpack.i.bf16 %v7860_v0, %v7866_v47  ;;  %v2769_v17 = vld [vmem:[#allocation3 + $0x159] sm:$0xff] }
 0x2f0   : > { %v2608_v42 = vpop.permute.xlu0 %2607 }
 0x2f1   : > { %v2673_v20 = vsel %vm1799_vm5, %v2383_v6, %v2608_v42  ;;  %5486 = vrot.lane.b32.xlu1 %v7793_v2, %s5918_s29  ;;  %v2894_v6 = vld [vmem:[#allocation3 + $0x152] sm:$0xff]  ;;  %v2895_v42 = vld [vmem:[#allocation3 + $0x15a] sm:$0xff] }
 0x2f2   : > { %5481 = vrot.lane.b32.xlu0 %v7791_v49, %s5918_s29  ;;  %2706 = vst.msk [vmem:[#allocation3 + $0x181] sm:$0xff] %vm311_vm3, %v2673_v20  ;;  %v7886_v20 = vpack.i.bf16 %v2769_v17, %v2768_v63  ;;  %v5585_v62 = vpack.i.bf16 %v2895_v42, %v2894_v6 }
 0x2f4   : > { %v2610_v28 = vpop.permute.xlu1 %2609  ;;  %v2604_v8 = vpop.permute.xlu0 %2603 }
 0x2f5   : > { %v2674_v21 = vsel %vm1799_vm5, %v2384_v36, %v2610_v28  ;;  %v2671_v5 = vsel %vm1799_vm5, %v2381_v43, %v2604_v8  ;;  %5501 = vrot.lane.b32.xlu1 %v7626_v51, %s5926_s13  ;;  %v5505_v51 = vpack.i.bf16 %v2773_v34, %v2772_v44  ;;  %v2767_v36 = vld [vmem:[#allocation3 + $0x141] sm:$0xff]  ;;  %v2766_v28 = vld [vmem:[#allocation3 + $0x139] sm:$0xff] }
 0x2f6   : > { %5491 = vrot.lane.b32.xlu0 %v7808_v37, %s5927_s14  ;;  %2707 = vst.msk [vmem:[#allocation3 + $0x189] sm:$0xff] %vm311_vm3, %v2674_v21  ;;  %2704 = vst.msk [vmem:[#allocation3 + $0x169] sm:$0xff] %vm311_vm3, %v2671_v5  ;;  %v7895_v30 = vpack.i.bf16 %v2767_v36, %v2766_v28  ;;  %v2829_v21 = vld [vmem:[#allocation3 + $0x140] sm:$0xff]  ;;  %v2828_v5 = vld [vmem:[#allocation3 + $0x138] sm:$0xff] }
 0x2f8   : > { %v2606_v7 = vpop.permute.xlu1 %2605 }
 0x2f9   : > { %v2672_v12 = vsel %vm1799_vm5, %v2382_v54, %v2606_v7  ;;  %5511 = vrot.lane.b32.xlu1 %v7793_v2, %s5926_s13  ;;  %v7904_v54 = vpack.i.bf16 %v2829_v21, %v2828_v5  ;;  %v2798_v7 = vld [vmem:[#allocation3 + $0x13a] sm:$0xff]  ;;  %vm3957_vm5 = vcmask 392192  }
 0x2fa   : > { %5496 = vrot.lane.b32.xlu0 %v7640_v15, %s5927_s14  ;;  %2705 = vst.msk [vmem:[#allocation3 + $0x171] sm:$0xff] %vm311_vm3, %v2672_v12  ;;  %v2932_v15 = vld [vmem:[#allocation3 + $0x1a0] sm:$0xff] }
 0x2fb   : > { %v5540_v10 = vpack.i.bf16 %v2932_v15, %v2931_v40  ;;  %v2799_v12 = vld [vmem:[#allocation3 + $0x142] sm:$0xff] }
 0x2fc   : > { %v5595_v40 = vpack.i.bf16 %v2799_v12, %v2798_v7  ;;  %v2834_v1 = vld [vmem:[#allocation3 + $0x180] sm:$0xff] }
 0x2fd   : > { %5516 = vrot.lane.b32.xlu1 %v5515_v59, %s5923_s26  ;;  %v2835_v15 = vld [vmem:[#allocation3 + $0x188] sm:$0xff] }
 0x2fe   : > { %5506 = vrot.lane.b32.xlu0 %v5505_v51, %s5922_s18 }
 0x301   : > { %5526 = vrot.lane.b32.xlu1 %v7594_v52, %s5924_s11  ;;  %v2764_v52 = vld [vmem:[#allocation3 + $0x121] sm:$0xff] }
 0x302   : > { %5521 = vrot.lane.b32.xlu0 %v7581_v48, %s5925_s12  ;;  %v2765_v48 = vld [vmem:[#allocation3 + $0x129] sm:$0xff] }
 0x303   : > { %v7856_v22 = vpack.i.bf16 %v2765_v48, %v2764_v52  ;;  %v2867_v48 = vld [vmem:[#allocation3 + $0x189] sm:$0xff] }
 0x304   : > { %v2899_v52 = vld [vmem:[#allocation3 + $0x18a] sm:$0xff] }
 0x305   : > { %5536 = vrot.lane.b32.xlu1 %v7561_v39, %s5926_s13  ;;  %v7858_v39 = vpack.i.bf16 %v2763_v19, %v2762_v35  ;;  %v2898_v19 = vld [vmem:[#allocation3 + $0x182] sm:$0xff] }
 0x306   : > { %5531 = vrot.lane.b32.xlu0 %v7559_v9, %s5927_s14  ;;  %v2866_v35 = vld [vmem:[#allocation3 + $0x181] sm:$0xff]  ;;  %v5625_v63 = vpack.i.bf16 %v2899_v52, %v2898_v19 }
 0x307   : > { %v7846_v3 = vpop.permute.xlu1 %5261  ;;  %v5620_v42 = vpack.i.bf16 %v2867_v48, %v2866_v35 }
 0x308   : > { %v7848_v29 = vpop.permute.xlu0 %5251 }
 0x309   : > { %5546 = vrot.lane.b32.xlu1 %v5545_v57, %s5926_s13  ;;  %v5615_v57 = vpack.i.bf16 %v2835_v15, %v2834_v1  ;;  %v5254_v38 = vunpack.i.h.bf16 %v7848_v29  ;;  %v5253_v26 = vunpack.i.l.bf16 %v7848_v29  ;;  %v2771_v15 = vld [vmem:[#allocation3 + $0x171] sm:$0xff] }
 0x30a   : > { %5541 = vrot.lane.b32.xlu0 %v5540_v10, %s5927_s14 }
 0x30b   : > { %v7852_v16 = vpop.permute.xlu1 %5271  ;;  %v3898_v29 = vsel %vm311_vm3, %v7552_v23, %v5254_v38  ;;  %v3897_v5 = vsel %vm311_vm3, %v7545_v14, %v5253_v26  ;;  %v2770_v38 = vld [vmem:[#allocation3 + $0x169] sm:$0xff] }
 0x30c   : > { %v7854_v9 = vpop.permute.xlu0 %5256 }
 0x30d   : > { %5561 = vrot.lane.b32.xlu1 %v7858_v39, %s5918_s29  ;;  %v5258_v36 = vunpack.i.l.bf16 %v7854_v9 }
 0x30e   : > { %5551 = vrot.lane.b32.xlu0 %v7856_v22, %s5918_s29 }
 0x30f   : > { %v7870_v33 = vpop.permute.xlu1 %5276  ;;  %v3929_v1 = vsel %vm1996_vm10, %v3897_v5, %v5258_v36  ;;  %v7941_v5 = vpack.i.bf16 %v2771_v15, %v2770_v38  ;;  %v7981_v38 = vld [vmem:[#allocation3 + $0x168] sm:$0xff] }
 0x310   : > { %v7868_v56 = vpop.permute.xlu0 %5266 }
 0x311   : > { %5576 = vrot.lane.b32.xlu1 %v7876_v27, %s5923_s26 }
 0x312   : > { %5556 = vrot.lane.b32.xlu0 %v7872_v55, %s5922_s18 }
 0x313   : > { %v7884_v45 = vpop.permute.xlu1 %5296 }
 0x314   : > { %v7882_v41 = vpop.permute.xlu0 %5281 }
 0x315   : > { %5586 = vrot.lane.b32.xlu1 %v5585_v62, %s5924_s11 }
 0x316   : > { %5566 = vrot.lane.b32.xlu0 %v7886_v20, %s5918_s29 }
 0x317   : > { %v7893_v8 = vpop.permute.xlu1 %5306 }
 0x318   : > { %v7891_v43 = vpop.permute.xlu0 %5286 }
 0x319   : > { %5591 = vrot.lane.b32.xlu1 %v7895_v30, %s5918_s29 }
 0x31a   : > { %5571 = vrot.lane.b32.xlu0 %v5585_v62, %s5922_s18  ;;  %v5259_v62 = vunpack.i.h.bf16 %v7854_v9  ;;  %v2803_v9 = vld [vmem:[#allocation3 + $0x172] sm:$0xff] }
 0x31b   : > { %v7902_v34 = vpop.permute.xlu1 %5316 }
 0x31c   : > { %v7900_v44 = vpop.permute.xlu0 %5291 }
 0x31d   : > { %5601 = vrot.lane.b32.xlu1 %v7904_v54, %s5923_s26 }
 0x31e   : > { %5581 = vrot.lane.b32.xlu0 %v7886_v20, %s5925_s12 }
 0x31f   : > { %v7912_v59 = vpop.permute.xlu1 %5321 }
 0x320   : > { %v7910_v51 = vpop.permute.xlu0 %5301 }
 0x321   : > { %5611 = vrot.lane.b32.xlu1 %v5595_v40, %s5924_s11 }
 0x322   : > { %5596 = vrot.lane.b32.xlu0 %v5595_v40, %s5922_s18  ;;  %v2802_v40 = vld [vmem:[#allocation3 + $0x16a] sm:$0xff] }
 0x323   : > { %v5332_v10 = vpop.permute.xlu1 %5331  ;;  %v5645_v36 = vpack.i.bf16 %v2803_v9, %v2802_v40 }
 0x324   : > { %v5312_v58 = vpop.permute.xlu0 %5311  ;;  %v5334_v28 = vunpack.i.h.bf16 %v5332_v10  ;;  %v5333_v21 = vunpack.i.l.bf16 %v5332_v10  ;;  %v3930_v10 = vsel %vm1996_vm10, %v3898_v29, %v5259_v62 }
 0x325   : > { %5616 = vrot.lane.b32.xlu1 %v5615_v57, %s5923_s26  ;;  %v5314_v62 = vunpack.i.h.bf16 %v5312_v58  ;;  %v5313_v29 = vunpack.i.l.bf16 %v5312_v58 }
 0x326   : > { %5606 = vrot.lane.b32.xlu0 %v7895_v30, %s5925_s12  ;;  %v3963_v52 = vsel %vm3957_vm5, %v3930_v10, %v5334_v28  ;;  %v3962_v23 = vsel %vm3957_vm5, %v3929_v1, %v5333_v21  ;;  %v5323_v1 = vunpack.i.l.bf16 %v7912_v59 }
 0x327   : > { %v5342_v6 = vpop.permute.xlu1 %5341 }
 0x328   : > { %v7921_v17 = vpop.permute.xlu0 %5326  ;;  %v5344_v35 = vunpack.i.h.bf16 %v5342_v6  ;;  %v5343_v14 = vunpack.i.l.bf16 %v5342_v6 }
 0x329   : > { %5626 = vrot.lane.b32.xlu1 %v5625_v63, %s5924_s11  ;;  %v5328_v9 = vunpack.i.l.bf16 %v7921_v17 }
 0x32a   : > { %5621 = vrot.lane.b32.xlu0 %v5620_v42, %s5925_s12 }
 0x32b   : > { %v7931_v12 = vpop.permute.xlu1 %5356 }
 0x32c   : > { %v5337_v7 = vpop.permute.xlu0 %5336 }
 0x32d   : > { %v5339_v48 = vunpack.i.h.bf16 %v5337_v7  ;;  %v5338_v19 = vunpack.i.l.bf16 %v5337_v7  ;;  %5636 = vrot.lane.b32.xlu1 %v5620_v42, %s5926_s13  ;;  %v5318_v42 = vunpack.i.l.bf16 %v7902_v34 }
 0x32e   : > { %5631 = vrot.lane.b32.xlu0 %v5615_v57, %s5927_s14  ;;  %v5319_v57 = vunpack.i.h.bf16 %v7902_v34  ;;  %v5324_v34 = vunpack.i.h.bf16 %v7912_v59 }
 0x32f   : > { %v3995_v26 = vsel %vm3990_vm13, %v3962_v23, %v5338_v19  ;;  %v3996_v63 = vsel %vm3990_vm13, %v3963_v52, %v5339_v48  ;;  %v7947_v6 = vpop.permute.xlu1 %5366  ;;  %v5329_v23 = vunpack.i.h.bf16 %v7921_v17 }
 0x330   : > { %v4028_v28 = vsel %vm4023_vm14, %v3995_v26, %v5343_v14  ;;  %v4029_v21 = vsel %vm4023_vm14, %v3996_v63, %v5344_v35  ;;  %v7945_v7 = vpop.permute.xlu0 %5346  ;;  %v7972_v35 = vld [vmem:[#allocation3 + $0x170] sm:$0xff]  ;;  %v3899_v14 = vsel %vm311_vm3, %v7636_v4, %v5323_v1  ;;  %v5298_v26 = vunpack.i.l.bf16 %v7884_v45  ;;  %v7999_v1 = vld [vmem:[#allocation3 + $0x128] sm:$0xff] }
 0x331   : > { %5641 = vrot.lane.b32.xlu1 %v7941_v5, %s5918_s29  ;;  %v4061_v58 = vsel %vm4056_vm15, %v4028_v28, %v5313_v29  ;;  %v4062_v40 = vsel %vm4056_vm15, %v4029_v21, %v5314_v62  ;;  %v3931_v59 = vsel %vm1996_vm10, %v3899_v14, %v5328_v9  ;;  %v3900_v17 = vsel %vm311_vm3, %v7630_v50, %v5324_v34  ;;  %v2794_v29 = vld [vmem:[#allocation3 + $0x10a] sm:$0xff]  ;;  %v2795_v28 = vld [vmem:[#allocation3 + $0x112] sm:$0xff] }
 0x332   : > { %5646 = vrot.lane.b32.xlu0 %v5645_v36, %s5922_s18  ;;  %v7959_v15 = vsel %vm4089_vm0, %v4061_v58, %v5318_v42  ;;  %v7962_v10 = vsel %vm4089_vm0, %v4062_v40, %v5319_v57  ;;  %v5660_v4 = vpack.i.bf16 %v7972_v35, %v7981_v38  ;;  %v3964_v21 = vsel %vm3957_vm5, %v3931_v59, %v5298_v26  ;;  %v8009_v59 = vld [vmem:[#allocation3 + $0x120] sm:$0xff] }
 0x333   : > { %v7967_v19 = vpop.permute.xlu1 %5376  ;;  %v5289_v50 = vunpack.i.h.bf16 %v7891_v43  ;;  %v5288_v57 = vunpack.i.l.bf16 %v7891_v43  ;;  %v5303_v42 = vunpack.i.l.bf16 %v7910_v51  ;;  %8796 = vst [vmem:[#allocation37_spill] sm:$0xff] %v7999_v1  ;;  %v5294_v58 = vunpack.i.h.bf16 %v7900_v44  ;;  %8797 = vst [vmem:[#allocation38_spill] sm:$0xff] %v8009_v59 }
 0x334   : > { %v7965_v48 = vpop.permute.xlu0 %5351  ;;  %v5293_v40 = vunpack.i.l.bf16 %v7900_v44  ;;  %v5304_v14 = vunpack.i.h.bf16 %v7910_v51  ;;  %v5308_v26 = vunpack.i.l.bf16 %v7893_v8  ;;  %v8018_v44 = vpack.i.bf16 %v7999_v1, %v8009_v59 }
 0x335   : > { %5656 = vrot.lane.b32.xlu1 %v7886_v20, %s5926_s13  ;;  %v5299_v20 = vunpack.i.h.bf16 %v7884_v45  ;;  %v3997_v43 = vsel %vm3990_vm13, %v3964_v21, %v5303_v42  ;;  %v3902_v51 = vsel %vm311_vm3, %v7592_v53, %v5289_v50 }
 0x336   : > { %5651 = vrot.lane.b32.xlu0 %v7876_v27, %s5927_s14  ;;  %v3932_v27 = vsel %vm1996_vm10, %v3900_v17, %v5329_v23  ;;  %v8006_v23 = vpack.i.bf16 %v2795_v28, %v2794_v29  ;;  %v5309_v29 = vunpack.i.h.bf16 %v7893_v8  ;;  %v4030_v59 = vsel %vm4023_vm14, %v3997_v43, %v5308_v26 }
 0x337   : > { %v5382_v62 = vpop.permute.xlu1 %5381  ;;  %v3965_v45 = vsel %vm3957_vm5, %v3932_v27, %v5299_v20  ;;  %v3901_v27 = vsel %vm311_vm3, %v7590_v18, %v5288_v57  ;;  %v3934_v20 = vsel %vm1996_vm10, %v3902_v51, %v5294_v58  ;;  %v5358_v18 = vunpack.i.l.bf16 %v7931_v12 }
 0x338   : > { %v7986_v63 = vpop.permute.xlu0 %5361  ;;  %v5384_v17 = vunpack.i.h.bf16 %v5382_v62  ;;  %v5383_v52 = vunpack.i.l.bf16 %v5382_v62  ;;  %v3998_v28 = vsel %vm3990_vm13, %v3965_v45, %v5304_v14  ;;  %v3933_v62 = vsel %vm1996_vm10, %v3901_v27, %v5293_v40 }
 0x339   : > { %5661 = vrot.lane.b32.xlu1 %v5660_v4, %s5923_s26  ;;  %v4031_v58 = vsel %vm4023_vm14, %v3998_v28, %v5309_v29  ;;  %v5369_v40 = vunpack.i.h.bf16 %v7947_v6  ;;  %v5368_v45 = vunpack.i.l.bf16 %v7947_v6 }
 0x33a   : > { %5666 = vrot.lane.b32.xlu0 %v7941_v5, %s5925_s12  ;;  %v3904_v8 = vsel %vm311_vm3, %v7697_v11, %v5384_v17  ;;  %v3903_v57 = vsel %vm311_vm3, %v7706_v32, %v5383_v52  ;;  %v5364_v11 = vunpack.i.h.bf16 %v7986_v63  ;;  %v5363_v32 = vunpack.i.l.bf16 %v7986_v63 }
 0x33b   : > { %v5392_v34 = vpop.permute.xlu1 %5391 }
 0x33c   : > { %v8004_v9 = vpop.permute.xlu0 %5371  ;;  %v5394_v1 = vunpack.i.h.bf16 %v5392_v34  ;;  %v5393_v47 = vunpack.i.l.bf16 %v5392_v34 }
 0x33d   : > { %5676 = vrot.lane.b32.xlu1 %v5645_v36, %s5924_s11  ;;  %v5359_v36 = vunpack.i.h.bf16 %v7931_v12 }
 0x33e   : > { %5671 = vrot.lane.b32.xlu0 %v8006_v23, %s5922_s18  ;;  %v3967_v17 = vsel %vm3957_vm5, %v3934_v20, %v5394_v1  ;;  %v3966_v51 = vsel %vm3957_vm5, %v3933_v62, %v5393_v47  ;;  %v5374_v62 = vunpack.i.h.bf16 %v8004_v9 }
 0x33f   : > { %v5402_v42 = vpop.permute.xlu1 %5401 }
 0x340   : > { %v5387_v21 = vpop.permute.xlu0 %5386  ;;  %v5404_v29 = vunpack.i.h.bf16 %v5402_v42  ;;  %v5403_v28 = vunpack.i.l.bf16 %v5402_v42 }
 0x341   : > { %v5389_v53 = vunpack.i.h.bf16 %v5387_v21  ;;  %v5388_v50 = vunpack.i.l.bf16 %v5387_v21  ;;  %5681 = vrot.lane.b32.xlu1 %v8018_v44, %s5923_s26 }
 0x342   : > { %5686 = vrot.lane.b32.xlu0 %v7856_v22, %s5925_s12 }
 0x343   : > { %v3935_v12 = vsel %vm1996_vm10, %v3903_v57, %v5388_v50  ;;  %v3936_v34 = vsel %vm1996_vm10, %v3904_v8, %v5389_v53  ;;  %v5412_v26 = vpop.permute.xlu1 %5411  ;;  %v5378_v8 = vunpack.i.l.bf16 %v7967_v19 }
 0x344   : > { %v3968_v52 = vsel %vm3957_vm5, %v3935_v12, %v5358_v18  ;;  %v3969_v14 = vsel %vm3957_vm5, %v3936_v34, %v5359_v36  ;;  %v5397_v43 = vpop.permute.xlu0 %5396  ;;  %v5379_v18 = vunpack.i.h.bf16 %v7967_v19  ;;  %v2792_v12 = vld [vmem:[#allocation3 + $0xf2] sm:$0xff]  ;;  %v5414_v34 = vunpack.i.h.bf16 %v5412_v26 }
 0x345   : > { %v5399_v27 = vunpack.i.h.bf16 %v5397_v43  ;;  %v5398_v6 = vunpack.i.l.bf16 %v5397_v43  ;;  %5691 = vrot.lane.b32.xlu1 %v7872_v55, %s5924_s11  ;;  %v4001_v63 = vsel %vm3990_vm13, %v3968_v52, %v5363_v32  ;;  %v4002_v21 = vsel %vm3990_vm13, %v3969_v14, %v5364_v11 }
 0x346   : > { %5696 = vrot.lane.b32.xlu0 %v5660_v4, %s5927_s14  ;;  %v8058_v1 = vsel %vm4023_vm14, %v4001_v63, %v5368_v45  ;;  %v8061_v47 = vsel %vm4023_vm14, %v4002_v21, %v5369_v40  ;;  %v5373_v4 = vunpack.i.l.bf16 %v8004_v9  ;;  %v2793_v40 = vld [vmem:[#allocation3 + $0xfa] sm:$0xff]  ;;  %v5413_v11 = vunpack.i.l.bf16 %v5412_v26 }
 0x347   : > { %v3999_v36 = vsel %vm3990_vm13, %v3966_v51, %v5398_v6  ;;  %v4000_v53 = vsel %vm3990_vm13, %v3967_v17, %v5399_v27  ;;  %v8067_v50 = vpop.permute.xlu1 %5421  ;;  %v5715_v17 = vpack.i.bf16 %v2793_v40, %v2792_v12  ;;  %v8104_v6 = vld [vmem:[#allocation3 + $0x108] sm:$0xff] }
 0x348   : > { %v4032_v55 = vsel %vm4023_vm14, %v3999_v36, %v5403_v28  ;;  %v4033_v20 = vsel %vm4023_vm14, %v4000_v53, %v5404_v29  ;;  %v5407_v42 = vpop.permute.xlu0 %5406  ;;  %v2790_v36 = vld [vmem:[#allocation3 + $0xda] sm:$0xff]  ;;  %v2791_v53 = vld [vmem:[#allocation3 + $0xe2] sm:$0xff] }
 0x349   : > { %v5409_v57 = vunpack.i.h.bf16 %v5407_v42  ;;  %v5408_v45 = vunpack.i.l.bf16 %v5407_v42  ;;  %5706 = vrot.lane.b32.xlu1 %v7941_v5, %s5926_s13  ;;  %v4065_v9 = vsel %vm4056_vm15, %v4032_v55, %v5373_v4  ;;  %v4066_v32 = vsel %vm4056_vm15, %v4033_v20, %v5374_v62  ;;  %v8125_v20 = vld [vmem:[#allocation3 + $0xf8] sm:$0xff]  ;;  %v8131_v42 = vld [vmem:[#allocation3 + $0xf0] sm:$0xff] }
 0x34a   : > { %5701 = vrot.lane.b32.xlu0 %v7904_v54, %s5927_s14  ;;  %v8080_v14 = vsel %vm4089_vm0, %v4065_v9, %v5378_v8  ;;  %v8083_v43 = vsel %vm4089_vm0, %v4066_v32, %v5379_v18  ;;  %v8123_v55 = vpack.i.bf16 %v2791_v53, %v2790_v36  ;;  %v5349_v36 = vunpack.i.h.bf16 %v7945_v7 }
 0x34b   : > { %v4063_v52 = vsel %vm4056_vm15, %v4030_v59, %v5408_v45  ;;  %v4064_v19 = vsel %vm4056_vm15, %v4031_v58, %v5409_v57  ;;  %v8087_v54 = vpop.permute.xlu1 %5431  ;;  %v8097_v58 = vld [vmem:[#allocation3 + $0x110] sm:$0xff]  ;;  %v8145_v45 = vld [vmem:[#allocation3 + $0xc2] sm:$0xff]  ;;  %v5354_v53 = vunpack.i.h.bf16 %v7965_v48 }
 0x34c   : > { %v8085_v26 = vpop.permute.xlu0 %5416  ;;  %v8092_v51 = vsel %vm4089_vm0, %v4063_v52, %v5413_v11  ;;  %v8095_v59 = vsel %vm4089_vm0, %v4064_v19, %v5414_v34  ;;  %v5720_v63 = vpack.i.bf16 %v8097_v58, %v8104_v6 }
 0x34d   : > { %8798 = vst [vmem:[#allocation10_spill] sm:$0xff] %v8085_v26  ;;  %5711 = vrot.lane.b32.xlu1 %v7895_v30, %s5926_s13 }
 0x34e   : > { %5716 = vrot.lane.b32.xlu0 %v5715_v17, %s5922_s18 }
 0x34f   : > { %v8108_v28 = vpop.permute.xlu1 %5441 }
 0x350   : > { %v8106_v29 = vpop.permute.xlu0 %5426 }
 0x351   : > { %5721 = vrot.lane.b32.xlu1 %v5720_v63, %s5923_s26 }
 0x352   : > { %5726 = vrot.lane.b32.xlu0 %v7858_v39, %s5925_s12 }
 0x353   : > { %v5447_v30 = vpop.permute.xlu1 %5446 }
 0x354   : > { %v8115_v21 = vpop.permute.xlu0 %5436  ;;  %v5449_v8 = vunpack.i.h.bf16 %v5447_v30  ;;  %v5448_v57 = vunpack.i.l.bf16 %v5447_v30 }
 0x355   : > { %5731 = vrot.lane.b32.xlu1 %v8006_v23, %s5924_s11  ;;  %v8139_v23 = vpack.i.bf16 %v8125_v20, %v8131_v42 }
 0x356   : > { %5736 = vrot.lane.b32.xlu0 %v8018_v44, %s5927_s14 }
 0x357   : > { %v8121_v4 = vpop.permute.xlu1 %5456 }
 0x358   : > { %v5452_v62 = vpop.permute.xlu0 %5451 }
 0x359   : > { %5741 = vrot.lane.b32.xlu1 %v7856_v22, %s5926_s13  ;;  %v8147_v22 = vld [vmem:[#allocation3 + $0xca] sm:$0xff]  ;;  %v5454_v12 = vunpack.i.h.bf16 %v5452_v62  ;;  %v5453_v40 = vunpack.i.l.bf16 %v5452_v62  ;;  %v3908_v62 = vsel %vm311_vm3, %v7758_v24, %v5449_v8  ;;  %v5459_v8 = vunpack.i.h.bf16 %v8121_v4 }
 0x35a   : > { %5746 = vrot.lane.b32.xlu0 %v8123_v55, %s5922_s18  ;;  %v5775_v30 = vpack.i.bf16 %v8147_v22, %v8145_v45 }
 0x35b   : > { %v8135_v44 = vpop.permute.xlu1 %5466 }
 0x35c   : > { %v8133_v18 = vpop.permute.xlu0 %5461 }
 0x35d   : > { %5751 = vrot.lane.b32.xlu1 %v8139_v23, %s5923_s26 }
 0x35e   : > { %5756 = vrot.lane.b32.xlu0 %v7791_v49, %s5925_s12  ;;  %v5348_v49 = vunpack.i.l.bf16 %v7945_v7 }
 0x35f   : > { %v5477_v11 = vpop.permute.xlu1 %5476 }
 0x360   : > { %v5472_v34 = vpop.permute.xlu0 %5471  ;;  %v5479_v52 = vunpack.i.h.bf16 %v5477_v11  ;;  %v5478_v19 = vunpack.i.l.bf16 %v5477_v11 }
 0x361   : > { %v5474_v9 = vunpack.i.h.bf16 %v5472_v34  ;;  %v5473_v32 = vunpack.i.l.bf16 %v5472_v34  ;;  %5761 = vrot.lane.b32.xlu1 %v5715_v17, %s5924_s11  ;;  %v3907_v34 = vsel %vm311_vm3, %v7766_v13, %v5448_v57  ;;  %v5353_v13 = vunpack.i.l.bf16 %v7965_v48 }
 0x362   : > { %5766 = vrot.lane.b32.xlu0 %v5720_v63, %s5927_s14  ;;  %v3939_v27 = vsel %vm1996_vm10, %v3907_v34, %v5453_v40  ;;  %v3940_v63 = vsel %vm1996_vm10, %v3908_v62, %v5454_v12  ;;  %v3906_v57 = vsel %vm311_vm3, %v7658_v46, %v5349_v36  ;;  %v3905_v12 = vsel %vm311_vm3, %v7667_v25, %v5348_v49  ;;  %v8212_v34 = vld [vmem:[%s8668_s4] sm:$0xff] }
 0x363   : > { %v4067_v11 = vsel %vm4056_vm15, %v8058_v1, %v5473_v32  ;;  %v4068_v7 = vsel %vm4056_vm15, %v8061_v47, %v5474_v9  ;;  %v8168_v5 = vpop.permute.xlu1 %5486  ;;  %v5424_v1 = vunpack.i.h.bf16 %v8067_v50  ;;  %v5423_v47 = vunpack.i.l.bf16 %v8067_v50 }
 0x364   : > { %v8166_v17 = vpop.permute.xlu0 %5481  ;;  %v8171_v26 = vsel %vm4089_vm0, %v4067_v11, %v5478_v19  ;;  %v8174_v24 = vsel %vm4089_vm0, %v4068_v7, %v5479_v52  ;;  %v3938_v40 = vsel %vm1996_vm10, %v3906_v57, %v5354_v53  ;;  %v5458_v32 = vunpack.i.l.bf16 %v8121_v4  ;;  %v2950_v57 = vld [vmem:[#allocation3 + $0xf9] sm:$0xff] }
 0x365   : > { %5771 = vrot.lane.b32.xlu1 %v7858_v39, %s5926_s13  ;;  %v4132_v48 = vpack.c.bf16 %v8174_v24, %v8171_v26  ;;  %v3972_v50 = vsel %vm3957_vm5, %v3939_v27, %v5423_v47  ;;  %v3973_v9 = vsel %vm3957_vm5, %v3940_v63, %v5424_v1  ;;  %v5429_v46 = vunpack.i.h.bf16 %v8106_v29 }
 0x366   : > { %5776 = vrot.lane.b32.xlu0 %v5775_v30, %s5922_s18  ;;  %v5428_v25 = vunpack.i.l.bf16 %v8106_v29  ;;  %v5464_v52 = vunpack.i.h.bf16 %v8133_v18  ;;  %v5463_v19 = vunpack.i.l.bf16 %v8133_v18  ;;  %v3937_v49 = vsel %vm1996_vm10, %v3905_v12, %v5353_v13  ;;  %s256_s18 = sand.u32 1, %s5903_s22  }
 0x367   : > { %v8197_v36 = vpop.permute.xlu1 %5501  ;;  %v5434_v53 = vunpack.i.h.bf16 %v8087_v54  ;;  %v5433_v27 = vunpack.i.l.bf16 %v8087_v54  ;;  %v3971_v30 = vsel %vm3957_vm5, %v3938_v40, %v5459_v8  ;;  %v4006_v18 = vsel %vm3990_vm13, %v3973_v9, %v5429_v46  ;;  %v2949_v46 = vld [vmem:[#allocation3 + $0xf1] sm:$0xff]  ;;  %s4353_s19 = sshll.u32 %s256_s18, 4  ;;  %s4262_s25 = scalar_lea.sflag [#allocation5], %s256_s18 }
 0x368   : > { %v5492_v39 = vpop.permute.xlu0 %5491  ;;  %v4005_v29 = vsel %vm3990_vm13, %v3972_v50, %v5428_v25  ;;  %v3970_v54 = vsel %vm3957_vm5, %v3937_v49, %v5458_v32  ;;  %v5469_v11 = vunpack.i.h.bf16 %v8135_v44  ;;  %v5468_v7 = vunpack.i.l.bf16 %v8135_v44  ;;  %s258_s28 = scalar_lea.vmem [#allocation7], %s4353_s19 }
 0x369   : > { %v5494_v4 = vunpack.i.h.bf16 %v5492_v39  ;;  %v5493_v62 = vunpack.i.l.bf16 %v5492_v39  ;;  %5781 = vrot.lane.b32.xlu1 %v7808_v37, %s5923_s26  ;;  %v4003_v37 = vsel %vm3990_vm13, %v3970_v54, %v5463_v19  ;;  %v4004_v63 = vsel %vm3990_vm13, %v3971_v30, %v5464_v52  ;;  %v4155_v30 = vld [vmem:[%s8669_s5] sm:$0xff]  ;;  %s4276_s9 = sshll.u32 %s258_s28, 4  ;;  %s8625_s9 = int_to_ptr.vmem [resolvable:$true] %s4276_s9 }
 0x36a   : > { %5786 = vrot.lane.b32.xlu0 %v7793_v2, %s5925_s12  ;;  %v4378_v2 = vcombine.high %v8212_v34, %v8212_v34  ;;  %v4038_v12 = vsel %vm4023_vm14, %v4005_v29, %v5433_v27  ;;  %v4039_v40 = vsel %vm4023_vm14, %v4006_v18, %v5434_v53  ;;  %v4036_v9 = vsel %vm4023_vm14, %v4003_v37, %v5468_v7  ;;  %v2975_v7 = vld [vmem:[#allocation3 + $0xaa] sm:$0xff]  ;;  %s5847_s12 = scalar_lea.vmem %s8625_s9, 256 }
 0x36b   : > { %v5512_v1 = vpop.permute.xlu1 %5511  ;;  %v4071_v44 = vsel %vm4056_vm15, %v4038_v12, %v5493_v62  ;;  %v4072_v50 = vsel %vm4056_vm15, %v4039_v40, %v5494_v4  ;;  %v4037_v32 = vsel %vm4023_vm14, %v4004_v63, %v5469_v11  ;;  %v5439_v19 = vunpack.i.h.bf16 %v8115_v21  ;;  %v2974_v12 = vld [vmem:[#allocation3 + $0x9a] sm:$0xff]  ;;  %p5848_p9 = scmp.ne.s32.totalorder %s8625_s9, %s5847_s12 }
 0x36c   : > { %v8221_v13 = vpop.permute.xlu0 %5496  ;;  %v5514_v47 = vunpack.i.h.bf16 %v5512_v1  ;;  %v5513_v8 = vunpack.i.l.bf16 %v5512_v1  ;;  %4395 = vmatprep.mubr.msk.bf16.mxu1 %vm311_vm3, %v4378_v2  ;;  %v5800_v49 = vpack.i.bf16 %v2950_v57, %v2949_v46  ;;  %v4135_v27 = vpack.c.bf16 %v8147_v22, %v8145_v45  ;;  %v2976_v2 = vld [vmem:[#allocation3 + $0xb2] sm:$0xff]  ;;  %v2971_v46 = vld [vmem:[#allocation3 + $0x7a] sm:$0xff] }
 0x36d   : > { %5791 = vrot.lane.b32.xlu1 %v8123_v55, %s5924_s11  ;;  %v5444_v62 = vunpack.i.h.bf16 %v8108_v28  ;;  %v5443_v29 = vunpack.i.l.bf16 %v8108_v28  ;;  %v5928_v18 = vmov 0   ;;  %v4133_v1 = vpack.c.bf16 %v2976_v2, %v2975_v7  ;;  %v2973_v57 = vld [vmem:[#allocation3 + $0x92] sm:$0xff]  ;;  %v2709_v7 = vld [vmem:[#allocation3 + $0x8] sm:$0xff]  ;;  %s8623_s11 = scalar_lea.hbm %s8670_s6, %s4402_s20  ;;  %p5849_p10 = pnand %p5848_p9, %p6003_p5 }
 0x36e   : > { %5796 = vrot.lane.b32.xlu0 %v8139_v23, %s5927_s14  ;;  %v4104_v25 = vsel %vm4089_vm0, %v4071_v44, %v5513_v8  ;;  %v4105_v52 = vsel %vm4089_vm0, %v4072_v50, %v5514_v47  ;;  %v5438_v23 = vunpack.i.l.bf16 %v8115_v21  ;;  %v4070_v21 = vsel %vm4056_vm15, %v4037_v32, %v5439_v19 }
 0x36f   : > { %v8240_v55 = vpop.permute.xlu1 %5516  ;;  %v4136_v53 = vpack.c.bf16 %v4105_v52, %v4104_v25  ;;  %5805 = vset.pattern.permute.xlu0 %v5928_v18  ;;  %v4103_v11 = vsel %vm4089_vm0, %v4070_v21, %v5444_v62  ;;  %v4131_v50 = vpack.c.bf16 %v2974_v12, %v2973_v57  ;;  %v2972_v25 = vld [vmem:[#allocation3 + $0x82] sm:$0xff]  ;;  %v5284_v26 = vunpack.i.h.bf16 %v7882_v41  ;;  %p5850_p12 = pneg %p5849_p10 }
 0x370   : > { %v8238_v39 = vpop.permute.xlu0 %5506  ;;  %v4069_v4 = vsel %vm4056_vm15, %v4036_v9, %v5438_v23  ;;  %v5279_v23 = vunpack.i.h.bf16 %v7870_v33  ;;  %v5283_v24 = vunpack.i.l.bf16 %v7882_v41  ;;  %v2969_v62 = vld [vmem:[#allocation3 + $0x62] sm:$0xff]  ;;  %v5264_v18 = vunpack.i.h.bf16 %v7846_v3 }
 0x371   : > { %5801 = vrot.lane.b32.xlu1 %v5800_v49, %s5926_s13  ;;  %4219 = vmatpush1.bf16.xpose.msra.mxu1 %v4136_v53  ;;  %v4102_v54 = vsel %vm4089_vm0, %v4069_v4, %v5443_v29  ;;  %v5278_v49 = vunpack.i.l.bf16 %v7870_v33  ;;  %v4129_v53 = vpack.c.bf16 %v2972_v25, %v2971_v46  ;;  %v2970_v29 = vld [vmem:[#allocation3 + $0x6a] sm:$0xff]  ;;  %v5269_v57 = vunpack.i.h.bf16 %v7868_v56  ;;  %s5929_s13 = smov [#allocation7]  }
 0x372   : > { %4380 = vmatprep.subr.msk.bf16.mxu1 %vm311_vm3, %v4135_v27  ;;  %4158 = vperm.xlu0 %5805, %v4155_v30   ;;  %v4134_v28 = vpack.c.bf16 %v4103_v11, %v4102_v54  ;;  %v3896_v33 = vsel %vm311_vm3, %v7824_v61, %v5279_v23  ;;  %v5263_v54 = vunpack.i.l.bf16 %v7846_v3  ;;  %v2708_v11 = vld [vmem:[#allocation3] sm:$0xff]  ;;  %v5268_v12 = vunpack.i.l.bf16 %v7868_v56  ;;  %s5851_s14 = sshll.u32 %s5929_s13, 4  ;;  %s5852_s14 = int_to_ptr.vmem [resolvable:$false] %s5851_s14 }
 0x373   : > { %v8255_v22 = vpop.permute.xlu1 %5526  ;;  %v3895_v4 = vsel %vm311_vm3, %v7832_v60, %v5278_v49  ;;  %v3928_v41 = vsel %vm1996_vm10, %v3896_v33, %v5284_v26  ;;  %v8800_v3 = vpack.c.bf16 %v8095_v59, %v8092_v51  ;;  %v5499_v23 = vunpack.i.h.bf16 %v8221_v13  ;;  %v2967_v51 = vld [vmem:[#allocation3 + $0x4a] sm:$0xff]  ;;  %v2968_v59 = vld [vmem:[#allocation3 + $0x52] sm:$0xff]  ;;  %s5853_s29 = scalar_lea.vmem %s5852_s14, 512  ;;  %p5854_p13 = scmp.lt.s32.totalorder %s8625_s9, %s5852_s14 }
 0x374   : > { %v8253_v45 = vpop.permute.xlu0 %5521  ;;  %v3927_v21 = vsel %vm1996_vm10, %v3895_v4, %v5283_v24  ;;  %v5498_v49 = vunpack.i.l.bf16 %v8221_v13  ;;  %v5274_v24 = vunpack.i.h.bf16 %v7852_v16  ;;  %v5519_v4 = vunpack.i.h.bf16 %v8240_v55  ;;  %p5855_p0 = scmp.lt.s32.totalorder %s5853_s29, %s5847_s12 }
 0x375   : > { %v3960_v61 = vsel %vm3957_vm5, %v3927_v21, %v5263_v54  ;;  %v5518_v33 = vunpack.i.l.bf16 %v8240_v55 }
 0x376   : > { %v3993_v56 = vsel %vm3990_vm13, %v3960_v61, %v5268_v12  ;;  %p5856_p1 = por %p5855_p0, %p5854_p13 }
 0x377   : > { %v8261_v63 = vpop.permute.xlu1 %5536 }
 0x378   : > { %v8259_v37 = vpop.permute.xlu0 %5531  ;;  %p5857_p2 = pnand %p5856_p1, %p5850_p12 }
 0x379   : > { %4221 = vmatpush1.bf16.xpose.msra.mxu1 %v4134_v28  ;;  %v3961_v28 = vsel %vm3957_vm5, %v3928_v41, %v5264_v18  ;;  %v5524_v41 = vunpack.i.h.bf16 %v8253_v45  ;;  %v5504_v18 = vunpack.i.h.bf16 %v8197_v36  ;;  %v5534_v12 = vunpack.i.h.bf16 %v8259_v37 }
 0x37a   : > { %4381 = vmatprep.subr.msk.bf16.mxu1 %vm311_vm3, %v4133_v1  ;;  %v4127_v1 = vpack.c.bf16 %v2970_v29, %v2969_v62  ;;  %v5523_v62 = vunpack.i.l.bf16 %v8253_v45 }
 0x37b   : > { %v8266_v8 = vpop.permute.xlu1 %5546 }
 0x37c   : > { %v8264_v47 = vpop.permute.xlu0 %5541 }
 0x37f   : > { %v8270_v44 = vpop.permute.xlu1 %5561 }
 0x380   : > { %v8268_v40 = vpop.permute.xlu0 %5551 }
 0x381   : > { %4223 = vmatpush1.bf16.xpose.msra.mxu1 %v4132_v48  ;;  %v8799_v48 = vpack.c.bf16 %v8083_v43, %v8080_v14  ;;  %v5249_v14 = vunpack.i.h.bf16 %v7504_v31  ;;  %v5248_v43 = vunpack.i.l.bf16 %v7504_v31  ;;  %v5509_v31 = vunpack.i.h.bf16 %v8238_v39 }
 0x382   : > { %4382 = vmatprep.subr.msk.bf16.mxu1 %vm311_vm3, %v4131_v50  ;;  %v5508_v50 = vunpack.i.l.bf16 %v8238_v39 }
 0x383   : > { %v8278_v32 = vpop.permute.xlu1 %5576  ;;  %v3894_v46 = vsel %vm311_vm3, %v2709_v7, %v5249_v14  ;;  %v3893_v25 = vsel %vm311_vm3, %v2708_v11, %v5248_v43  ;;  %v4125_v43 = vpack.c.bf16 %v2968_v59, %v2967_v51  ;;  %v2966_v51 = vld [vmem:[#allocation3 + $0x3a] sm:$0xff]  ;;  %v8372_v59 = vld [vmem:[#allocation3 + $0x152] sm:$0xff] }
 0x384   : > { %v8276_v9 = vpop.permute.xlu0 %5556  ;;  %v3926_v13 = vsel %vm1996_vm10, %v3894_v46, %v5509_v31  ;;  %v3925_v21 = vsel %vm1996_vm10, %v3893_v25, %v5508_v50  ;;  %v5533_v31 = vunpack.i.l.bf16 %v8259_v37  ;;  %v8801_v50 = vpack.c.bf16 %v7962_v10, %v7959_v15  ;;  %v2965_v15 = vld [vmem:[#allocation3 + $0x32] sm:$0xff] }
 0x385   : > { %v3959_v61 = vsel %vm3957_vm5, %v3926_v13, %v5519_v4  ;;  %v3958_v45 = vsel %vm3957_vm5, %v3925_v21, %v5518_v33  ;;  %v5539_v37 = vunpack.i.h.bf16 %v8261_v63  ;;  %v8378_v4 = vld [vmem:[#allocation3 + $0x18a] sm:$0xff] }
 0x386   : > { %v8380_v33 = vld [vmem:[#allocation3 + $0x16a] sm:$0xff] }
 0x387   : > { %v8282_v19 = vpop.permute.xlu1 %5586 }
 0x388   : > { %v8280_v52 = vpop.permute.xlu0 %5566 }
 0x389   : > { %4225 = vmatpush1.bf16.xpose.msra.mxu1 %v8799_v48  ;;  %v5273_v48 = vunpack.i.l.bf16 %v7852_v16  ;;  %v5503_v16 = vunpack.i.l.bf16 %v8197_v36  ;;  %v3992_v36 = vsel %vm3990_vm13, %v3959_v61, %v5524_v41  ;;  %v2995_v41 = vld [vmem:[#allocation3 + $0x19a] sm:$0xff]  ;;  %v5543_v61 = vunpack.i.l.bf16 %v8264_v47 }
 0x38a   : > { %4383 = vmatprep.subr.msk.bf16.mxu1 %vm311_vm3, %v4129_v53  ;;  %v3994_v53 = vsel %vm3990_vm13, %v3961_v28, %v5269_v57  ;;  %v5529_v28 = vunpack.i.h.bf16 %v8255_v22  ;;  %v3991_v57 = vsel %vm3990_vm13, %v3958_v45, %v5523_v62  ;;  %v2996_v62 = vld [vmem:[#allocation3 + $0x1a2] sm:$0xff] }
 0x38b   : > { %v8294_v30 = vpop.permute.xlu1 %5591  ;;  %v4026_v29 = vsel %vm4023_vm14, %v3993_v56, %v5273_v48  ;;  %v4027_v14 = vsel %vm4023_vm14, %v3994_v53, %v5274_v24  ;;  %v5538_v56 = vunpack.i.l.bf16 %v8261_v63  ;;  %v8374_v24 = vld [vmem:[#allocation3 + $0x15a] sm:$0xff]  ;;  %v8376_v48 = vld [vmem:[#allocation3 + $0x182] sm:$0xff]  ;;  %v4153_v45 = vpack.c.bf16 %v2996_v62, %v2995_v41 }
 0x38c   : > { %v8292_v27 = vpop.permute.xlu0 %5571  ;;  %v4059_v54 = vsel %vm4056_vm15, %v4026_v29, %v5498_v49  ;;  %v4060_v55 = vsel %vm4056_vm15, %v4027_v14, %v5499_v23  ;;  %v4025_v49 = vsel %vm4023_vm14, %v3992_v36, %v5529_v28  ;;  %v8386_v29 = vld [vmem:[#allocation3 + $0x172] sm:$0xff]  ;;  %v4123_v14 = vpack.c.bf16 %v2966_v51, %v2965_v15 }
 0x38d   : > { %v4093_v25 = vsel %vm4089_vm0, %v4060_v55, %v5504_v18  ;;  %v4058_v53 = vsel %vm4056_vm15, %v4025_v49, %v5534_v12  ;;  %v5544_v55 = vunpack.i.h.bf16 %v8264_v47  ;;  %v4149_v28 = vpack.c.bf16 %v8386_v29, %v8380_v33 }
 0x38e   : > { %v4091_v18 = vsel %vm4089_vm0, %v4058_v53, %v5539_v37  ;;  %v5554_v36 = vunpack.i.h.bf16 %v8268_v40  ;;  %v5569_v47 = vunpack.i.h.bf16 %v8280_v52  ;;  %v5568_v37 = vunpack.i.l.bf16 %v8280_v52 }
 0x38f   : > { %v8308_v2 = vpop.permute.xlu1 %5601  ;;  %v5573_v15 = vunpack.i.l.bf16 %v8292_v27 }
 0x390   : > { %v8306_v60 = vpop.permute.xlu0 %5581 }
 0x391   : > { %4227 = vmatpush1.bf16.xpose.msra.mxu1 %v8800_v3 }
 0x392   : > { %4384 = vmatprep.subr.msk.bf16.mxu1 %vm311_vm3, %v4127_v1  ;;  %v5528_v1 = vunpack.i.l.bf16 %v8255_v22  ;;  %v4092_v22 = vsel %vm4089_vm0, %v4059_v54, %v5503_v16  ;;  %v4151_v16 = vpack.c.bf16 %v8378_v4, %v8376_v48  ;;  %v4147_v54 = vpack.c.bf16 %v8374_v24, %v8372_v59  ;;  %v8804_v48 = vld [vmem:[#allocation38_spill] sm:$0xff]  ;;  %v2987_v24 = vld [vmem:[#allocation3 + $0x13a] sm:$0xff] }
 0x393   : > { %v8328_v39 = vpop.permute.xlu1 %5611  ;;  %v4124_v63 = vpack.c.bf16 %v4093_v25, %v4092_v22 }
 0x394   : > { %v8326_v26 = vpop.permute.xlu0 %5596  ;;  %v4024_v23 = vsel %vm4023_vm14, %v3991_v57, %v5528_v1  ;;  %v5549_v1 = vunpack.i.h.bf16 %v8266_v8  ;;  %v5548_v57 = vunpack.i.l.bf16 %v8266_v8 }
 0x395   : > { %v4057_v10 = vsel %vm4056_vm15, %v4024_v23, %v5533_v31 }
 0x397   : > { %v8346_v7 = vpop.permute.xlu1 %5616 }
 0x398   : > { %v8344_v11 = vpop.permute.xlu0 %5606  ;;  %v5618_v8 = vunpack.i.l.bf16 %v8346_v7 }
 0x399   : > { %4229 = vmatpush1.bf16.xpose.msra.mxu1 %v8801_v50 }
 0x39a   : > { %4385 = vmatprep.subr.msk.bf16.mxu1 %vm311_vm3, %v4125_v43  ;;  %v4090_v43 = vsel %vm4089_vm0, %v4057_v10, %v5538_v56  ;;  %v5574_v56 = vunpack.i.h.bf16 %v8292_v27  ;;  %v5619_v10 = vunpack.i.h.bf16 %v8346_v7 }
 0x39b   : > { %v8362_v46 = vpop.permute.xlu1 %5626  ;;  %v4122_v50 = vpack.c.bf16 %v4091_v18, %v4090_v43  ;;  %v5553_v18 = vunpack.i.l.bf16 %v8268_v40  ;;  %v5584_v40 = vunpack.i.h.bf16 %v8306_v60 }
 0x39c   : > { %v8360_v3 = vpop.permute.xlu0 %5621  ;;  %v5629_v7 = vunpack.i.h.bf16 %v8362_v46  ;;  %v5628_v43 = vunpack.i.l.bf16 %v8362_v46 }
 0x39d   : > { %v5623_v41 = vunpack.i.l.bf16 %v8360_v3  ;;  %v3917_v4 = vsel %vm311_vm3, %v8804_v48, %v5553_v18  ;;  %v5603_v18 = vunpack.i.l.bf16 %v8308_v2 }
 0x39f   : > { %v8384_v21 = vpop.permute.xlu1 %5636 }
 0x3a0   : > { %v8382_v13 = vpop.permute.xlu0 %5631 }
 0x3a1   : > { %4231 = vmatpush1.bf16.xpose.msra.mxu1 %v4124_v63  ;;  %v5624_v63 = vunpack.i.h.bf16 %v8360_v3  ;;  %v5564_v3 = vunpack.i.h.bf16 %v8270_v44 }
 0x3a2   : > { %4386 = vmatprep.subr.msk.bf16.mxu1 %vm311_vm3, %v4123_v14 }
 0x3a3   : > { %v5642_v31 = vpop.permute.xlu1 %5641 }
 0x3a4   : > { %v5647_v12 = vpop.permute.xlu0 %5646  ;;  %v5644_v23 = vunpack.i.h.bf16 %v5642_v31  ;;  %v5643_v49 = vunpack.i.l.bf16 %v5642_v31 }
 0x3a5   : > { %v5649_v22 = vunpack.i.h.bf16 %v5647_v12  ;;  %v5648_v25 = vunpack.i.l.bf16 %v5647_v12 }
 0x3a6   : > { %v3924_v53 = vsel %vm311_vm3, %v7972_v35, %v5644_v23  ;;  %v3923_v51 = vsel %vm311_vm3, %v7981_v38, %v5643_v49 }
 0x3a7   : > { %v3956_v52 = vsel %vm1996_vm10, %v3924_v53, %v5649_v22  ;;  %v3955_v62 = vsel %vm1996_vm10, %v3923_v51, %v5648_v25  ;;  %v8418_v27 = vpop.permute.xlu1 %5656  ;;  %v3922_v22 = vsel %vm311_vm3, %v7860_v0, %v5569_v47  ;;  %v8802_v25 = vld [vmem:[#allocation26_spill] sm:$0xff] }
 0x3a8   : > { %v8416_v14 = vpop.permute.xlu0 %5651  ;;  %v3988_v35 = vsel %vm3957_vm5, %v3955_v62, %v5618_v8  ;;  %v3989_v38 = vsel %vm3957_vm5, %v3956_v52, %v5619_v10  ;;  %v3921_v23 = vsel %vm311_vm3, %v8802_v25, %v5568_v37  ;;  %v5594_v10 = vunpack.i.h.bf16 %v8294_v30 }
 0x3a9   : > { %4233 = vmatpush1.bf16.xpose.msra.mxu1 %v4122_v50  ;;  %v4021_v12 = vsel %vm3990_vm13, %v3988_v35, %v5623_v41  ;;  %v4022_v31 = vsel %vm3990_vm13, %v3989_v38, %v5624_v63  ;;  %v5593_v50 = vunpack.i.l.bf16 %v8294_v30  ;;  %v3953_v0 = vsel %vm1996_vm10, %v3921_v23, %v5573_v15 }
 0x3aa   : > { %4387 = vmatprep.subr.msk.bf16.mxu1 %vm311_vm3, %v4153_v45  ;;  %v4054_v46 = vsel %vm4023_vm14, %v4021_v12, %v5628_v43  ;;  %v4055_v49 = vsel %vm4023_vm14, %v4022_v31, %v5629_v7  ;;  %v3954_v47 = vsel %vm1996_vm10, %v3922_v22, %v5574_v56  ;;  %v5599_v30 = vunpack.i.h.bf16 %v8326_v26  ;;  %v5826_v31 = vld [vmem:[#allocation3 + $0x140] sm:$0xff]  ;;  %v5827_v22 = vld [vmem:[#allocation3 + $0x138] sm:$0xff] }
 0x3ab   : > { %v5662_v53 = vpop.permute.xlu1 %5661  ;;  %v4087_v51 = vsel %vm4056_vm15, %v4054_v46, %v5543_v61  ;;  %v4088_v63 = vsel %vm4056_vm15, %v4055_v49, %v5544_v55  ;;  %v5598_v43 = vunpack.i.l.bf16 %v8326_v26  ;;  %v5563_v15 = vunpack.i.l.bf16 %v8270_v44 }
 0x3ac   : > { %v5667_v8 = vpop.permute.xlu0 %5666  ;;  %v5664_v37 = vunpack.i.h.bf16 %v5662_v53  ;;  %v5663_v45 = vunpack.i.l.bf16 %v5662_v53  ;;  %v4120_v62 = vsel %vm4089_vm0, %v4087_v51, %v5548_v57  ;;  %v4121_v7 = vsel %vm4089_vm0, %v4088_v63, %v5549_v1 }
 0x3ad   : > { %v5669_v41 = vunpack.i.h.bf16 %v5667_v8  ;;  %v5668_v52 = vunpack.i.l.bf16 %v5667_v8  ;;  %v5579_v56 = vunpack.i.h.bf16 %v8278_v32  ;;  %v5578_v35 = vunpack.i.l.bf16 %v8278_v32 }
 0x3ae   : > { %v3987_v61 = vsel %vm3957_vm5, %v3954_v47, %v5664_v37  ;;  %v3986_v55 = vsel %vm3957_vm5, %v3953_v0, %v5663_v45  ;;  %v4152_v57 = vpack.c.bf16 %v4121_v7, %v4120_v62  ;;  %v3920_v1 = vsel %vm311_vm3, %v5826_v31, %v5594_v10 }
 0x3af   : > { %v5677_v12 = vpop.permute.xlu1 %5676  ;;  %v3919_v26 = vsel %vm311_vm3, %v5827_v22, %v5593_v50  ;;  %v5634_v46 = vunpack.i.h.bf16 %v8382_v13  ;;  %v5633_v49 = vunpack.i.l.bf16 %v8382_v13  ;;  %v4019_v8 = vsel %vm3990_vm13, %v3986_v55, %v5668_v52 }
 0x3b0   : > { %v8450_v38 = vpop.permute.xlu0 %5671  ;;  %v5679_v25 = vunpack.i.h.bf16 %v5677_v12  ;;  %v5678_v23 = vunpack.i.l.bf16 %v5677_v12  ;;  %v4020_v32 = vsel %vm3990_vm13, %v3987_v61, %v5669_v41  ;;  %v3951_v53 = vsel %vm1996_vm10, %v3919_v26, %v5598_v43  ;;  %v8803_v41 = vld [vmem:[#allocation37_spill] sm:$0xff] }
 0x3b1   : > { %4235 = vmatpush2.bf16.xpose.msra.mxu1 %v4152_v57  ;;  %v3952_v51 = vsel %vm1996_vm10, %v3920_v1, %v5599_v30  ;;  %v5639_v13 = vunpack.i.h.bf16 %v8384_v21  ;;  %v5638_v50 = vunpack.i.l.bf16 %v8384_v21  ;;  %v3918_v52 = vsel %vm311_vm3, %v8803_v41, %v5554_v36 }
 0x3b2   : > { %v4052_v10 = vsel %vm4023_vm14, %v4019_v8, %v5678_v23  ;;  %v4053_v63 = vsel %vm4023_vm14, %v4020_v32, %v5679_v25  ;;  %4388 = vmatprep.subr.msk.bf16.mxu1 %vm311_vm3, %v4151_v16  ;;  %v5559_v16 = vunpack.i.h.bf16 %v8276_v9  ;;  %v5558_v21 = vunpack.i.l.bf16 %v8276_v9 }
 0x3b3   : > { %v8470_v47 = vpop.permute.xlu1 %5681  ;;  %v4085_v37 = vsel %vm4056_vm15, %v4052_v10, %v5633_v49  ;;  %v4086_v45 = vsel %vm4056_vm15, %v4053_v63, %v5634_v46  ;;  %v3984_v62 = vsel %vm3957_vm5, %v3951_v53, %v5578_v35  ;;  %v3985_v7 = vsel %vm3957_vm5, %v3952_v51, %v5579_v56 }
 0x3b4   : > { %v8468_v0 = vpop.permute.xlu0 %5686  ;;  %v4118_v30 = vsel %vm4089_vm0, %v4085_v37, %v5638_v50  ;;  %v4119_v43 = vsel %vm4089_vm0, %v4086_v45, %v5639_v13  ;;  %v5583_v61 = vunpack.i.l.bf16 %v8306_v60  ;;  %v5604_v36 = vunpack.i.h.bf16 %v8308_v2 }
 0x3b5   : > { %v3916_v9 = vsel %vm311_vm3, %v8097_v58, %v5564_v3  ;;  %v5609_v55 = vunpack.i.h.bf16 %v8344_v11  ;;  %v5608_v56 = vunpack.i.l.bf16 %v8344_v11  ;;  %v4150_v57 = vpack.c.bf16 %v4119_v43, %v4118_v30 }
 0x3b6   : > { %v3949_v31 = vsel %vm1996_vm10, %v3917_v4, %v5558_v21  ;;  %v3950_v60 = vsel %vm1996_vm10, %v3918_v52, %v5559_v16  ;;  %v4017_v1 = vsel %vm3990_vm13, %v3984_v62, %v5583_v61  ;;  %v4018_v2 = vsel %vm3990_vm13, %v3985_v7, %v5584_v40 }
 0x3b7   : > { %v8496_v12 = vpop.permute.xlu1 %5691  ;;  %v5589_v22 = vunpack.i.h.bf16 %v8282_v19  ;;  %v5588_v58 = vunpack.i.l.bf16 %v8282_v19  ;;  %v3983_v11 = vsel %vm3957_vm5, %v3950_v60, %v5604_v36  ;;  %v3982_v25 = vsel %vm3957_vm5, %v3949_v31, %v5603_v18 }
 0x3b8   : > { %v5697_v35 = vpop.permute.xlu0 %5696  ;;  %v5614_v23 = vunpack.i.h.bf16 %v8328_v39  ;;  %v5613_v46 = vunpack.i.l.bf16 %v8328_v39  ;;  %v4015_v49 = vsel %vm3990_vm13, %v3982_v25, %v5608_v56  ;;  %v4016_v19 = vsel %vm3990_vm13, %v3983_v11, %v5609_v55 }
 0x3b9   : > { %v5699_v3 = vunpack.i.h.bf16 %v5697_v35  ;;  %v5698_v26 = vunpack.i.l.bf16 %v5697_v35  ;;  %4237 = vmatpush2.bf16.xpose.msra.mxu1 %v4150_v57  ;;  %v4050_v8 = vsel %vm4023_vm14, %v4017_v1, %v5588_v58  ;;  %v4051_v32 = vsel %vm4023_vm14, %v4018_v2, %v5589_v22 }
 0x3ba   : > { %4389 = vmatprep.subr.msk.bf16.mxu1 %vm311_vm3, %v4149_v28  ;;  %v5654_v10 = vunpack.i.h.bf16 %v8416_v14  ;;  %v5653_v39 = vunpack.i.l.bf16 %v8416_v14  ;;  %v5674_v33 = vunpack.i.h.bf16 %v8450_v38  ;;  %v5673_v29 = vunpack.i.l.bf16 %v8450_v38 }
 0x3bb   : > { %v5707_v51 = vpop.permute.xlu1 %5706  ;;  %v4083_v28 = vsel %vm4056_vm15, %v4050_v8, %v5698_v26  ;;  %v4084_v50 = vsel %vm4056_vm15, %v4051_v32, %v5699_v3  ;;  %v5684_v37 = vunpack.i.h.bf16 %v8470_v47  ;;  %v5683_v45 = vunpack.i.l.bf16 %v8470_v47 }
 0x3bc   : > { %v8516_v53 = vpop.permute.xlu0 %5701  ;;  %v5709_v63 = vunpack.i.h.bf16 %v5707_v51  ;;  %v5708_v13 = vunpack.i.l.bf16 %v5707_v51  ;;  %v3915_v14 = vsel %vm311_vm3, %v8104_v6, %v5563_v15  ;;  %v4048_v48 = vsel %vm4023_vm14, %v4015_v49, %v5613_v46 }
 0x3bd   : > { %v4049_v38 = vsel %vm4023_vm14, %v4016_v19, %v5614_v23  ;;  %v4081_v62 = vsel %vm4056_vm15, %v4048_v48, %v5653_v39  ;;  %v5659_v7 = vunpack.i.h.bf16 %v8418_v27  ;;  %v5658_v30 = vunpack.i.l.bf16 %v8418_v27  ;;  %v2985_v48 = vld [vmem:[#allocation3 + $0x122] sm:$0xff] }
 0x3be   : > { %v4116_v41 = vsel %vm4089_vm0, %v4083_v28, %v5708_v13  ;;  %v4117_v52 = vsel %vm4089_vm0, %v4084_v50, %v5709_v63  ;;  %v4082_v47 = vsel %vm4056_vm15, %v4049_v38, %v5654_v10  ;;  %v3947_v44 = vsel %vm1996_vm10, %v3915_v14, %v5673_v29  ;;  %v2986_v38 = vld [vmem:[#allocation3 + $0x12a] sm:$0xff] }
 0x3bf   : > { %v5712_v16 = vpop.permute.xlu1 %5711  ;;  %v4148_v21 = vpack.c.bf16 %v4117_v52, %v4116_v41  ;;  %v3948_v43 = vsel %vm1996_vm10, %v3916_v9, %v5674_v33  ;;  %v5689_v6 = vunpack.i.h.bf16 %v8468_v0  ;;  %v5688_v15 = vunpack.i.l.bf16 %v8468_v0 }
 0x3c0   : > { %v5717_v4 = vpop.permute.xlu0 %5716  ;;  %v3980_v40 = vsel %vm3957_vm5, %v3947_v44, %v5683_v45  ;;  %v3981_v61 = vsel %vm3957_vm5, %v3948_v43, %v5684_v37  ;;  %v5484_v27 = vunpack.i.h.bf16 %v8166_v17  ;;  %v5483_v36 = vunpack.i.l.bf16 %v8166_v17 }
 0x3c1   : > { %4239 = vmatpush2.bf16.xpose.msra.mxu1 %v4148_v21  ;;  %v5694_v18 = vunpack.i.h.bf16 %v8496_v12  ;;  %v5693_v9 = vunpack.i.l.bf16 %v8496_v12  ;;  %v5704_v56 = vunpack.i.h.bf16 %v8516_v53  ;;  %v5703_v35 = vunpack.i.l.bf16 %v8516_v53 }
 0x3c2   : > { %4390 = vmatprep.subr.msk.bf16.mxu1 %vm311_vm3, %v4147_v54  ;;  %v4114_v57 = vsel %vm4089_vm0, %v4081_v62, %v5658_v30  ;;  %v4115_v59 = vsel %vm4089_vm0, %v4082_v47, %v5659_v7  ;;  %v2988_v54 = vld [vmem:[#allocation3 + $0x142] sm:$0xff]  ;;  %v4013_v31 = vsel %vm3990_vm13, %v3980_v40, %v5688_v15  ;;  %v4014_v17 = vsel %vm3990_vm13, %v3981_v61, %v5689_v6 }
 0x3c3   : > { %v5722_v0 = vpop.permute.xlu1 %5721  ;;  %v5719_v60 = vunpack.i.h.bf16 %v5717_v4  ;;  %v5718_v1 = vunpack.i.l.bf16 %v5717_v4  ;;  %v5714_v2 = vunpack.i.h.bf16 %v5712_v16  ;;  %v5713_v12 = vunpack.i.l.bf16 %v5712_v16  ;;  %v5828_v61 = vld [vmem:[#allocation3 + $0xe0] sm:$0xff] }
 0x3c4   : > { %v5727_v55 = vpop.permute.xlu0 %5726  ;;  %v5724_v22 = vunpack.i.h.bf16 %v5722_v0  ;;  %v5723_v58 = vunpack.i.l.bf16 %v5722_v0  ;;  %v4046_v3 = vsel %vm4023_vm14, %v4013_v31, %v5693_v9  ;;  %v4047_v26 = vsel %vm4023_vm14, %v4014_v17, %v5694_v18  ;;  %v2983_v17 = vld [vmem:[#allocation3 + $0x10a] sm:$0xff] }
 0x3c5   : > { %v4146_v23 = vpack.c.bf16 %v4115_v59, %v4114_v57  ;;  %v4145_v46 = vpack.c.bf16 %v2988_v54, %v2987_v24  ;;  %v3914_v49 = vsel %vm311_vm3, %v8125_v20, %v5484_v27  ;;  %v3913_v19 = vsel %vm311_vm3, %v8131_v42, %v5483_v36  ;;  %v5829_v36 = vld [vmem:[#allocation3 + $0xd8] sm:$0xff] }
 0x3c6   : > { %v4079_v8 = vsel %vm4056_vm15, %v4046_v3, %v5703_v35  ;;  %v4080_v32 = vsel %vm4056_vm15, %v4047_v26, %v5704_v56  ;;  %v3945_v53 = vsel %vm1996_vm10, %v3913_v19, %v5718_v1  ;;  %v3946_v51 = vsel %vm1996_vm10, %v3914_v49, %v5719_v60  ;;  %v2984_v60 = vld [vmem:[#allocation3 + $0x112] sm:$0xff] }
 0x3c7   : > { %v5732_v25 = vpop.permute.xlu1 %5731  ;;  %v5729_v10 = vunpack.i.h.bf16 %v5727_v55  ;;  %v5728_v39 = vunpack.i.l.bf16 %v5727_v55  ;;  %v3979_v63 = vsel %vm3957_vm5, %v3946_v51, %v5724_v22  ;;  %v3978_v13 = vsel %vm3957_vm5, %v3945_v53, %v5723_v58  ;;  %v8805_v58 = vld [vmem:[#allocation10_spill] sm:$0xff] }
 0x3c8   : > { %v5737_v11 = vpop.permute.xlu0 %5736  ;;  %v4112_v20 = vsel %vm4089_vm0, %v4079_v8, %v5713_v12  ;;  %v4113_v42 = vsel %vm4089_vm0, %v4080_v32, %v5714_v2  ;;  %v5734_v33 = vunpack.i.h.bf16 %v5732_v25  ;;  %v5733_v29 = vunpack.i.l.bf16 %v5732_v25 }
 0x3c9   : > { %4241 = vmatpush2.bf16.xpose.msra.mxu1 %v4146_v23  ;;  %v5489_v37 = vunpack.i.h.bf16 %v8168_v5  ;;  %v5488_v45 = vunpack.i.l.bf16 %v8168_v5  ;;  %v4011_v41 = vsel %vm3990_vm13, %v3978_v13, %v5728_v39  ;;  %v4012_v52 = vsel %vm3990_vm13, %v3979_v63, %v5729_v10 }
 0x3ca   : > { %4391 = vmatprep.subr.msk.bf16.mxu1 %vm311_vm3, %v4145_v46  ;;  %v4144_v14 = vpack.c.bf16 %v4113_v42, %v4112_v20  ;;  %v5739_v4 = vunpack.i.h.bf16 %v5737_v11  ;;  %v5738_v16 = vunpack.i.l.bf16 %v5737_v11  ;;  %v4044_v47 = vsel %vm4023_vm14, %v4011_v41, %v5733_v29  ;;  %v5830_v20 = vld [vmem:[#allocation3 + $0xc8] sm:$0xff] }
 0x3cb   : > { %v5742_v50 = vpop.permute.xlu1 %5741  ;;  %v4045_v7 = vsel %vm4023_vm14, %v4012_v52, %v5734_v33  ;;  %v4143_v40 = vpack.c.bf16 %v2986_v38, %v2985_v48  ;;  %v3912_v27 = vsel %vm311_vm3, %v5828_v61, %v5489_v37  ;;  %v3911_v18 = vsel %vm311_vm3, %v5829_v36, %v5488_v45  ;;  %v5831_v33 = vld [vmem:[#allocation3 + $0xc0] sm:$0xff] }
 0x3cc   : > { %v5747_v28 = vpop.permute.xlu0 %5746  ;;  %v5744_v30 = vunpack.i.h.bf16 %v5742_v50  ;;  %v5743_v44 = vunpack.i.l.bf16 %v5742_v50  ;;  %v4077_v0 = vsel %vm4056_vm15, %v4044_v47, %v5738_v16  ;;  %v4078_v56 = vsel %vm4056_vm15, %v4045_v7, %v5739_v4  ;;  %v2982_v47 = vld [vmem:[#allocation3 + $0xfa] sm:$0xff] }
 0x3cd   : > { %v5749_v21 = vunpack.i.h.bf16 %v5747_v28  ;;  %v5748_v62 = vunpack.i.l.bf16 %v5747_v28  ;;  %v5419_v3 = vunpack.i.h.bf16 %v8805_v58  ;;  %v5418_v26 = vunpack.i.l.bf16 %v8805_v58 }
 0x3ce   : > { %v4110_v54 = vsel %vm4089_vm0, %v4077_v0, %v5743_v44  ;;  %v4111_v31 = vsel %vm4089_vm0, %v4078_v56, %v5744_v30  ;;  %v4141_v25 = vpack.c.bf16 %v2984_v60, %v2983_v17  ;;  %v4377_v17 = vcombine.low %v8212_v34, %v8212_v34 }
 0x3cf   : > { %v5752_v6 = vpop.permute.xlu1 %5751  ;;  %v3943_v9 = vsel %vm1996_vm10, %v3911_v18, %v5748_v62  ;;  %v3944_v55 = vsel %vm1996_vm10, %v3912_v27, %v5749_v21  ;;  %v4142_v11 = vpack.c.bf16 %v4111_v31, %v4110_v54  ;;  %v3910_v42 = vsel %vm311_vm3, %v5830_v20, %v5419_v3  ;;  %v2981_v62 = vld [vmem:[#allocation3 + $0xf2] sm:$0xff] }
 0x3d0   : > { %v5757_v43 = vpop.permute.xlu0 %5756  ;;  %v5754_v5 = vunpack.i.h.bf16 %v5752_v6  ;;  %v5753_v15 = vunpack.i.l.bf16 %v5752_v6  ;;  %v3909_v29 = vsel %vm311_vm3, %v5831_v33, %v5418_v26 }
 0x3d1   : > { %4243 = vmatpush2.bf16.xpose.msra.mxu1 %v4144_v14  ;;  %v5759_v35 = vunpack.i.h.bf16 %v5757_v43  ;;  %v5758_v57 = vunpack.i.l.bf16 %v5757_v43 }
 0x3d2   : > { %4392 = vmatprep.subr.msk.bf16.mxu1 %vm311_vm3, %v4143_v40  ;;  %v3976_v1 = vsel %vm3957_vm5, %v3943_v9, %v5753_v15  ;;  %v3977_v2 = vsel %vm3957_vm5, %v3944_v55, %v5754_v5  ;;  %v4139_v40 = vpack.c.bf16 %v2982_v47, %v2981_v62 }
 0x3d3   : > { %v5762_v24 = vpop.permute.xlu1 %5761  ;;  %v4009_v49 = vsel %vm3990_vm13, %v3976_v1, %v5758_v57  ;;  %v4010_v19 = vsel %vm3990_vm13, %v3977_v2, %v5759_v35 }
 0x3d4   : > { %v5767_v59 = vpop.permute.xlu0 %5766  ;;  %v5764_v12 = vunpack.i.h.bf16 %v5762_v24  ;;  %v5763_v22 = vunpack.i.l.bf16 %v5762_v24 }
 0x3d5   : > { %v5769_v23 = vunpack.i.h.bf16 %v5767_v59  ;;  %v5768_v46 = vunpack.i.l.bf16 %v5767_v59 }
 0x3d6   : > { %v4042_v53 = vsel %vm4023_vm14, %v4009_v49, %v5763_v22  ;;  %v4043_v51 = vsel %vm4023_vm14, %v4010_v19, %v5764_v12 }
 0x3d7   : > { %v5772_v32 = vpop.permute.xlu1 %5771  ;;  %v4075_v37 = vsel %vm4056_vm15, %v4042_v53, %v5768_v46  ;;  %v4076_v45 = vsel %vm4056_vm15, %v4043_v51, %v5769_v23 }
 0x3d8   : > { %v5777_v8 = vpop.permute.xlu0 %5776  ;;  %v5774_v10 = vunpack.i.h.bf16 %v5772_v32  ;;  %v5773_v39 = vunpack.i.l.bf16 %v5772_v32 }
 0x3d9   : > { %v5779_v63 = vunpack.i.h.bf16 %v5777_v8  ;;  %v5778_v13 = vunpack.i.l.bf16 %v5777_v8  ;;  %4245 = vmatpush2.bf16.xpose.msra.mxu1 %v4142_v11 }
 0x3da   : > { %4393 = vmatprep.subr.msk.bf16.mxu1 %vm311_vm3, %v4141_v25  ;;  %v4108_v14 = vsel %vm4089_vm0, %v4075_v37, %v5773_v39  ;;  %v4109_v48 = vsel %vm4089_vm0, %v4076_v45, %v5774_v10 }
 0x3db   : > { %v5782_v50 = vpop.permute.xlu1 %5781  ;;  %v3941_v38 = vsel %vm1996_vm10, %v3909_v29, %v5778_v13  ;;  %v3942_v4 = vsel %vm1996_vm10, %v3910_v42, %v5779_v63  ;;  %v4140_v6 = vpack.c.bf16 %v4109_v48, %v4108_v14 }
 0x3dc   : > { %v5787_v28 = vpop.permute.xlu0 %5786  ;;  %v5784_v41 = vunpack.i.h.bf16 %v5782_v50  ;;  %v5783_v52 = vunpack.i.l.bf16 %v5782_v50 }
 0x3dd   : > { %v5789_v16 = vunpack.i.h.bf16 %v5787_v28  ;;  %v5788_v21 = vunpack.i.l.bf16 %v5787_v28 }
 0x3de   : > { %v3975_v7 = vsel %vm3957_vm5, %v3942_v4, %v5784_v41  ;;  %v3974_v30 = vsel %vm3957_vm5, %v3941_v38, %v5783_v52 }
 0x3df   : > { %v5792_v43 = vpop.permute.xlu1 %5791  ;;  %v4007_v36 = vsel %vm3990_vm13, %v3974_v30, %v5788_v21  ;;  %v4008_v18 = vsel %vm3990_vm13, %v3975_v7, %v5789_v16 }
 0x3e0   : > { %v5797_v44 = vpop.permute.xlu0 %5796  ;;  %v5794_v5 = vunpack.i.h.bf16 %v5792_v43  ;;  %v5793_v15 = vunpack.i.l.bf16 %v5792_v43 }
 0x3e1   : > { %v5799_v61 = vunpack.i.h.bf16 %v5797_v44  ;;  %v5798_v27 = vunpack.i.l.bf16 %v5797_v44  ;;  %4247 = vmatpush2.bf16.xpose.msra.mxu1 %v4140_v6 }
 0x3e2   : > { %v4040_v9 = vsel %vm4023_vm14, %v4007_v36, %v5793_v15  ;;  %v4041_v55 = vsel %vm4023_vm14, %v4008_v18, %v5794_v5  ;;  %4394 = vmatprep.subr.msk.bf16.mxu1 %vm311_vm3, %v4139_v40 }
 0x3e3   : > { %v5802_v0 = vpop.permute.xlu1 %5801  ;;  %v4073_v57 = vsel %vm4056_vm15, %v4040_v9, %v5798_v27  ;;  %v4074_v59 = vsel %vm4056_vm15, %v4041_v55, %v5799_v61 }
 0x3e4   : > { %v5804_v56 = vunpack.i.h.bf16 %v5802_v0  ;;  %v5803_v35 = vunpack.i.l.bf16 %v5802_v0 }
 0x3e6   : > { %v4106_v24 = vsel %vm4089_vm0, %v4073_v57, %v5803_v35  ;;  %v4107_v54 = vsel %vm4089_vm0, %v4074_v59, %v5804_v56 }
 0x3e7   : > { %v4138_v31 = vpack.c.bf16 %v4107_v54, %v4106_v24 }
 0x3e9   : > { %4249 = vmatpush2.bf16.xpose.msra.mxu1 %v4138_v31 }
 0x3ed   : > { %v4159_v60 = vpop.permute.xlu0 %4158 }
 0x3f0   : > { %4251 = vmatmul.mubr.bf16.vlgmr.msra.gmra.mxu1 %v4377_v17 }
 0x4b0   : > { %v4252_v1 = vpop.f32.mrf.mxu1 }
 0x4b1   : > { %v4253_v2 = vadd.f32 %v4252_v1, %v4159_v60 }
 0x4b2   : > { %v4254_v12 = vpop.f32.mrf.mxu1 }
 0x4b3   : > { %4259 = vst [vmem:[%s258_s28] sm:$0xff] %v4253_v2  ;;  %v4255_v22 = vadd.f32 %v4254_v12, %v4159_v60 }
 0x4b4   : > { %v4256_v34 = vpop.f32.mrf.mxu1 }
 0x4b5   : > { %4260 = vst [vmem:[%s258_s28 + $0x8] sm:$0xff] %v4255_v22 }
 0x4b6   : > { %v4257_v58 = vpop.f32.mrf.mxu1 }
 0x4b7   : > { %5860 = shalt.err (!%p5857_p2)
}
 0x4b8   : > { %s5861_s15 = scalar_lea.hbm %s8623_s11, 256  ;;  %s5865_s18 = scalar_lea.hbm %s8670_s6, 512 }
 0x4b9   : > { %p5862_p3 = scmp.ne.s32.totalorder %s8623_s11, %s5861_s15  ;;  %p5866_p8 = scmp.lt.s32.totalorder %s8623_s11, %s8670_s6 }
 0x4ba   : > { %p5867_p11 = scmp.lt.s32.totalorder %s5865_s18, %s5861_s15 }
 0x4bb   : > { %p5863_p4 = pnand %p5862_p3, %p6003_p5 }
 0x4bc   : > { %p5868_p9 = por %p5867_p11, %p5866_p8 }
 0x4bd   : > { %p5864_p7 = pneg %p5863_p4 }
 0x4bf   : > { %p5869_p10 = pnand %p5868_p9, %p5864_p7 }
 0x4c1   : > { %5872 = shalt.err (!%p5869_p10)
}
 0x4c2   : > { %4544 = dma.vmem_to_hbm [thread:$0]  (%p6003_p5), %s8625_s9, 256, %s8623_s11, %s4262_s25  }
 0x4c3 PF: > { %p4556_p12 = scmp.ge.s32.totalorder %s5911_s24, 2  ;;  %s4288_s28 = sand.u32 1, %s5899_s21  }
 0x4c4   : > { %s4289_s10 = scalar_lea.sflag [#allocation5], %s4288_s28 }
 0x4c5   : > { %p4551_p13 = pnand %p4556_p12, %p6007_p6 }
 0x4c7   : > { %p4552_p0 = pneg %p4551_p13 }
 0x4c9   : > { %5894 = dma.done.wait (%p4552_p0), %s4289_s10, 256  }
 0x4ca   : > { %5896 = vsyncadd (%p4552_p0), %s4289_s10, 4294967040  ;;  %p17_p1 = scmp.ge.s32.totalorder %s5990_s27, 4   ;;  %s8806_s21 = smov %s5903_s22 }
 0x4cb   : > { %s8807_s22 = smov %s5907_s23  ;;  %s8808_s23 = smov %s6001_s30 }
 0x4cc   : > { %s8809_s24 = smov %s5990_s27  ;;  %19 = sbr.rel (!%p17_p1) target bundleno = 4 (0x4), region = 90 }
 0x4d1   :  { %4294 = vsyncpa [#allocation5], 1 }
 0x4d2   :  { %4296 = vsyncpa [#allocation5 + $0x1], 1 }
 0x4d3   :  { %4297 = vsyncpa [#allocation6], 1 }
 0x4d4   :  { %4299 = vsyncpa [#allocation6 + $0x1], 1 }

</bundles_post_ra>
